<compile_context>
chip_gen: v6e
topology: v6e:2x2x1
jax: 0.10.0
libtpu: 0.0.40
codegen_flags: <defaults>
</compile_context>

<pallas_src>
import functools

import jax
import jax.numpy as jnp
import numpy as np
from jax import lax
from jax.experimental import pallas as pl
from jax.experimental.pallas import tpu as pltpu


def _round_up(x, m):
    return (x + m - 1) // m * m


def narm_kernel(enc_ref, lens_ref, att_ref,
                w_ih_ref, w_hh_ref, b_ih_ref, b_hh_ref,
                w_a1_ref, w_a2_ref, w_vt_ref, w_lt_ref,
                out_ref,
                gi_scr, go_scr,
                *, cdt, chunk, unroll, approx_recip):
    """One batch tile of the NARM forward pass.

    enc_ref   : [N, TB, HP] f32   w_ih/w_hh : [HP, 3HP] cdt (fused gates r|z|n)
    lens_ref  : [TB, 1]     i32   b_ih/b_hh : [1, 3HP]  f32
    att_ref   : [TB, M, HP] f32   w_a1/w_a2 : [HP, HP]  cdt
    out_ref   : [TB, M]     f32   w_vt      : [1, HP]   f32 (VPU-only)
    gi_scr    : [N, TB, 3HP] cdt  w_lt      : [2, HP, HP] cdt
    go_scr    : [N, TB, HP]  cdt
    """
    N, TB, HP = enc_ref.shape
    f32 = jnp.float32
    C = chunk
    n_chunks = N // C

    # ---- stage 1: hoisted GRU input projection, in time chunks of C steps ----------
    # Each chunk is a (C*TB, HP) x (HP, 3HP) MXU matmul; TB % 8 == 0 and HP % 128 == 0
    # so the reshape is tile-aligned.  Chunking bounds the f32 temporaries to
    # O(C*TB*3HP) instead of O(N*TB*3HP).
    w_ih = w_ih_ref[...]
    b_ih = b_ih_ref[...]

    def gi_chunk(ci, carry):
        t0 = pl.multiple_of(ci * C, C)
        x = enc_ref[pl.ds(t0, C)].reshape(C * TB, HP).astype(cdt)
        g = jnp.dot(x, w_ih, preferred_element_type=f32) + b_ih
        gi_scr[pl.ds(t0, C)] = g.reshape(C, TB, 3 * HP).astype(gi_scr.dtype)
        return carry

    lax.fori_loop(0, n_chunks, gi_chunk, 0)

    # ---- stage 2: serial GRU recurrence; only h @ W_hh stays on the critical path ---
    w_hh = w_hh_ref[...]
    b_hh = b_hh_ref[...]
    lens = lens_ref[...]                                   # [TB, 1] int32

    def gru_step(t, h):
        gi_t = gi_scr[t].astype(f32)                       # [TB, 3HP]
        gh = jnp.dot(h.astype(cdt), w_hh, preferred_element_type=f32) + b_hh
        r = jax.nn.sigmoid(gi_t[:, 0 * HP:1 * HP] + gh[:, 0 * HP:1 * HP])
        z = jax.nn.sigmoid(gi_t[:, 1 * HP:2 * HP] + gh[:, 1 * HP:2 * HP])
        n = jnp.tanh(gi_t[:, 2 * HP:3 * HP] + r * gh[:, 2 * HP:3 * HP])
        h_new = n + z * (h - n)                            # == (1 - z) * n + z * h
        v = t < lens                                       # [TB, 1] bool, in-kernel mask
        go_scr[t] = jnp.where(v, h_new, 0.0).astype(go_scr.dtype)   # pad_packed zeros
        return jnp.where(v, h_new, h)                      # freeze h past the length

    h0 = jnp.zeros((TB, HP), f32)
    ht = lax.fori_loop(0, N, gru_step, h0, unroll=unroll)  # hidden[-1] == c_global

    # ---- stage 3: NARM attention, streamed over time chunks ------------------------
    q2 = jnp.dot(ht.astype(cdt), w_a2_ref[...], preferred_element_type=f32)  # [TB, HP]
    w_a1 = w_a1_ref[...]
    w_vt = w_vt_ref[...]                                   # [1, HP]

    def attn_chunk(ci, c_loc):
        t0 = pl.multiple_of(ci * C, C)
        go_c = go_scr[pl.ds(t0, C)]                        # [C, TB, HP]
        enc_c = enc_ref[pl.ds(t0, C)]                      # [C, TB, HP]
        q1 = jnp.dot(go_c.reshape(C * TB, HP).astype(cdt), w_a1,
                     preferred_element_type=f32).reshape(C, TB, HP)
        # literal PyTorch semantics: (enc == 0) mask, fused into one select
        s = jax.nn.sigmoid(q1 + jnp.where(enc_c != 0.0, q2[None, :, :], 0.0))
        # v_t(s) is a width-1 matmul -> VPU multiply + lane reduce instead of MXU
        alpha = jnp.sum(s * w_vt[None, :, :], axis=-1, keepdims=True)   # [C, TB, 1]
        return c_loc + jnp.sum(alpha * go_c.astype(f32), axis=0)        # [TB, HP]

    c_local = lax.fori_loop(0, n_chunks, attn_chunk, jnp.zeros((TB, HP), f32))

    # linear_transform(cat([c_local, c_global])) with the weight pre-split in two halves
    c_t = (jnp.dot(c_local.astype(cdt), w_lt_ref[0], preferred_element_type=f32)
           + jnp.dot(ht.astype(cdt), w_lt_ref[1], preferred_element_type=f32))  # [TB, HP]

    # att_weight[b, m] = <c_t[b], att[b, m]>  (M is tiny -> VPU multiply + lane reduce)
    logits = jnp.sum(att_ref[...] * c_t[:, None, :], axis=-1)           # [TB, M]
    logits = logits - jnp.max(logits, axis=1, keepdims=True)
    e = jnp.exp(logits)
    denom = jnp.sum(e, axis=1, keepdims=True)
    if approx_recip:
        out_ref[...] = e * pl.reciprocal(denom, approx=True)  # EUP, otherwise-idle slot
    else:
        out_ref[...] = e / denom


def _pick_chunk(N, TB, target_rows=512):
    """Largest divisor of N whose chunk matmul has <= ~target_rows rows."""
    c = 1
    for d in range(1, N + 1):
        if N % d == 0 and d * TB <= target_rows:
            c = d
    return c


def narm_pallas(enc_input, att_input, lengths, params, *, precise=True, batch_tile=None):
    """enc_input: [B, N, H], att_input: [B, M, H], lengths: [B] int32.

    precise=True : f32 MXU inputs + exact division (matches the f32 reference tightly).
    precise=False: bf16 MXU inputs / bf16 gi+gru_out scratch / f32 gate math +
                   approx EUP reciprocal (fast path on v6e/v7x; error grows with N).
    """
    B, N, H = enc_input.shape
    M = att_input.shape[1]
    HP = _round_up(H, 128)                       # lane-dense hidden / feature dim
    cdt = jnp.float32 if precise else jnp.bfloat16
    f32 = jnp.float32

    # ---- batch tile: fill MXU rows, but keep >=2 grid steps for v7x megacore -------
    bp8 = _round_up(B, 8)
    if batch_tile is None:
        if bp8 <= 32:
            batch_tile = bp8                      # tiny batch: one tile
        elif bp8 <= 512:
            batch_tile = _round_up((bp8 + 1) // 2, 8)   # >=2 tiles, <=256 rows each
        else:
            batch_tile = 256                      # v6e/v7x MXU rows; pass 128 on v5e
    TB = _round_up(batch_tile, 8)

    # ---- honest per-tile VMEM estimate (double-buffering + padding + temporaries) ---
    cb = jnp.dtype(cdt).itemsize
    m8 = _round_up(M, 8)

    def vmem_bytes(tb):
        c = _pick_chunk(N, tb)
        est = 0
        est += 2 * N * tb * HP * 4                          # enc (double-buffered)
        est += 2 * tb * 128 * 4                             # lens ([tb,1] lane-padded)
        est += 2 * tb * m8 * HP * 4                         # att
        est += 2 * tb * 128 * 4                             # out (M lane-padded)
        est += 2 * (2 * HP * 3 * HP + 4 * HP * HP) * cb     # weights, 2 buffers each
        est += 2 * (2 * 3 * HP + HP) * 8 * 4                # biases + v_t (sublane pad)
        est += N * tb * (3 * HP + HP) * cb                  # gi / gru_out scratch
        est += 6 * c * tb * 3 * HP * 4                      # per-chunk temporaries
        return est

    try:
        phys = int(pltpu.get_tpu_info().vmem_capacity_bytes)
    except Exception:
        phys = 64 * 1024 * 1024                  # conservative (v7x per-TC size)
    vmem_cap = max(24 * 1024 * 1024, phys - 16 * 1024 * 1024)   # leave compiler headroom

    while TB > 8 and vmem_bytes(TB) > vmem_cap:  # auto-shrink tile until it fits
        TB = max(8, _round_up(TB // 2, 8))
    BP = _round_up(B, TB)
    C = _pick_chunk(N, TB)
    est = vmem_bytes(TB)
    vmem_limit = int(min(vmem_cap, max(32 * 1024 * 1024, est + est // 4)))

    # ---- padded activations (stay f32; MXU casts happen in-kernel) ------------------
    enc_t = jnp.transpose(enc_input, (1, 0, 2)).astype(f32)
    enc_t = jnp.pad(enc_t, ((0, 0), (0, BP - B), (0, HP - H)))             # [N, BP, HP]
    lens2 = jnp.pad(lengths.astype(jnp.int32), (0, BP - B))[:, None]       # [BP, 1]
    att = jnp.pad(att_input.astype(f32),
                  ((0, BP - B), (0, 0), (0, HP - H)))                      # [BP, M, HP]

    # ---- fused + zero-padded parameters ---------------------------------------------
    def pad_mat(w):  # [H, H] -> [HP, HP]
        return jnp.pad(w, ((0, HP - H), (0, HP - H)))

    w_ih = jnp.concatenate([pad_mat(params['w_ih'][g]) for g in range(3)], axis=1).astype(cdt)
    w_hh = jnp.concatenate([pad_mat(params['w_hh'][g]) for g in range(3)], axis=1).astype(cdt)
    b_ih = jnp.concatenate([jnp.pad(params['b_ih'][g], ((0, 0), (0, HP - H)))
                            for g in range(3)], axis=1)                    # [1, 3HP] f32
    b_hh = jnp.concatenate([jnp.pad(params['b_hh'][g], ((0, 0), (0, HP - H)))
                            for g in range(3)], axis=1)                    # [1, 3HP] f32
    w_a1 = pad_mat(params['w_a1']).astype(cdt)
    w_a2 = pad_mat(params['w_a2']).astype(cdt)
    w_vt = jnp.pad(params['w_vt'][:, 0][None, :], ((0, 0), (0, HP - H)))   # [1, HP] f32
    w_lt = jnp.stack([pad_mat(params['w_lt'][0]),
                      pad_mat(params['w_lt'][1])]).astype(cdt)             # [2, HP, HP]

    kernel = functools.partial(narm_kernel, cdt=cdt, chunk=C,
                               unroll=min(N, 8), approx_recip=not precise)

    out = pl.pallas_call(
        kernel,
        out_shape=jax.ShapeDtypeStruct((BP, M), jnp.float32),
        grid=(BP // TB,),
        in_specs=[
            pl.BlockSpec((N, TB, HP), lambda b: (0, b, 0)),     # enc (time-major)
            pl.BlockSpec((TB, 1), lambda b: (b, 0)),            # lengths (int32)
            pl.BlockSpec((TB, M, HP), lambda b: (b, 0, 0)),     # att_input
            pl.BlockSpec((HP, 3 * HP), lambda b: (0, 0)),       # W_ih (fused gates)
            pl.BlockSpec((HP, 3 * HP), lambda b: (0, 0)),       # W_hh (fused gates)
            pl.BlockSpec((1, 3 * HP), lambda b: (0, 0)),        # b_ih
            pl.BlockSpec((1, 3 * HP), lambda b: (0, 0)),        # b_hh
            pl.BlockSpec((HP, HP), lambda b: (0, 0)),           # a_1
            pl.BlockSpec((HP, HP), lambda b: (0, 0)),           # a_2
            pl.BlockSpec((1, HP), lambda b: (0, 0)),            # v_t (as a lane row)
            pl.BlockSpec((2, HP, HP), lambda b: (0, 0, 0)),     # linear_transform halves
        ],
        out_specs=pl.BlockSpec((TB, M), lambda b: (b, 0)),
        scratch_shapes=[
            pltpu.VMEM((N, TB, 3 * HP), cdt),   # hoisted input projections (bf16 on fast path)
            pltpu.VMEM((N, TB, HP), cdt),       # gru_out (zero-padded past lengths)
        ],
        compiler_params=pltpu.CompilerParams(
            dimension_semantics=("parallel",),  # shard batch tiles across TCs (v7x)
            vmem_limit_bytes=vmem_limit),
    )(enc_t, lens2, att, w_ih, w_hh, b_ih, b_hh, w_a1, w_a2, w_vt, w_lt)

    return out[:B]


def narm_reference(enc_input, att_input, lengths, params):
    """Pure-JAX f32 reference mirroring the PyTorch forward semantics."""
    B, N, H = enc_input.shape
    enc = jnp.transpose(enc_input, (1, 0, 2)).astype(jnp.float32)            # [N, B, H]
    valid = (jnp.arange(N)[:, None] < lengths[None, :]).astype(jnp.float32)  # [N, B]

    def step(h, inp):
        x, v = inp
        gi_r = x @ params['w_ih'][0] + params['b_ih'][0]
        gi_z = x @ params['w_ih'][1] + params['b_ih'][1]
        gi_n = x @ params['w_ih'][2] + params['b_ih'][2]
        gh_r = h @ params['w_hh'][0] + params['b_hh'][0]
        gh_z = h @ params['w_hh'][1] + params['b_hh'][1]
        gh_n = h @ params['w_hh'][2] + params['b_hh'][2]
        r = jax.nn.sigmoid(gi_r + gh_r)
        z = jax.nn.sigmoid(gi_z + gh_z)
        n = jnp.tanh(gi_n + r * gh_n)
        h_new = (1.0 - z) * n + z * h
        v = v[:, None]
        return v * h_new + (1.0 - v) * h, v * h_new

    h0 = jnp.zeros((B, H), jnp.float32)
    ht, go = lax.scan(step, h0, (enc, valid))
    q1 = go @ params['w_a1']
    q2 = ht @ params['w_a2']
    mask = jnp.where(enc == 0.0, 0.0, 1.0)
    s = jax.nn.sigmoid(q1 + mask * q2[None])
    alpha = s @ params['w_vt']                           # [N, B, 1]
    c_local = jnp.sum(alpha * go, axis=0)
    c_t = c_local @ params['w_lt'][0] + ht @ params['w_lt'][1]
    att_w = jnp.einsum('bh,bmh->bm', c_t, att_input.astype(jnp.float32))
    return jax.nn.softmax(att_w, axis=1)


def init_params(key, H):
    ks = jax.random.split(key, 8)
    scale = 1.0 / np.sqrt(H)
    u = lambda k, shape: jax.random.uniform(k, shape, jnp.float32, -scale, scale)
    return {
        # nn.GRU weights, gate order (r, z, n), stored pre-transposed as [3, in, out]
        'w_ih': u(ks[0], (3, H, H)),
        'w_hh': u(ks[1], (3, H, H)),
        'b_ih': u(ks[2], (3, 1, H)),
        'b_hh': u(ks[3], (3, 1, H)),
        'w_a1': u(ks[4], (H, H)),        # a_1 (bias-free), pre-transposed
        'w_a2': u(ks[5], (H, H)),        # a_2
        'w_vt': u(ks[6], (H, 1)),        # v_t
        'w_lt': u(ks[7], (2, H, H)),     # linear_transform split: [c_local | c_global]
    }


if __name__ == "__main__":
    B, N, M, H = 2, 8, 6, 32   # batch, N-action, M-action, n_features=emb_dim=hidden_size
    key = jax.random.PRNGKey(0)
    k_enc, k_att, k_par = jax.random.split(key, 3)

    lengths = jnp.array([8, 5], dtype=jnp.int32)          # sorted descending, max == N
    enc_input = jax.random.normal(k_enc, (B, N, H), jnp.float32)
    pad_mask = (jnp.arange(N)[None, :] < lengths[:, None]).astype(jnp.float32)
    enc_input = enc_input * pad_mask[:, :, None]          # zero out padded timesteps
    att_input = jax.random.normal(k_att, (B, M, H), jnp.float32)
    params = init_params(k_par, H)

    ref = narm_reference(enc_input, att_input, lengths, params)

    # precise path: f32 MXU + exact division, checked tightly against the reference
    out = jax.jit(functools.partial(narm_pallas, precise=True))(
        enc_input, att_input, lengths, params)
    out = jax.block_until_ready(out)
    np.testing.assert_allclose(np.asarray(out), np.asarray(ref), rtol=1e-4, atol=1e-5)

    # fast path (v6e/v7x): bf16 MXU inputs / bf16 scratch + approx EUP reciprocal
    out_fast = jax.jit(functools.partial(narm_pallas, precise=False))(
        enc_input, att_input, lengths, params)
    out_fast = jax.block_until_ready(out_fast)
    np.testing.assert_allclose(np.asarray(out_fast), np.asarray(ref), atol=0.1)

    print("KERNEL_OK")
</pallas_src>

<mosaic_0001>
module attributes {stable_mosaic.version = 11 : i64} {
  func.func @narm_kernel(%arg0: i32, %arg1: memref<8x8x128xf32, #tpu.memory_space<vmem>>, %arg2: memref<8x1xi32, #tpu.memory_space<vmem>>, %arg3: memref<8x6x128xf32, #tpu.memory_space<vmem>>, %arg4: memref<128x384xf32, #tpu.memory_space<vmem>>, %arg5: memref<128x384xf32, #tpu.memory_space<vmem>>, %arg6: memref<1x384xf32, #tpu.memory_space<vmem>>, %arg7: memref<1x384xf32, #tpu.memory_space<vmem>>, %arg8: memref<128x128xf32, #tpu.memory_space<vmem>>, %arg9: memref<128x128xf32, #tpu.memory_space<vmem>>, %arg10: memref<1x128xf32, #tpu.memory_space<vmem>>, %arg11: memref<2x128x128xf32, #tpu.memory_space<vmem>>, %arg12: memref<8x6xf32, #tpu.memory_space<vmem>>, %arg13: memref<8x8x384xf32, #tpu.memory_space<vmem>>, %arg14: memref<8x8x128xf32, #tpu.memory_space<vmem>>) attributes {dimension_semantics = [#tpu.dimension_semantics<parallel>], iteration_bounds = array<i64: 1>, scalar_prefetch = 0 : i64, scratch_operands = 2 : i64, tpu.core_type = #tpu.core_type<tc>, window_params = [{transform_indices = @transform_0, window_bounds = array<i64: 8, 8, 128>}, {transform_indices = @transform_1, window_bounds = array<i64: 8, 1>}, {transform_indices = @transform_2, window_bounds = array<i64: 8, 6, 128>}, {pipeline_mode = #tpu.pipeline_mode<synchronous>, transform_indices = @transform_3, window_bounds = array<i64: 128, 384>}, {pipeline_mode = #tpu.pipeline_mode<synchronous>, transform_indices = @transform_4, window_bounds = array<i64: 128, 384>}, {pipeline_mode = #tpu.pipeline_mode<synchronous>, transform_indices = @transform_5, window_bounds = array<i64: 1, 384>}, {pipeline_mode = #tpu.pipeline_mode<synchronous>, transform_indices = @transform_6, window_bounds = array<i64: 1, 384>}, {pipeline_mode = #tpu.pipeline_mode<synchronous>, transform_indices = @transform_7, window_bounds = array<i64: 128, 128>}, {pipeline_mode = #tpu.pipeline_mode<synchronous>, transform_indices = @transform_8, window_bounds = array<i64: 128, 128>}, {pipeline_mode = #tpu.pipeline_mode<synchronous>, transform_indices = @transform_9, window_bounds = array<i64: 1, 128>}, {pipeline_mode = #tpu.pipeline_mode<synchronous>, transform_indices = @transform_10, window_bounds = array<i64: 2, 128, 128>}, {transform_indices = @transform_11, window_bounds = array<i64: 8, 6>}]} {
    %c0 = arith.constant 0 : index
    %c0_0 = arith.constant 0 : index
    %0 = vector.load %arg4[%c0, %c0_0] : memref<128x384xf32, #tpu.memory_space<vmem>>, vector<128x384xf32>
    %c0_1 = arith.constant 0 : index
    %c0_2 = arith.constant 0 : index
    %1 = vector.load %arg6[%c0_1, %c0_2] : memref<1x384xf32, #tpu.memory_space<vmem>>, vector<1x384xf32>
    %c0_i32 = arith.constant 0 : i32
    %c8_i32 = arith.constant 8 : i32
    %2 = arith.muli %c0_i32, %c8_i32 : i32
    %3 = tpu.assume_multiple %2, 8 : i32
    %4 = arith.index_cast %3 : i32 to index
    %c0_3 = arith.constant 0 : index
    %c0_4 = arith.constant 0 : index
    %5 = vector.load %arg1[%4, %c0_3, %c0_4] : memref<8x8x128xf32, #tpu.memory_space<vmem>>, vector<8x8x128xf32>
    %6 = vector.shape_cast %5 : vector<8x8x128xf32> to vector<64x128xf32>
    %cst = arith.constant dense<0.000000e+00> : vector<64x384xf32>
    %7 = tpu.matmul %6, %0, %cst {dimension_numbers = #tpu.dot_dimension_numbers<[1], [0], [0], [1], [0, 0, 1, 1], [], []>} : vector<64x128xf32>, vector<128x384xf32>, vector<64x384xf32> -> vector<64x384xf32>
    %8 = vector.broadcast %1 : vector<1x384xf32> to vector<64x384xf32>
    %9 = arith.addf %7, %8 : vector<64x384xf32>
    %10 = vector.shape_cast %9 : vector<64x384xf32> to vector<8x8x384xf32>
    %11 = arith.index_cast %3 : i32 to index
    %c0_5 = arith.constant 0 : index
    %c0_6 = arith.constant 0 : index
    %12 = vector.load %arg13[%11, %c0_5, %c0_6] : memref<8x8x384xf32, #tpu.memory_space<vmem>>, vector<8x8x384xf32>
    tpu.vector_store %arg13[%11, %c0_5, %c0_6], %10 {strides = array<i32>} : memref<8x8x384xf32, #tpu.memory_space<vmem>>, vector<8x8x384xf32>,
    %c1_i32 = arith.constant 1 : i32
    %c0_7 = arith.constant 0 : index
    %c0_8 = arith.constant 0 : index
    %13 = vector.load %arg5[%c0_7, %c0_8] : memref<128x384xf32, #tpu.memory_space<vmem>>, vector<128x384xf32>
    %c0_9 = arith.constant 0 : index
    %c0_10 = arith.constant 0 : index
    %14 = vector.load %arg7[%c0_9, %c0_10] : memref<1x384xf32, #tpu.memory_space<vmem>>, vector<1x384xf32>
    %c0_11 = arith.constant 0 : index
    %c0_12 = arith.constant 0 : index
    %15 = vector.load %arg2[%c0_11, %c0_12] : memref<8x1xi32, #tpu.memory_space<vmem>>, vector<8x1xi32>
    %cst_13 = arith.constant 0.000000e+00 : f32
    %16 = vector.broadcast %cst_13 : f32 to vector<8x128xf32>
    %c0_i32_14 = arith.constant 0 : i32
    %17 = arith.index_cast %c0_i32_14 : i32 to index
    %c0_15 = arith.constant 0 : index
    %c0_16 = arith.constant 0 : index
    %18 = vector.load %arg13[%17, %c0_15, %c0_16] : memref<8x8x384xf32, #tpu.memory_space<vmem>>, vector<1x8x384xf32>
    %19 = vector.shape_cast %18 : vector<1x8x384xf32> to vector<8x384xf32>
    %cst_17 = arith.constant dense<0.000000e+00> : vector<8x384xf32>
    %20 = tpu.matmul %16, %13, %cst_17 {dimension_numbers = #tpu.dot_dimension_numbers<[1], [0], [0], [1], [0, 0, 1, 1], [], []>} : vector<8x128xf32>, vector<128x384xf32>, vector<8x384xf32> -> vector<8x384xf32>
    %21 = vector.broadcast %14 : vector<1x384xf32> to vector<8x384xf32>
    %22 = arith.addf %20, %21 : vector<8x384xf32>
    %23 = vector.extract_strided_slice %19 {offsets = [0, 0], sizes = [8, 128], strides = [1, 1]} : vector<8x384xf32> to vector<8x128xf32>
    %24 = vector.extract_strided_slice %22 {offsets = [0, 0], sizes = [8, 128], strides = [1, 1]} : vector<8x384xf32> to vector<8x128xf32>
    %25 = arith.addf %23, %24 : vector<8x128xf32>
    %26 = arith.negf %25 : vector<8x128xf32>
    %27 = math.exp %26 : vector<8x128xf32>
    %cst_18 = arith.constant 1.000000e+00 : f32
    %28 = vector.broadcast %cst_18 : f32 to vector<8x128xf32>
    %29 = arith.addf %28, %27 : vector<8x128xf32>
    %30 = arith.divf %28, %29 : vector<8x128xf32>
    %31 = vector.extract_strided_slice %19 {offsets = [0, 128], sizes = [8, 128], strides = [1, 1]} : vector<8x384xf32> to vector<8x128xf32>
    %32 = vector.extract_strided_slice %22 {offsets = [0, 128], sizes = [8, 128], strides = [1, 1]} : vector<8x384xf32> to vector<8x128xf32>
    %33 = arith.addf %31, %32 : vector<8x128xf32>
    %34 = arith.negf %33 : vector<8x128xf32>
    %35 = math.exp %34 : vector<8x128xf32>
    %cst_19 = arith.constant 1.000000e+00 : f32
    %36 = vector.broadcast %cst_19 : f32 to vector<8x128xf32>
    %37 = arith.addf %36, %35 : vector<8x128xf32>
    %38 = arith.divf %36, %37 : vector<8x128xf32>
    %39 = vector.extract_strided_slice %19 {offsets = [0, 256], sizes = [8, 128], strides = [1, 1]} : vector<8x384xf32> to vector<8x128xf32>
    %40 = vector.extract_strided_slice %22 {offsets = [0, 256], sizes = [8, 128], strides = [1, 1]} : vector<8x384xf32> to vector<8x128xf32>
    %41 = arith.mulf %30, %40 : vector<8x128xf32>
    %42 = arith.addf %39, %41 : vector<8x128xf32>
    %43 = math.tanh %42 : vector<8x128xf32>
    %44 = arith.subf %16, %43 : vector<8x128xf32>
    %45 = arith.mulf %38, %44 : vector<8x128xf32>
    %46 = arith.addf %43, %45 : vector<8x128xf32>
    %47 = vector.broadcast %c0_i32_14 : i32 to vector<8x1xi32>
    %48 = arith.cmpi slt, %47, %15 : vector<8x1xi32>
    %cst_20 = arith.constant 0.000000e+00 : f32
    %49 = vector.shape_cast %48 : vector<8x1xi1> to vector<8x1xi1>
    %50 = vector.broadcast %49 : vector<8x1xi1> to vector<8x128xi1>
    %51 = vector.broadcast %cst_20 : f32 to vector<8x128xf32>
    %52 = arith.select %50, %46, %51 : vector<8x128xi1>, vector<8x128xf32>
    %53 = arith.index_cast %c0_i32_14 : i32 to index
    %c0_21 = arith.constant 0 : index
    %c0_22 = arith.constant 0 : index
    %54 = vector.load %arg14[%53, %c0_21, %c0_22] : memref<8x8x128xf32, #tpu.memory_space<vmem>>, vector<1x8x128xf32>
    %55 = vector.shape_cast %54 : vector<1x8x128xf32> to vector<8x128xf32>
    %56 = vector.shape_cast %52 : vector<8x128xf32> to vector<1x8x128xf32>
    tpu.vector_store %arg14[%53, %c0_21, %c0_22], %56 {strides = array<i32>} : memref<8x8x128xf32, #tpu.memory_space<vmem>>, vector<1x8x128xf32>,
    %57 = vector.shape_cast %48 : vector<8x1xi1> to vector<8x1xi1>
    %58 = vector.broadcast %57 : vector<8x1xi1> to vector<8x128xi1>
    %59 = arith.select %58, %46, %16 : vector<8x128xi1>, vector<8x128xf32>
    %c1_i32_23 = arith.constant 1 : i32
    %60 = arith.index_cast %c1_i32_23 : i32 to index
    %c0_24 = arith.constant 0 : index
    %c0_25 = arith.constant 0 : index
    %61 = vector.load %arg13[%60, %c0_24, %c0_25] : memref<8x8x384xf32, #tpu.memory_space<vmem>>, vector<1x8x384xf32>
    %62 = vector.shape_cast %61 : vector<1x8x384xf32> to vector<8x384xf32>
    %cst_26 = arith.constant dense<0.000000e+00> : vector<8x384xf32>
    %63 = tpu.matmul %59, %13, %cst_26 {dimension_numbers = #tpu.dot_dimension_numbers<[1], [0], [0], [1], [0, 0, 1, 1], [], []>} : vector<8x128xf32>, vector<128x384xf32>, vector<8x384xf32> -> vector<8x384xf32>
    %64 = vector.broadcast %14 : vector<1x384xf32> to vector<8x384xf32>
    %65 = arith.addf %63, %64 : vector<8x384xf32>
    %66 = vector.extract_strided_slice %62 {offsets = [0, 0], sizes = [8, 128], strides = [1, 1]} : vector<8x384xf32> to vector<8x128xf32>
    %67 = vector.extract_strided_slice %65 {offsets = [0, 0], sizes = [8, 128], strides = [1, 1]} : vector<8x384xf32> to vector<8x128xf32>
    %68 = arith.addf %66, %67 : vector<8x128xf32>
    %69 = arith.negf %68 : vector<8x128xf32>
    %70 = math.exp %69 : vector<8x128xf32>
    %cst_27 = arith.constant 1.000000e+00 : f32
    %71 = vector.broadcast %cst_27 : f32 to vector<8x128xf32>
    %72 = arith.addf %71, %70 : vector<8x128xf32>
    %73 = arith.divf %71, %72 : vector<8x128xf32>
    %74 = vector.extract_strided_slice %62 {offsets = [0, 128], sizes = [8, 128], strides = [1, 1]} : vector<8x384xf32> to vector<8x128xf32>
    %75 = vector.extract_strided_slice %65 {offsets = [0, 128], sizes = [8, 128], strides = [1, 1]} : vector<8x384xf32> to vector<8x128xf32>
    %76 = arith.addf %74, %75 : vector<8x128xf32>
    %77 = arith.negf %76 : vector<8x128xf32>
    %78 = math.exp %77 : vector<8x128xf32>
    %cst_28 = arith.constant 1.000000e+00 : f32
    %79 = vector.broadcast %cst_28 : f32 to vector<8x128xf32>
    %80 = arith.addf %79, %78 : vector<8x128xf32>
    %81 = arith.divf %79, %80 : vector<8x128xf32>
    %82 = vector.extract_strided_slice %62 {offsets = [0, 256], sizes = [8, 128], strides = [1, 1]} : vector<8x384xf32> to vector<8x128xf32>
    %83 = vector.extract_strided_slice %65 {offsets = [0, 256], sizes = [8, 128], strides = [1, 1]} : vector<8x384xf32> to vector<8x128xf32>
    %84 = arith.mulf %73, %83 : vector<8x128xf32>
    %85 = arith.addf %82, %84 : vector<8x128xf32>
    %86 = math.tanh %85 : vector<8x128xf32>
    %87 = arith.subf %59, %86 : vector<8x128xf32>
    %88 = arith.mulf %81, %87 : vector<8x128xf32>
    %89 = arith.addf %86, %88 : vector<8x128xf32>
    %90 = vector.broadcast %c1_i32_23 : i32 to vector<8x1xi32>
    %91 = arith.cmpi slt, %90, %15 : vector<8x1xi32>
    %cst_29 = arith.constant 0.000000e+00 : f32
    %92 = vector.shape_cast %91 : vector<8x1xi1> to vector<8x1xi1>
    %93 = vector.broadcast %92 : vector<8x1xi1> to vector<8x128xi1>
    %94 = vector.broadcast %cst_29 : f32 to vector<8x128xf32>
    %95 = arith.select %93, %89, %94 : vector<8x128xi1>, vector<8x128xf32>
    %96 = arith.index_cast %c1_i32_23 : i32 to index
    %c0_30 = arith.constant 0 : index
    %c0_31 = arith.constant 0 : index
    %97 = vector.load %arg14[%96, %c0_30, %c0_31] : memref<8x8x128xf32, #tpu.memory_space<vmem>>, vector<1x8x128xf32>
    %98 = vector.shape_cast %97 : vector<1x8x128xf32> to vector<8x128xf32>
    %99 = vector.shape_cast %95 : vector<8x128xf32> to vector<1x8x128xf32>
    tpu.vector_store %arg14[%96, %c0_30, %c0_31], %99 {strides = array<i32>} : memref<8x8x128xf32, #tpu.memory_space<vmem>>, vector<1x8x128xf32>,
    %100 = vector.shape_cast %91 : vector<8x1xi1> to vector<8x1xi1>
    %101 = vector.broadcast %100 : vector<8x1xi1> to vector<8x128xi1>
    %102 = arith.select %101, %89, %59 : vector<8x128xi1>, vector<8x128xf32>
    %c2_i32 = arith.constant 2 : i32
    %103 = arith.index_cast %c2_i32 : i32 to index
    %c0_32 = arith.constant 0 : index
    %c0_33 = arith.constant 0 : index
    %104 = vector.load %arg13[%103, %c0_32, %c0_33] : memref<8x8x384xf32, #tpu.memory_space<vmem>>, vector<1x8x384xf32>
    %105 = vector.shape_cast %104 : vector<1x8x384xf32> to vector<8x384xf32>
    %cst_34 = arith.constant dense<0.000000e+00> : vector<8x384xf32>
    %106 = tpu.matmul %102, %13, %cst_34 {dimension_numbers = #tpu.dot_dimension_numbers<[1], [0], [0], [1], [0, 0, 1, 1], [], []>} : vector<8x128xf32>, vector<128x384xf32>, vector<8x384xf32> -> vector<8x384xf32>
    %107 = vector.broadcast %14 : vector<1x384xf32> to vector<8x384xf32>
    %108 = arith.addf %106, %107 : vector<8x384xf32>
    %109 = vector.extract_strided_slice %105 {offsets = [0, 0], sizes = [8, 128], strides = [1, 1]} : vector<8x384xf32> to vector<8x128xf32>
    %110 = vector.extract_strided_slice %108 {offsets = [0, 0], sizes = [8, 128], strides = [1, 1]} : vector<8x384xf32> to vector<8x128xf32>
    %111 = arith.addf %109, %110 : vector<8x128xf32>
    %112 = arith.negf %111 : vector<8x128xf32>
    %113 = math.exp %112 : vector<8x128xf32>
    %cst_35 = arith.constant 1.000000e+00 : f32
    %114 = vector.broadcast %cst_35 : f32 to vector<8x128xf32>
    %115 = arith.addf %114, %113 : vector<8x128xf32>
    %116 = arith.divf %114, %115 : vector<8x128xf32>
    %117 = vector.extract_strided_slice %105 {offsets = [0, 128], sizes = [8, 128], strides = [1, 1]} : vector<8x384xf32> to vector<8x128xf32>
    %118 = vector.extract_strided_slice %108 {offsets = [0, 128], sizes = [8, 128], strides = [1, 1]} : vector<8x384xf32> to vector<8x128xf32>
    %119 = arith.addf %117, %118 : vector<8x128xf32>
    %120 = arith.negf %119 : vector<8x128xf32>
    %121 = math.exp %120 : vector<8x128xf32>
    %cst_36 = arith.constant 1.000000e+00 : f32
    %122 = vector.broadcast %cst_36 : f32 to vector<8x128xf32>
    %123 = arith.addf %122, %121 : vector<8x128xf32>
    %124 = arith.divf %122, %123 : vector<8x128xf32>
    %125 = vector.extract_strided_slice %105 {offsets = [0, 256], sizes = [8, 128], strides = [1, 1]} : vector<8x384xf32> to vector<8x128xf32>
    %126 = vector.extract_strided_slice %108 {offsets = [0, 256], sizes = [8, 128], strides = [1, 1]} : vector<8x384xf32> to vector<8x128xf32>
    %127 = arith.mulf %116, %126 : vector<8x128xf32>
    %128 = arith.addf %125, %127 : vector<8x128xf32>
    %129 = math.tanh %128 : vector<8x128xf32>
    %130 = arith.subf %102, %129 : vector<8x128xf32>
    %131 = arith.mulf %124, %130 : vector<8x128xf32>
    %132 = arith.addf %129, %131 : vector<8x128xf32>
    %133 = vector.broadcast %c2_i32 : i32 to vector<8x1xi32>
    %134 = arith.cmpi slt, %133, %15 : vector<8x1xi32>
    %cst_37 = arith.constant 0.000000e+00 : f32
    %135 = vector.shape_cast %134 : vector<8x1xi1> to vector<8x1xi1>
    %136 = vector.broadcast %135 : vector<8x1xi1> to vector<8x128xi1>
    %137 = vector.broadcast %cst_37 : f32 to vector<8x128xf32>
    %138 = arith.select %136, %132, %137 : vector<8x128xi1>, vector<8x128xf32>
    %139 = arith.index_cast %c2_i32 : i32 to index
    %c0_38 = arith.constant 0 : index
    %c0_39 = arith.constant 0 : index
    %140 = vector.load %arg14[%139, %c0_38, %c0_39] : memref<8x8x128xf32, #tpu.memory_space<vmem>>, vector<1x8x128xf32>
    %141 = vector.shape_cast %140 : vector<1x8x128xf32> to vector<8x128xf32>
    %142 = vector.shape_cast %138 : vector<8x128xf32> to vector<1x8x128xf32>
    tpu.vector_store %arg14[%139, %c0_38, %c0_39], %142 {strides = array<i32>} : memref<8x8x128xf32, #tpu.memory_space<vmem>>, vector<1x8x128xf32>,
    %143 = vector.shape_cast %134 : vector<8x1xi1> to vector<8x1xi1>
    %144 = vector.broadcast %143 : vector<8x1xi1> to vector<8x128xi1>
    %145 = arith.select %144, %132, %102 : vector<8x128xi1>, vector<8x128xf32>
    %c3_i32 = arith.constant 3 : i32
    %146 = arith.index_cast %c3_i32 : i32 to index
    %c0_40 = arith.constant 0 : index
    %c0_41 = arith.constant 0 : index
    %147 = vector.load %arg13[%146, %c0_40, %c0_41] : memref<8x8x384xf32, #tpu.memory_space<vmem>>, vector<1x8x384xf32>
    %148 = vector.shape_cast %147 : vector<1x8x384xf32> to vector<8x384xf32>
    %cst_42 = arith.constant dense<0.000000e+00> : vector<8x384xf32>
    %149 = tpu.matmul %145, %13, %cst_42 {dimension_numbers = #tpu.dot_dimension_numbers<[1], [0], [0], [1], [0, 0, 1, 1], [], []>} : vector<8x128xf32>, vector<128x384xf32>, vector<8x384xf32> -> vector<8x384xf32>
    %150 = vector.broadcast %14 : vector<1x384xf32> to vector<8x384xf32>
    %151 = arith.addf %149, %150 : vector<8x384xf32>
    %152 = vector.extract_strided_slice %148 {offsets = [0, 0], sizes = [8, 128], strides = [1, 1]} : vector<8x384xf32> to vector<8x128xf32>
    %153 = vector.extract_strided_slice %151 {offsets = [0, 0], sizes = [8, 128], strides = [1, 1]} : vector<8x384xf32> to vector<8x128xf32>
    %154 = arith.addf %152, %153 : vector<8x128xf32>
    %155 = arith.negf %154 : vector<8x128xf32>
    %156 = math.exp %155 : vector<8x128xf32>
    %cst_43 = arith.constant 1.000000e+00 : f32
    %157 = vector.broadcast %cst_43 : f32 to vector<8x128xf32>
    %158 = arith.addf %157, %156 : vector<8x128xf32>
    %159 = arith.divf %157, %158 : vector<8x128xf32>
    %160 = vector.extract_strided_slice %148 {offsets = [0, 128], sizes = [8, 128], strides = [1, 1]} : vector<8x384xf32> to vector<8x128xf32>
    %161 = vector.extract_strided_slice %151 {offsets = [0, 128], sizes = [8, 128], strides = [1, 1]} : vector<8x384xf32> to vector<8x128xf32>
    %162 = arith.addf %160, %161 : vector<8x128xf32>
    %163 = arith.negf %162 : vector<8x128xf32>
    %164 = math.exp %163 : vector<8x128xf32>
    %cst_44 = arith.constant 1.000000e+00 : f32
    %165 = vector.broadcast %cst_44 : f32 to vector<8x128xf32>
    %166 = arith.addf %165, %164 : vector<8x128xf32>
    %167 = arith.divf %165, %166 : vector<8x128xf32>
    %168 = vector.extract_strided_slice %148 {offsets = [0, 256], sizes = [8, 128], strides = [1, 1]} : vector<8x384xf32> to vector<8x128xf32>
    %169 = vector.extract_strided_slice %151 {offsets = [0, 256], sizes = [8, 128], strides = [1, 1]} : vector<8x384xf32> to vector<8x128xf32>
    %170 = arith.mulf %159, %169 : vector<8x128xf32>
    %171 = arith.addf %168, %170 : vector<8x128xf32>
    %172 = math.tanh %171 : vector<8x128xf32>
    %173 = arith.subf %145, %172 : vector<8x128xf32>
    %174 = arith.mulf %167, %173 : vector<8x128xf32>
    %175 = arith.addf %172, %174 : vector<8x128xf32>
    %176 = vector.broadcast %c3_i32 : i32 to vector<8x1xi32>
    %177 = arith.cmpi slt, %176, %15 : vector<8x1xi32>
    %cst_45 = arith.constant 0.000000e+00 : f32
    %178 = vector.shape_cast %177 : vector<8x1xi1> to vector<8x1xi1>
    %179 = vector.broadcast %178 : vector<8x1xi1> to vector<8x128xi1>
    %180 = vector.broadcast %cst_45 : f32 to vector<8x128xf32>
    %181 = arith.select %179, %175, %180 : vector<8x128xi1>, vector<8x128xf32>
    %182 = arith.index_cast %c3_i32 : i32 to index
    %c0_46 = arith.constant 0 : index
    %c0_47 = arith.constant 0 : index
    %183 = vector.load %arg14[%182, %c0_46, %c0_47] : memref<8x8x128xf32, #tpu.memory_space<vmem>>, vector<1x8x128xf32>
    %184 = vector.shape_cast %183 : vector<1x8x128xf32> to vector<8x128xf32>
    %185 = vector.shape_cast %181 : vector<8x128xf32> to vector<1x8x128xf32>
    tpu.vector_store %arg14[%182, %c0_46, %c0_47], %185 {strides = array<i32>} : memref<8x8x128xf32, #tpu.memory_space<vmem>>, vector<1x8x128xf32>,
    %186 = vector.shape_cast %177 : vector<8x1xi1> to vector<8x1xi1>
    %187 = vector.broadcast %186 : vector<8x1xi1> to vector<8x128xi1>
    %188 = arith.select %187, %175, %145 : vector<8x128xi1>, vector<8x128xf32>
    %c4_i32 = arith.constant 4 : i32
    %189 = arith.index_cast %c4_i32 : i32 to index
    %c0_48 = arith.constant 0 : index
    %c0_49 = arith.constant 0 : index
    %190 = vector.load %arg13[%189, %c0_48, %c0_49] : memref<8x8x384xf32, #tpu.memory_space<vmem>>, vector<1x8x384xf32>
    %191 = vector.shape_cast %190 : vector<1x8x384xf32> to vector<8x384xf32>
    %cst_50 = arith.constant dense<0.000000e+00> : vector<8x384xf32>
    %192 = tpu.matmul %188, %13, %cst_50 {dimension_numbers = #tpu.dot_dimension_numbers<[1], [0], [0], [1], [0, 0, 1, 1], [], []>} : vector<8x128xf32>, vector<128x384xf32>, vector<8x384xf32> -> vector<8x384xf32>
    %193 = vector.broadcast %14 : vector<1x384xf32> to vector<8x384xf32>
    %194 = arith.addf %192, %193 : vector<8x384xf32>
    %195 = vector.extract_strided_slice %191 {offsets = [0, 0], sizes = [8, 128], strides = [1, 1]} : vector<8x384xf32> to vector<8x128xf32>
    %196 = vector.extract_strided_slice %194 {offsets = [0, 0], sizes = [8, 128], strides = [1, 1]} : vector<8x384xf32> to vector<8x128xf32>
    %197 = arith.addf %195, %196 : vector<8x128xf32>
    %198 = arith.negf %197 : vector<8x128xf32>
    %199 = math.exp %198 : vector<8x128xf32>
    %cst_51 = arith.constant 1.000000e+00 : f32
    %200 = vector.broadcast %cst_51 : f32 to vector<8x128xf32>
    %201 = arith.addf %200, %199 : vector<8x128xf32>
    %202 = arith.divf %200, %201 : vector<8x128xf32>
    %203 = vector.extract_strided_slice %191 {offsets = [0, 128], sizes = [8, 128], strides = [1, 1]} : vector<8x384xf32> to vector<8x128xf32>
    %204 = vector.extract_strided_slice %194 {offsets = [0, 128], sizes = [8, 128], strides = [1, 1]} : vector<8x384xf32> to vector<8x128xf32>
    %205 = arith.addf %203, %204 : vector<8x128xf32>
    %206 = arith.negf %205 : vector<8x128xf32>
    %207 = math.exp %206 : vector<8x128xf32>
    %cst_52 = arith.constant 1.000000e+00 : f32
    %208 = vector.broadcast %cst_52 : f32 to vector<8x128xf32>
    %209 = arith.addf %208, %207 : vector<8x128xf32>
    %210 = arith.divf %208, %209 : vector<8x128xf32>
    %211 = vector.extract_strided_slice %191 {offsets = [0, 256], sizes = [8, 128], strides = [1, 1]} : vector<8x384xf32> to vector<8x128xf32>
    %212 = vector.extract_strided_slice %194 {offsets = [0, 256], sizes = [8, 128], strides = [1, 1]} : vector<8x384xf32> to vector<8x128xf32>
    %213 = arith.mulf %202, %212 : vector<8x128xf32>
    %214 = arith.addf %211, %213 : vector<8x128xf32>
    %215 = math.tanh %214 : vector<8x128xf32>
    %216 = arith.subf %188, %215 : vector<8x128xf32>
    %217 = arith.mulf %210, %216 : vector<8x128xf32>
    %218 = arith.addf %215, %217 : vector<8x128xf32>
    %219 = vector.broadcast %c4_i32 : i32 to vector<8x1xi32>
    %220 = arith.cmpi slt, %219, %15 : vector<8x1xi32>
    %cst_53 = arith.constant 0.000000e+00 : f32
    %221 = vector.shape_cast %220 : vector<8x1xi1> to vector<8x1xi1>
    %222 = vector.broadcast %221 : vector<8x1xi1> to vector<8x128xi1>
    %223 = vector.broadcast %cst_53 : f32 to vector<8x128xf32>
    %224 = arith.select %222, %218, %223 : vector<8x128xi1>, vector<8x128xf32>
    %225 = arith.index_cast %c4_i32 : i32 to index
    %c0_54 = arith.constant 0 : index
    %c0_55 = arith.constant 0 : index
    %226 = vector.load %arg14[%225, %c0_54, %c0_55] : memref<8x8x128xf32, #tpu.memory_space<vmem>>, vector<1x8x128xf32>
    %227 = vector.shape_cast %226 : vector<1x8x128xf32> to vector<8x128xf32>
    %228 = vector.shape_cast %224 : vector<8x128xf32> to vector<1x8x128xf32>
    tpu.vector_store %arg14[%225, %c0_54, %c0_55], %228 {strides = array<i32>} : memref<8x8x128xf32, #tpu.memory_space<vmem>>, vector<1x8x128xf32>,
    %229 = vector.shape_cast %220 : vector<8x1xi1> to vector<8x1xi1>
    %230 = vector.broadcast %229 : vector<8x1xi1> to vector<8x128xi1>
    %231 = arith.select %230, %218, %188 : vector<8x128xi1>, vector<8x128xf32>
    %c5_i32 = arith.constant 5 : i32
    %232 = arith.index_cast %c5_i32 : i32 to index
    %c0_56 = arith.constant 0 : index
    %c0_57 = arith.constant 0 : index
    %233 = vector.load %arg13[%232, %c0_56, %c0_57] : memref<8x8x384xf32, #tpu.memory_space<vmem>>, vector<1x8x384xf32>
    %234 = vector.shape_cast %233 : vector<1x8x384xf32> to vector<8x384xf32>
    %cst_58 = arith.constant dense<0.000000e+00> : vector<8x384xf32>
    %235 = tpu.matmul %231, %13, %cst_58 {dimension_numbers = #tpu.dot_dimension_numbers<[1], [0], [0], [1], [0, 0, 1, 1], [], []>} : vector<8x128xf32>, vector<128x384xf32>, vector<8x384xf32> -> vector<8x384xf32>
    %236 = vector.broadcast %14 : vector<1x384xf32> to vector<8x384xf32>
    %237 = arith.addf %235, %236 : vector<8x384xf32>
    %238 = vector.extract_strided_slice %234 {offsets = [0, 0], sizes = [8, 128], strides = [1, 1]} : vector<8x384xf32> to vector<8x128xf32>
    %239 = vector.extract_strided_slice %237 {offsets = [0, 0], sizes = [8, 128], strides = [1, 1]} : vector<8x384xf32> to vector<8x128xf32>
    %240 = arith.addf %238, %239 : vector<8x128xf32>
    %241 = arith.negf %240 : vector<8x128xf32>
    %242 = math.exp %241 : vector<8x128xf32>
    %cst_59 = arith.constant 1.000000e+00 : f32
    %243 = vector.broadcast %cst_59 : f32 to vector<8x128xf32>
    %244 = arith.addf %243, %242 : vector<8x128xf32>
    %245 = arith.divf %243, %244 : vector<8x128xf32>
    %246 = vector.extract_strided_slice %234 {offsets = [0, 128], sizes = [8, 128], strides = [1, 1]} : vector<8x384xf32> to vector<8x128xf32>
    %247 = vector.extract_strided_slice %237 {offsets = [0, 128], sizes = [8, 128], strides = [1, 1]} : vector<8x384xf32> to vector<8x128xf32>
    %248 = arith.addf %246, %247 : vector<8x128xf32>
    %249 = arith.negf %248 : vector<8x128xf32>
    %250 = math.exp %249 : vector<8x128xf32>
    %cst_60 = arith.constant 1.000000e+00 : f32
    %251 = vector.broadcast %cst_60 : f32 to vector<8x128xf32>
    %252 = arith.addf %251, %250 : vector<8x128xf32>
    %253 = arith.divf %251, %252 : vector<8x128xf32>
    %254 = vector.extract_strided_slice %234 {offsets = [0, 256], sizes = [8, 128], strides = [1, 1]} : vector<8x384xf32> to vector<8x128xf32>
    %255 = vector.extract_strided_slice %237 {offsets = [0, 256], sizes = [8, 128], strides = [1, 1]} : vector<8x384xf32> to vector<8x128xf32>
    %256 = arith.mulf %245, %255 : vector<8x128xf32>
    %257 = arith.addf %254, %256 : vector<8x128xf32>
    %258 = math.tanh %257 : vector<8x128xf32>
    %259 = arith.subf %231, %258 : vector<8x128xf32>
    %260 = arith.mulf %253, %259 : vector<8x128xf32>
    %261 = arith.addf %258, %260 : vector<8x128xf32>
    %262 = vector.broadcast %c5_i32 : i32 to vector<8x1xi32>
    %263 = arith.cmpi slt, %262, %15 : vector<8x1xi32>
    %cst_61 = arith.constant 0.000000e+00 : f32
    %264 = vector.shape_cast %263 : vector<8x1xi1> to vector<8x1xi1>
    %265 = vector.broadcast %264 : vector<8x1xi1> to vector<8x128xi1>
    %266 = vector.broadcast %cst_61 : f32 to vector<8x128xf32>
    %267 = arith.select %265, %261, %266 : vector<8x128xi1>, vector<8x128xf32>
    %268 = arith.index_cast %c5_i32 : i32 to index
    %c0_62 = arith.constant 0 : index
    %c0_63 = arith.constant 0 : index
    %269 = vector.load %arg14[%268, %c0_62, %c0_63] : memref<8x8x128xf32, #tpu.memory_space<vmem>>, vector<1x8x128xf32>
    %270 = vector.shape_cast %269 : vector<1x8x128xf32> to vector<8x128xf32>
    %271 = vector.shape_cast %267 : vector<8x128xf32> to vector<1x8x128xf32>
    tpu.vector_store %arg14[%268, %c0_62, %c0_63], %271 {strides = array<i32>} : memref<8x8x128xf32, #tpu.memory_space<vmem>>, vector<1x8x128xf32>,
    %272 = vector.shape_cast %263 : vector<8x1xi1> to vector<8x1xi1>
    %273 = vector.broadcast %272 : vector<8x1xi1> to vector<8x128xi1>
    %274 = arith.select %273, %261, %231 : vector<8x128xi1>, vector<8x128xf32>
    %c6_i32 = arith.constant 6 : i32
    %275 = arith.index_cast %c6_i32 : i32 to index
    %c0_64 = arith.constant 0 : index
    %c0_65 = arith.constant 0 : index
    %276 = vector.load %arg13[%275, %c0_64, %c0_65] : memref<8x8x384xf32, #tpu.memory_space<vmem>>, vector<1x8x384xf32>
    %277 = vector.shape_cast %276 : vector<1x8x384xf32> to vector<8x384xf32>
    %cst_66 = arith.constant dense<0.000000e+00> : vector<8x384xf32>
    %278 = tpu.matmul %274, %13, %cst_66 {dimension_numbers = #tpu.dot_dimension_numbers<[1], [0], [0], [1], [0, 0, 1, 1], [], []>} : vector<8x128xf32>, vector<128x384xf32>, vector<8x384xf32> -> vector<8x384xf32>
    %279 = vector.broadcast %14 : vector<1x384xf32> to vector<8x384xf32>
    %280 = arith.addf %278, %279 : vector<8x384xf32>
    %281 = vector.extract_strided_slice %277 {offsets = [0, 0], sizes = [8, 128], strides = [1, 1]} : vector<8x384xf32> to vector<8x128xf32>
    %282 = vector.extract_strided_slice %280 {offsets = [0, 0], sizes = [8, 128], strides = [1, 1]} : vector<8x384xf32> to vector<8x128xf32>
    %283 = arith.addf %281, %282 : vector<8x128xf32>
    %284 = arith.negf %283 : vector<8x128xf32>
    %285 = math.exp %284 : vector<8x128xf32>
    %cst_67 = arith.constant 1.000000e+00 : f32
    %286 = vector.broadcast %cst_67 : f32 to vector<8x128xf32>
    %287 = arith.addf %286, %285 : vector<8x128xf32>
    %288 = arith.divf %286, %287 : vector<8x128xf32>
    %289 = vector.extract_strided_slice %277 {offsets = [0, 128], sizes = [8, 128], strides = [1, 1]} : vector<8x384xf32> to vector<8x128xf32>
    %290 = vector.extract_strided_slice %280 {offsets = [0, 128], sizes = [8, 128], strides = [1, 1]} : vector<8x384xf32> to vector<8x128xf32>
    %291 = arith.addf %289, %290 : vector<8x128xf32>
    %292 = arith.negf %291 : vector<8x128xf32>
    %293 = math.exp %292 : vector<8x128xf32>
    %cst_68 = arith.constant 1.000000e+00 : f32
    %294 = vector.broadcast %cst_68 : f32 to vector<8x128xf32>
    %295 = arith.addf %294, %293 : vector<8x128xf32>
    %296 = arith.divf %294, %295 : vector<8x128xf32>
    %297 = vector.extract_strided_slice %277 {offsets = [0, 256], sizes = [8, 128], strides = [1, 1]} : vector<8x384xf32> to vector<8x128xf32>
    %298 = vector.extract_strided_slice %280 {offsets = [0, 256], sizes = [8, 128], strides = [1, 1]} : vector<8x384xf32> to vector<8x128xf32>
    %299 = arith.mulf %288, %298 : vector<8x128xf32>
    %300 = arith.addf %297, %299 : vector<8x128xf32>
    %301 = math.tanh %300 : vector<8x128xf32>
    %302 = arith.subf %274, %301 : vector<8x128xf32>
    %303 = arith.mulf %296, %302 : vector<8x128xf32>
    %304 = arith.addf %301, %303 : vector<8x128xf32>
    %305 = vector.broadcast %c6_i32 : i32 to vector<8x1xi32>
    %306 = arith.cmpi slt, %305, %15 : vector<8x1xi32>
    %cst_69 = arith.constant 0.000000e+00 : f32
    %307 = vector.shape_cast %306 : vector<8x1xi1> to vector<8x1xi1>
    %308 = vector.broadcast %307 : vector<8x1xi1> to vector<8x128xi1>
    %309 = vector.broadcast %cst_69 : f32 to vector<8x128xf32>
    %310 = arith.select %308, %304, %309 : vector<8x128xi1>, vector<8x128xf32>
    %311 = arith.index_cast %c6_i32 : i32 to index
    %c0_70 = arith.constant 0 : index
    %c0_71 = arith.constant 0 : index
    %312 = vector.load %arg14[%311, %c0_70, %c0_71] : memref<8x8x128xf32, #tpu.memory_space<vmem>>, vector<1x8x128xf32>
    %313 = vector.shape_cast %312 : vector<1x8x128xf32> to vector<8x128xf32>
    %314 = vector.shape_cast %310 : vector<8x128xf32> to vector<1x8x128xf32>
    tpu.vector_store %arg14[%311, %c0_70, %c0_71], %314 {strides = array<i32>} : memref<8x8x128xf32, #tpu.memory_space<vmem>>, vector<1x8x128xf32>,
    %315 = vector.shape_cast %306 : vector<8x1xi1> to vector<8x1xi1>
    %316 = vector.broadcast %315 : vector<8x1xi1> to vector<8x128xi1>
    %317 = arith.select %316, %304, %274 : vector<8x128xi1>, vector<8x128xf32>
    %c7_i32 = arith.constant 7 : i32
    %318 = arith.index_cast %c7_i32 : i32 to index
    %c0_72 = arith.constant 0 : index
    %c0_73 = arith.constant 0 : index
    %319 = vector.load %arg13[%318, %c0_72, %c0_73] : memref<8x8x384xf32, #tpu.memory_space<vmem>>, vector<1x8x384xf32>
    %320 = vector.shape_cast %319 : vector<1x8x384xf32> to vector<8x384xf32>
    %cst_74 = arith.constant dense<0.000000e+00> : vector<8x384xf32>
    %321 = tpu.matmul %317, %13, %cst_74 {dimension_numbers = #tpu.dot_dimension_numbers<[1], [0], [0], [1], [0, 0, 1, 1], [], []>} : vector<8x128xf32>, vector<128x384xf32>, vector<8x384xf32> -> vector<8x384xf32>
    %322 = vector.broadcast %14 : vector<1x384xf32> to vector<8x384xf32>
    %323 = arith.addf %321, %322 : vector<8x384xf32>
    %324 = vector.extract_strided_slice %320 {offsets = [0, 0], sizes = [8, 128], strides = [1, 1]} : vector<8x384xf32> to vector<8x128xf32>
    %325 = vector.extract_strided_slice %323 {offsets = [0, 0], sizes = [8, 128], strides = [1, 1]} : vector<8x384xf32> to vector<8x128xf32>
    %326 = arith.addf %324, %325 : vector<8x128xf32>
    %327 = arith.negf %326 : vector<8x128xf32>
    %328 = math.exp %327 : vector<8x128xf32>
    %cst_75 = arith.constant 1.000000e+00 : f32
    %329 = vector.broadcast %cst_75 : f32 to vector<8x128xf32>
    %330 = arith.addf %329, %328 : vector<8x128xf32>
    %331 = arith.divf %329, %330 : vector<8x128xf32>
    %332 = vector.extract_strided_slice %320 {offsets = [0, 128], sizes = [8, 128], strides = [1, 1]} : vector<8x384xf32> to vector<8x128xf32>
    %333 = vector.extract_strided_slice %323 {offsets = [0, 128], sizes = [8, 128], strides = [1, 1]} : vector<8x384xf32> to vector<8x128xf32>
    %334 = arith.addf %332, %333 : vector<8x128xf32>
    %335 = arith.negf %334 : vector<8x128xf32>
    %336 = math.exp %335 : vector<8x128xf32>
    %cst_76 = arith.constant 1.000000e+00 : f32
    %337 = vector.broadcast %cst_76 : f32 to vector<8x128xf32>
    %338 = arith.addf %337, %336 : vector<8x128xf32>
    %339 = arith.divf %337, %338 : vector<8x128xf32>
    %340 = vector.extract_strided_slice %320 {offsets = [0, 256], sizes = [8, 128], strides = [1, 1]} : vector<8x384xf32> to vector<8x128xf32>
    %341 = vector.extract_strided_slice %323 {offsets = [0, 256], sizes = [8, 128], strides = [1, 1]} : vector<8x384xf32> to vector<8x128xf32>
    %342 = arith.mulf %331, %341 : vector<8x128xf32>
    %343 = arith.addf %340, %342 : vector<8x128xf32>
    %344 = math.tanh %343 : vector<8x128xf32>
    %345 = arith.subf %317, %344 : vector<8x128xf32>
    %346 = arith.mulf %339, %345 : vector<8x128xf32>
    %347 = arith.addf %344, %346 : vector<8x128xf32>
    %348 = vector.broadcast %c7_i32 : i32 to vector<8x1xi32>
    %349 = arith.cmpi slt, %348, %15 : vector<8x1xi32>
    %cst_77 = arith.constant 0.000000e+00 : f32
    %350 = vector.shape_cast %349 : vector<8x1xi1> to vector<8x1xi1>
    %351 = vector.broadcast %350 : vector<8x1xi1> to vector<8x128xi1>
    %352 = vector.broadcast %cst_77 : f32 to vector<8x128xf32>
    %353 = arith.select %351, %347, %352 : vector<8x128xi1>, vector<8x128xf32>
    %354 = arith.index_cast %c7_i32 : i32 to index
    %c0_78 = arith.constant 0 : index
    %c0_79 = arith.constant 0 : index
    %355 = vector.load %arg14[%354, %c0_78, %c0_79] : memref<8x8x128xf32, #tpu.memory_space<vmem>>, vector<1x8x128xf32>
    %356 = vector.shape_cast %355 : vector<1x8x128xf32> to vector<8x128xf32>
    %357 = vector.shape_cast %353 : vector<8x128xf32> to vector<1x8x128xf32>
    tpu.vector_store %arg14[%354, %c0_78, %c0_79], %357 {strides = array<i32>} : memref<8x8x128xf32, #tpu.memory_space<vmem>>, vector<1x8x128xf32>,
    %358 = vector.shape_cast %349 : vector<8x1xi1> to vector<8x1xi1>
    %359 = vector.broadcast %358 : vector<8x1xi1> to vector<8x128xi1>
    %360 = arith.select %359, %347, %317 : vector<8x128xi1>, vector<8x128xf32>
    %c8_i32_80 = arith.constant 8 : i32
    %c0_81 = arith.constant 0 : index
    %c0_82 = arith.constant 0 : index
    %361 = vector.load %arg9[%c0_81, %c0_82] : memref<128x128xf32, #tpu.memory_space<vmem>>, vector<128x128xf32>
    %cst_83 = arith.constant dense<0.000000e+00> : vector<8x128xf32>
    %362 = tpu.matmul %360, %361, %cst_83 {dimension_numbers = #tpu.dot_dimension_numbers<[1], [0], [0], [1], [0, 0, 1, 1], [], []>} : vector<8x128xf32>, vector<128x128xf32>, vector<8x128xf32> -> vector<8x128xf32>
    %c0_84 = arith.constant 0 : index
    %c0_85 = arith.constant 0 : index
    %363 = vector.load %arg8[%c0_84, %c0_85] : memref<128x128xf32, #tpu.memory_space<vmem>>, vector<128x128xf32>
    %c0_86 = arith.constant 0 : index
    %c0_87 = arith.constant 0 : index
    %364 = vector.load %arg10[%c0_86, %c0_87] : memref<1x128xf32, #tpu.memory_space<vmem>>, vector<1x128xf32>
    %cst_88 = arith.constant 0.000000e+00 : f32
    %365 = vector.broadcast %cst_88 : f32 to vector<8x128xf32>
    %c0_i32_89 = arith.constant 0 : i32
    %c8_i32_90 = arith.constant 8 : i32
    %366 = arith.muli %c0_i32_89, %c8_i32_90 : i32
    %367 = tpu.assume_multiple %366, 8 : i32
    %368 = arith.index_cast %367 : i32 to index
    %c0_91 = arith.constant 0 : index
    %c0_92 = arith.constant 0 : index
    %369 = vector.load %arg14[%368, %c0_91, %c0_92] : memref<8x8x128xf32, #tpu.memory_space<vmem>>, vector<8x8x128xf32>
    %370 = arith.index_cast %367 : i32 to index
    %c0_93 = arith.constant 0 : index
    %c0_94 = arith.constant 0 : index
    %371 = vector.load %arg1[%370, %c0_93, %c0_94] : memref<8x8x128xf32, #tpu.memory_space<vmem>>, vector<8x8x128xf32>
    %372 = vector.shape_cast %369 : vector<8x8x128xf32> to vector<64x128xf32>
    %cst_95 = arith.constant dense<0.000000e+00> : vector<64x128xf32>
    %373 = tpu.matmul %372, %363, %cst_95 {dimension_numbers = #tpu.dot_dimension_numbers<[1], [0], [0], [1], [0, 0, 1, 1], [], []>} : vector<64x128xf32>, vector<128x128xf32>, vector<64x128xf32> -> vector<64x128xf32>
    %374 = vector.shape_cast %373 : vector<64x128xf32> to vector<8x8x128xf32>
    %cst_96 = arith.constant 0.000000e+00 : f32
    %375 = vector.broadcast %cst_96 : f32 to vector<8x8x128xf32>
    %376 = arith.cmpf one, %371, %375 : vector<8x8x128xf32>
    %377 = vector.shape_cast %362 : vector<8x128xf32> to vector<1x8x128xf32>
    %cst_97 = arith.constant 0.000000e+00 : f32
    %378 = vector.shape_cast %377 : vector<1x8x128xf32> to vector<1x8x128xf32>
    %379 = vector.broadcast %378 : vector<1x8x128xf32> to vector<8x8x128xf32>
    %380 = vector.broadcast %cst_97 : f32 to vector<8x8x128xf32>
    %381 = arith.select %376, %379, %380 : vector<8x8x128xi1>, vector<8x8x128xf32>
    %382 = arith.addf %374, %381 : vector<8x8x128xf32>
    %383 = arith.negf %382 : vector<8x8x128xf32>
    %384 = math.exp %383 : vector<8x8x128xf32>
    %cst_98 = arith.constant 1.000000e+00 : f32
    %385 = vector.broadcast %cst_98 : f32 to vector<8x8x128xf32>
    %386 = arith.addf %385, %384 : vector<8x8x128xf32>
    %387 = arith.divf %385, %386 : vector<8x8x128xf32>
    %388 = vector.shape_cast %364 : vector<1x128xf32> to vector<1x1x128xf32>
    %389 = vector.broadcast %388 : vector<1x1x128xf32> to vector<8x8x128xf32>
    %390 = arith.mulf %387, %389 : vector<8x8x128xf32>
    %cst_99 = arith.constant dense<0.000000e+00> : vector<8x8xf32>
    %391 = vector.multi_reduction <add>, %390, %cst_99 [2] : vector<8x8x128xf32> to vector<8x8xf32>
    %392 = vector.shape_cast %391 : vector<8x8xf32> to vector<8x8x1xf32>
    %393 = vector.broadcast %392 : vector<8x8x1xf32> to vector<8x8x128xf32>
    %394 = arith.mulf %393, %369 : vector<8x8x128xf32>
    %cst_100 = arith.constant dense<0.000000e+00> : vector<8x128xf32>
    %395 = vector.multi_reduction <add>, %394, %cst_100 [0] : vector<8x8x128xf32> to vector<8x128xf32>
    %396 = arith.addf %365, %395 : vector<8x128xf32>
    %c1_i32_101 = arith.constant 1 : i32
    %c0_102 = arith.constant 0 : index
    %c0_103 = arith.constant 0 : index
    %c0_104 = arith.constant 0 : index
    %397 = vector.load %arg11[%c0_102, %c0_103, %c0_104] : memref<2x128x128xf32, #tpu.memory_space<vmem>>, vector<1x128x128xf32>
    %398 = vector.shape_cast %397 : vector<1x128x128xf32> to vector<128x128xf32>
    %cst_105 = arith.constant dense<0.000000e+00> : vector<8x128xf32>
    %399 = tpu.matmul %396, %398, %cst_105 {dimension_numbers = #tpu.dot_dimension_numbers<[1], [0], [0], [1], [0, 0, 1, 1], [], []>} : vector<8x128xf32>, vector<128x128xf32>, vector<8x128xf32> -> vector<8x128xf32>
    %c1 = arith.constant 1 : index
    %c0_106 = arith.constant 0 : index
    %c0_107 = arith.constant 0 : index
    %400 = vector.load %arg11[%c1, %c0_106, %c0_107] : memref<2x128x128xf32, #tpu.memory_space<vmem>>, vector<1x128x128xf32>
    %401 = vector.shape_cast %400 : vector<1x128x128xf32> to vector<128x128xf32>
    %cst_108 = arith.constant dense<0.000000e+00> : vector<8x128xf32>
    %402 = tpu.matmul %360, %401, %cst_108 {dimension_numbers = #tpu.dot_dimension_numbers<[1], [0], [0], [1], [0, 0, 1, 1], [], []>} : vector<8x128xf32>, vector<128x128xf32>, vector<8x128xf32> -> vector<8x128xf32>
    %403 = arith.addf %399, %402 : vector<8x128xf32>
    %c0_109 = arith.constant 0 : index
    %c0_110 = arith.constant 0 : index
    %c0_111 = arith.constant 0 : index
    %404 = vector.load %arg3[%c0_109, %c0_110, %c0_111] : memref<8x6x128xf32, #tpu.memory_space<vmem>>, vector<8x6x128xf32>
    %405 = vector.shape_cast %403 : vector<8x128xf32> to vector<8x1x128xf32>
    %406 = vector.broadcast %405 : vector<8x1x128xf32> to vector<8x6x128xf32>
    %407 = arith.mulf %404, %406 : vector<8x6x128xf32>
    %cst_112 = arith.constant dense<0.000000e+00> : vector<8x6xf32>
    %408 = vector.multi_reduction <add>, %407, %cst_112 [2] : vector<8x6x128xf32> to vector<8x6xf32>
    %cst_113 = arith.constant dense<0xFF800000> : vector<8xf32>
    %409 = vector.multi_reduction <maximumf>, %408, %cst_113 [1] : vector<8x6xf32> to vector<8xf32>
    %410 = vector.shape_cast %409 : vector<8xf32> to vector<8x1xf32>
    %411 = vector.broadcast %410 : vector<8x1xf32> to vector<8x6xf32>
    %412 = arith.subf %408, %411 : vector<8x6xf32>
    %413 = math.exp %412 : vector<8x6xf32>
    %cst_114 = arith.constant dense<0.000000e+00> : vector<8xf32>
    %414 = vector.multi_reduction <add>, %413, %cst_114 [1] : vector<8x6xf32> to vector<8xf32>
    %415 = vector.shape_cast %414 : vector<8xf32> to vector<8x1xf32>
    %416 = vector.broadcast %415 : vector<8x1xf32> to vector<8x6xf32>
    %417 = arith.divf %413, %416 : vector<8x6xf32>
    %c0_115 = arith.constant 0 : index
    %c0_116 = arith.constant 0 : index
    %418 = vector.load %arg12[%c0_115, %c0_116] : memref<8x6xf32, #tpu.memory_space<vmem>>, vector<8x6xf32>
    tpu.vector_store %arg12[%c0_115, %c0_116], %417 {strides = array<i32>} : memref<8x6xf32, #tpu.memory_space<vmem>>, vector<8x6xf32>,
    return
  }
  func.func @transform_0(%arg0: i32) -> (i32, i32, i32) {
    %c0_i32 = arith.constant 0 : i32
    %c0_i32_0 = arith.constant 0 : i32
    %c0_i32_1 = arith.constant 0 : i32
    return %c0_i32, %arg0, %c0_i32_0 : i32, i32, i32
  }
  func.func @transform_1(%arg0: i32) -> (i32, i32) {
    %c0_i32 = arith.constant 0 : i32
    %c0_i32_0 = arith.constant 0 : i32
    return %arg0, %c0_i32 : i32, i32
  }
  func.func @transform_2(%arg0: i32) -> (i32, i32, i32) {
    %c0_i32 = arith.constant 0 : i32
    %c0_i32_0 = arith.constant 0 : i32
    %c0_i32_1 = arith.constant 0 : i32
    return %arg0, %c0_i32, %c0_i32_0 : i32, i32, i32
  }
  func.func @transform_3(%arg0: i32) -> (i32, i32) {
    %c0_i32 = arith.constant 0 : i32
    %c0_i32_0 = arith.constant 0 : i32
    %c0_i32_1 = arith.constant 0 : i32
    return %c0_i32, %c0_i32_0 : i32, i32
  }
  func.func @transform_4(%arg0: i32) -> (i32, i32) {
    %c0_i32 = arith.constant 0 : i32
    %c0_i32_0 = arith.constant 0 : i32
    %c0_i32_1 = arith.constant 0 : i32
    return %c0_i32, %c0_i32_0 : i32, i32
  }
  func.func @transform_5(%arg0: i32) -> (i32, i32) {
    %c0_i32 = arith.constant 0 : i32
    %c0_i32_0 = arith.constant 0 : i32
    %c0_i32_1 = arith.constant 0 : i32
    return %c0_i32, %c0_i32_0 : i32, i32
  }
  func.func @transform_6(%arg0: i32) -> (i32, i32) {
    %c0_i32 = arith.constant 0 : i32
    %c0_i32_0 = arith.constant 0 : i32
    %c0_i32_1 = arith.constant 0 : i32
    return %c0_i32, %c0_i32_0 : i32, i32
  }
  func.func @transform_7(%arg0: i32) -> (i32, i32) {
    %c0_i32 = arith.constant 0 : i32
    %c0_i32_0 = arith.constant 0 : i32
    %c0_i32_1 = arith.constant 0 : i32
    return %c0_i32, %c0_i32_0 : i32, i32
  }
  func.func @transform_8(%arg0: i32) -> (i32, i32) {
    %c0_i32 = arith.constant 0 : i32
    %c0_i32_0 = arith.constant 0 : i32
    %c0_i32_1 = arith.constant 0 : i32
    return %c0_i32, %c0_i32_0 : i32, i32
  }
  func.func @transform_9(%arg0: i32) -> (i32, i32) {
    %c0_i32 = arith.constant 0 : i32
    %c0_i32_0 = arith.constant 0 : i32
    %c0_i32_1 = arith.constant 0 : i32
    return %c0_i32, %c0_i32_0 : i32, i32
  }
  func.func @transform_10(%arg0: i32) -> (i32, i32, i32) {
    %c0_i32 = arith.constant 0 : i32
    %c0_i32_0 = arith.constant 0 : i32
    %c0_i32_1 = arith.constant 0 : i32
    %c0_i32_2 = arith.constant 0 : i32
    return %c0_i32, %c0_i32_0, %c0_i32_1 : i32, i32, i32
  }
  func.func @transform_11(%arg0: i32) -> (i32, i32) {
    %c0_i32 = arith.constant 0 : i32
    %c0_i32_0 = arith.constant 0 : i32
    return %arg0, %c0_i32 : i32, i32
  }
}

</mosaic_0001>

<bundles_post_ra>
// kernel: narm_pallas.1
= control target key start
LH: loop header
LB: loop body
LE: loop exit
PB: predicated region body
PF: predicated region fallthrough
CT: control target
= control target key end

     0   :  { %v5759_v3 = vmov 0.0   ;;  %v5757_v4 = vmov 0   ;;  %vm3762_vm4 = vmmov 0   ;;  %s5744_s3 = inlined_call_operand.vmem [shape: f32[128,384], index: 3, kind: input, shape index: {}]   ;;  %s5745_s0 = inlined_call_operand.vmem [shape: f32[8,8,128], index: 0, kind: input, shape index: {}]   ;;  %s5746_s4 = inlined_call_operand.vmem [shape: f32[128,384], index: 4, kind: input, shape index: {}]   ;;  %s5747_s1 = inlined_call_operand.vmem [shape: s32[8,1], index: 1, kind: input, shape index: {}]   ;;  %s5748_s5 = inlined_call_operand.vmem [shape: f32[1,384], index: 5, kind: input, shape index: {}]   ;;  %s5749_s6 = inlined_call_operand.vmem [shape: f32[1,384], index: 6, kind: input, shape index: {}]   ;;  %s5750_s7 = inlined_call_operand.vmem [shape: f32[128,128], index: 7, kind: input, shape index: {}]   ;;  %s5751_s8 = inlined_call_operand.vmem [shape: f32[128,128], index: 8, kind: input, shape index: {}]   ;;  %s5752_s10 = inlined_call_operand.vmem [shape: f32[2,128,128], index: 10, kind: input, shape index: {}]   ;;  %s5753_s9 = inlined_call_operand.vmem [shape: f32[1,128], index: 9, kind: input, shape index: {}]   ;;  %s5754_s2 = inlined_call_operand.vmem [shape: f32[8,6,128], index: 2, kind: input, shape index: {}]   ;;  %s5755_s11 = inlined_call_operand.vmem [shape: f32[8,6], index: 11, kind: output, shape index: {}]  }
   0x1   :  { %v84_v0 = vld [vmem:[%s5744_s3 + $0x170] sm:$0xff]  ;;  %v83_v1 = vld [vmem:[%s5744_s3 + $0x168] sm:$0xff]  ;;  %v81_v2 = vld [vmem:[%s5744_s3 + $0x158] sm:$0xff]  ;;  %177 = vmatprep.mubr.f32.mxu0 %v5759_v3  ;;  %3566 = vset.pattern.permute.xlu0 %v5757_v4 }
   0x2   :  { %113 = vmatprep.subr.mxu0 %v84_v0  ;;  %v80_v5 = vld [vmem:[%s5744_s3 + $0x150] sm:$0xff]  ;;  %3567 = vset.pattern.permute.xlu1 %v5757_v4  ;;  %v78_v6 = vld [vmem:[%s5744_s3 + $0x140] sm:$0xff]  ;;  %v77_v7 = vld [vmem:[%s5744_s3 + $0x138] sm:$0xff] }
   0x3   :  { %114 = vmatpush1.msra.mxu0 %v83_v1  ;;  %v75_v8 = vld [vmem:[%s5744_s3 + $0x128] sm:$0xff]  ;;  %v74_v9 = vld [vmem:[%s5744_s3 + $0x120] sm:$0xff]  ;;  %v72_v10 = vld [vmem:[%s5744_s3 + $0x110] sm:$0xff] }
   0x4   :  { %115 = vmatprep.subr.mxu0 %v81_v2  ;;  %v71_v11 = vld [vmem:[%s5744_s3 + $0x108] sm:$0xff]  ;;  %v69_v12 = vld [vmem:[%s5744_s3 + $0xf8] sm:$0xff]  ;;  %v68_v13 = vld [vmem:[%s5744_s3 + $0xf0] sm:$0xff] }
   0x5   :  { %116 = vmatpush1.msra.mxu0 %v80_v5  ;;  %v66_v14 = vld [vmem:[%s5744_s3 + $0xe0] sm:$0xff]  ;;  %v65_v16 = vld [vmem:[%s5744_s3 + $0xd8] sm:$0xff]  ;;  %v63_v18 = vld [vmem:[%s5744_s3 + $0xc8] sm:$0xff] }
   0x6   :  { %117 = vmatprep.subr.mxu0 %v78_v6  ;;  %v3869_v15 = vld [vmem:[%s5745_s0] sm:$0xff]  ;;  %v85_v17 = vld [vmem:[%s5744_s3 + $0x178] sm:$0xff]  ;;  %v79_v21 = vld [vmem:[%s5744_s3 + $0x148] sm:$0xff] }
   0x7   :  { %118 = vmatpush1.msra.mxu0 %v77_v7  ;;  %3121 = vmatprep.mubr.f32.mxu1 %v3869_v15  ;;  %v82_v19 = vld [vmem:[%s5744_s3 + $0x160] sm:$0xff]  ;;  %v60_v22 = vld [vmem:[%s5744_s3 + $0xb0] sm:$0xff]  ;;  %v59_v23 = vld [vmem:[%s5744_s3 + $0xa8] sm:$0xff] }
   0x8   :  { %119 = vmatprep.subr.mxu0 %v75_v8  ;;  %3089 = vmatprep.subr.mxu1 %v85_v17  ;;  %v62_v20 = vld [vmem:[%s5744_s3 + $0xc0] sm:$0xff]  ;;  %v76_v24 = vld [vmem:[%s5744_s3 + $0x130] sm:$0xff]  ;;  %v57_v25 = vld [vmem:[%s5744_s3 + $0x98] sm:$0xff] }
   0x9   :  { %120 = vmatpush1.msra.mxu0 %v74_v9  ;;  %3090 = vmatpush3.msra.mxu1 %v85_v17  ;;  %v56_v26 = vld [vmem:[%s5744_s3 + $0x90] sm:$0xff]  ;;  %v73_v27 = vld [vmem:[%s5744_s3 + $0x118] sm:$0xff]  ;;  %v54_v28 = vld [vmem:[%s5744_s3 + $0x80] sm:$0xff] }
   0xa   :  { %121 = vmatprep.subr.mxu0 %v72_v10  ;;  %3091 = vmatprep.subr.mxu1 %v82_v19  ;;  %v53_v29 = vld [vmem:[%s5744_s3 + $0x78] sm:$0xff]  ;;  %v70_v30 = vld [vmem:[%s5744_s3 + $0x100] sm:$0xff]  ;;  %v51_v31 = vld [vmem:[%s5744_s3 + $0x68] sm:$0xff] }
   0xb   :  { %122 = vmatpush1.msra.mxu0 %v71_v11  ;;  %3092 = vmatpush3.msra.mxu1 %v82_v19  ;;  %v50_v32 = vld [vmem:[%s5744_s3 + $0x60] sm:$0xff]  ;;  %v67_v33 = vld [vmem:[%s5744_s3 + $0xe8] sm:$0xff]  ;;  %v48_v34 = vld [vmem:[%s5744_s3 + $0x50] sm:$0xff] }
   0xc   :  { %123 = vmatprep.subr.mxu0 %v69_v12  ;;  %3093 = vmatprep.subr.mxu1 %v79_v21  ;;  %v47_v35 = vld [vmem:[%s5744_s3 + $0x48] sm:$0xff]  ;;  %v64_v36 = vld [vmem:[%s5744_s3 + $0xd0] sm:$0xff]  ;;  %v45_v37 = vld [vmem:[%s5744_s3 + $0x38] sm:$0xff] }
   0xd   :  { %124 = vmatpush1.msra.mxu0 %v68_v13  ;;  %3094 = vmatpush3.msra.mxu1 %v79_v21  ;;  %v44_v38 = vld [vmem:[%s5744_s3 + $0x30] sm:$0xff]  ;;  %v61_v39 = vld [vmem:[%s5744_s3 + $0xb8] sm:$0xff]  ;;  %v42_v40 = vld [vmem:[%s5744_s3 + $0x20] sm:$0xff] }
   0xe   :  { %125 = vmatprep.subr.mxu0 %v66_v14  ;;  %3095 = vmatprep.subr.mxu1 %v76_v24  ;;  %v41_v41 = vld [vmem:[%s5744_s3 + $0x18] sm:$0xff]  ;;  %v58_v42 = vld [vmem:[%s5744_s3 + $0xa0] sm:$0xff]  ;;  %v39_v43 = vld [vmem:[%s5744_s3 + $0x8] sm:$0xff] }
   0xf   :  { %126 = vmatpush1.msra.mxu0 %v65_v16  ;;  %3096 = vmatpush3.msra.mxu1 %v76_v24  ;;  %v38_v44 = vld [vmem:[%s5744_s3] sm:$0xff]  ;;  %v55_v45 = vld [vmem:[%s5744_s3 + $0x88] sm:$0xff]  ;;  %v3965_v46 = vld [vmem:[%s5746_s4 + $0x170] sm:$0xff] }
  0x10   :  { %127 = vmatprep.subr.mxu0 %v63_v18  ;;  %3097 = vmatprep.subr.mxu1 %v73_v27  ;;  %5819 = vst [vmem:[#allocation4_spill] sm:$0xff] %v3965_v46  ;;  %v3970_v47 = vld [vmem:[%s5746_s4 + $0x168] sm:$0xff]  ;;  %v3975_v48 = vld [vmem:[%s5746_s4 + $0x158] sm:$0xff]  ;;  %v3982_v49 = vld [vmem:[%s5746_s4 + $0x150] sm:$0xff] }
  0x11   :  { %128 = vmatpush1.msra.mxu0 %v62_v20  ;;  %3098 = vmatpush3.msra.mxu1 %v73_v27  ;;  %v52_v50 = vld [vmem:[%s5744_s3 + $0x70] sm:$0xff]  ;;  %v3992_v51 = vld [vmem:[%s5745_s0 + $0x8] sm:$0xff]  ;;  %v3997_v52 = vld [vmem:[%s5746_s4 + $0x140] sm:$0xff] }
  0x12   :  { %129 = vmatprep.subr.mxu0 %v60_v22  ;;  %3099 = vmatprep.subr.mxu1 %v70_v30  ;;  %v4003_v53 = vld [vmem:[%s5746_s4 + $0x138] sm:$0xff]  ;;  %v4009_v54 = vld [vmem:[%s5746_s4 + $0x128] sm:$0xff]  ;;  %v4016_v55 = vld [vmem:[%s5746_s4 + $0x120] sm:$0xff] }
  0x13   :  { %130 = vmatpush1.msra.mxu0 %v59_v23  ;;  %3100 = vmatpush3.msra.mxu1 %v70_v30  ;;  %v49_v56 = vld [vmem:[%s5744_s3 + $0x58] sm:$0xff]  ;;  %v4026_v57 = vld [vmem:[%s5745_s0 + $0x10] sm:$0xff]  ;;  %v4037_v59 = vld [vmem:[%s5746_s4 + $0x108] sm:$0xff] }
  0x14   :  { %131 = vmatprep.subr.mxu0 %v57_v25  ;;  %3101 = vmatprep.subr.mxu1 %v67_v33  ;;  %v4031_v58 = vld [vmem:[%s5746_s4 + $0x110] sm:$0xff]  ;;  %v4043_v60 = vld [vmem:[%s5746_s4 + $0xf8] sm:$0xff]  ;;  %v46_v62 = vld [vmem:[%s5744_s3 + $0x40] sm:$0xff] }
  0x15   :  { %132 = vmatpush1.msra.mxu0 %v56_v26  ;;  %3102 = vmatpush3.msra.mxu1 %v67_v33  ;;  %v4050_v61 = vld [vmem:[%s5746_s4 + $0xf0] sm:$0xff]  ;;  %v4060_v63 = vld [vmem:[%s5745_s0 + $0x18] sm:$0xff]  ;;  %v4065_v0 = vld [vmem:[%s5746_s4 + $0xe0] sm:$0xff] }
  0x16   :  { %133 = vmatprep.subr.mxu0 %v54_v28  ;;  %3103 = vmatprep.subr.mxu1 %v64_v36  ;;  %v4071_v1 = vld [vmem:[%s5746_s4 + $0xd8] sm:$0xff]  ;;  %v4077_v2 = vld [vmem:[%s5746_s4 + $0xc8] sm:$0xff]  ;;  %v4084_v5 = vld [vmem:[%s5746_s4 + $0xc0] sm:$0xff] }
  0x17   :  { %134 = vmatpush1.msra.mxu0 %v53_v29  ;;  %3104 = vmatpush3.msra.mxu1 %v64_v36  ;;  %v43_v6 = vld [vmem:[%s5744_s3 + $0x28] sm:$0xff]  ;;  %v4094_v7 = vld [vmem:[%s5745_s0 + $0x20] sm:$0xff]  ;;  %v4099_v8 = vld [vmem:[%s5746_s4 + $0xb0] sm:$0xff] }
  0x18   :  { %135 = vmatprep.subr.mxu0 %v51_v31  ;;  %3105 = vmatprep.subr.mxu1 %v61_v39  ;;  %v4105_v9 = vld [vmem:[%s5746_s4 + $0xa8] sm:$0xff]  ;;  %v4111_v10 = vld [vmem:[%s5746_s4 + $0x98] sm:$0xff]  ;;  %v4118_v11 = vld [vmem:[%s5746_s4 + $0x90] sm:$0xff] }
  0x19   :  { %136 = vmatpush1.msra.mxu0 %v50_v32  ;;  %3106 = vmatpush3.msra.mxu1 %v61_v39  ;;  %v40_v12 = vld [vmem:[%s5744_s3 + $0x10] sm:$0xff]  ;;  %v4128_v13 = vld [vmem:[%s5745_s0 + $0x28] sm:$0xff]  ;;  %v4133_v14 = vld [vmem:[%s5746_s4 + $0x80] sm:$0xff] }
  0x1a   :  { %137 = vmatprep.subr.mxu0 %v48_v34  ;;  %3107 = vmatprep.subr.mxu1 %v58_v42  ;;  %v4145_v16 = vld [vmem:[%s5746_s4 + $0x68] sm:$0xff]  ;;  %v4152_v17 = vld [vmem:[%s5746_s4 + $0x60] sm:$0xff]  ;;  %v95_v18 = vld [vmem:[%s5745_s0 + $0x30] sm:$0xff] }
  0x1b   :  { %138 = vmatpush1.msra.mxu0 %v47_v35  ;;  %3108 = vmatpush3.msra.mxu1 %v58_v42  ;;  %v4162_v19 = vld [vmem:[%s5746_s4 + $0x50] sm:$0xff]  ;;  %v4168_v20 = vld [vmem:[%s5746_s4 + $0x48] sm:$0xff]  ;;  %v4174_v21 = vld [vmem:[%s5746_s4 + $0x38] sm:$0xff] }
  0x1c   :  { %139 = vmatprep.subr.mxu0 %v45_v37  ;;  %3109 = vmatprep.subr.mxu1 %v55_v45  ;;  %v4181_v22 = vld [vmem:[%s5746_s4 + $0x30] sm:$0xff]  ;;  %v4186_v23 = vld [vmem:[%s5746_s4 + $0x178] sm:$0xff]  ;;  %v4196_v25 = vld [vmem:[%s5746_s4 + $0x20] sm:$0xff] }
  0x1d   :  { %140 = vmatpush1.msra.mxu0 %v44_v38  ;;  %3110 = vmatpush3.msra.mxu1 %v55_v45  ;;  %v96_v24 = vld [vmem:[%s5745_s0 + $0x38] sm:$0xff]  ;;  %5820 = vst [vmem:[#allocation5_spill] sm:$0xff] %v4196_v25  ;;  %v4209_v27 = vld [vmem:[%s5746_s4 + $0x8] sm:$0xff]  ;;  %v4215_v28 = vld [vmem:[%s5747_s1] sm:$0xff] }
  0x1e   :  { %141 = vmatprep.subr.mxu0 %v42_v40  ;;  %3111 = vmatprep.subr.mxu1 %v52_v50  ;;  %v4202_v26 = vld [vmem:[%s5746_s4 + $0x18] sm:$0xff]  ;;  %5822 = vst [vmem:[#allocation7_spill] sm:$0xff] %v4209_v27  ;;  %5823 = vst [vmem:[#allocation8_spill] sm:$0xff] %v4215_v28  ;;  %v4221_v29 = vld [vmem:[%s5746_s4] sm:$0xff]  ;;  %vm588_vm0 = vcmp.gt.s32.totalorder %v4215_v28, 0  ;;  %vm761_vm1 = vcmp.gt.s32.totalorder %v4215_v28, 1 }
  0x1f   :  { %142 = vmatpush1.msra.mxu0 %v41_v41  ;;  %3112 = vmatpush3.msra.mxu1 %v52_v50  ;;  %5821 = vst [vmem:[#allocation6_spill] sm:$0xff] %v4202_v26  ;;  %5824 = vst [vmem:[#allocation9_spill] sm:$0xff] %v4221_v29  ;;  %v4226_v30 = vld [vmem:[%s5746_s4 + $0x160] sm:$0xff]  ;;  %v4235_v31 = vld [vmem:[%s5746_s4 + $0x148] sm:$0xff]  ;;  %v589_v33 = vsel %vm588_vm0, 1, %v5757_v4  ;;  %v762_v36 = vsel %vm761_vm1, 1, %v5757_v4 }
  0x20   :  { %143 = vmatprep.subr.mxu0 %v39_v43  ;;  %3113 = vmatprep.subr.mxu1 %v49_v56  ;;  %v4245_v32 = vld [vmem:[%s5746_s4 + $0x130] sm:$0xff]  ;;  %v4254_v34 = vld [vmem:[%s5746_s4 + $0x118] sm:$0xff]  ;;  %v4264_v35 = vld [vmem:[%s5746_s4 + $0x100] sm:$0xff]  ;;  %vm1286_vm2 = vcmp.gt.s32.totalorder %v4215_v28, 4  ;;  %vm1636_vm3 = vcmp.gt.s32.totalorder %v4215_v28, 6 }
  0x21   :  { %144 = vmatpush1.msra.mxu0 %v38_v44  ;;  %3114 = vmatpush3.msra.mxu1 %v49_v56  ;;  %v4273_v37 = vld [vmem:[%s5746_s4 + $0xe8] sm:$0xff]  ;;  %v4282_v38 = vld [vmem:[%s5746_s4 + $0xd0] sm:$0xff]  ;;  %v1287_v39 = vsel %vm1286_vm2, 1, %v5757_v4  ;;  %v4291_v40 = vld [vmem:[%s5746_s4 + $0xb8] sm:$0xff]  ;;  %v1637_v42 = vsel %vm1636_vm3, 1, %v5757_v4 }
  0x22   :  { %178 = vmatmul.mubr.f32.vlgmr.msra.gmra.mxu0 %v3869_v15  ;;  %427 = vmatprep.subr.mxu0 %v3965_v46  ;;  %v4139_v15 = vld [vmem:[%s5746_s4 + $0x78] sm:$0xff]  ;;  %v4301_v41 = vld [vmem:[%s5746_s4 + $0xa0] sm:$0xff]  ;;  %v4310_v43 = vld [vmem:[%s5746_s4 + $0x88] sm:$0xff] }
  0x23   :  { %428 = vmatpush1.msra.mxu0 %v3970_v47  ;;  %183 = vmatprep.mubr.f32.mxu0 %v5759_v3  ;;  %v4319_v44 = vld [vmem:[%s5746_s4 + $0x70] sm:$0xff]  ;;  %v4327_v45 = vld [vmem:[%s5746_s4 + $0x58] sm:$0xff]  ;;  %v4336_v50 = vld [vmem:[%s5746_s4 + $0x40] sm:$0xff] }
  0x24   :  { %429 = vmatprep.subr.mxu0 %v3975_v48  ;;  %3115 = vmatprep.subr.mxu1 %v46_v62  ;;  %5825 = vst [vmem:[#allocation10_spill] sm:$0xff] %v4336_v50  ;;  %v4354_v56 = vld [vmem:[%s5746_s4 + $0x10] sm:$0xff] }
  0x25   :  { %430 = vmatpush1.msra.mxu0 %v3982_v49  ;;  %3116 = vmatpush3.msra.mxu1 %v46_v62  ;;  %5827 = vst [vmem:[#allocation12_spill] sm:$0xff] %v4354_v56 }
  0x26   :  { %184 = vmatmul.mubr.f32.gmra.mxu0 %v3992_v51  ;;  %431 = vmatprep.subr.mxu0 %v3997_v52 }
  0x27   :  { %432 = vmatpush1.msra.mxu0 %v4003_v53  ;;  %189 = vmatprep.mubr.f32.mxu0 %v5759_v3 }
  0x28   :  { %433 = vmatprep.subr.mxu0 %v4009_v54  ;;  %3117 = vmatprep.subr.mxu1 %v43_v6 }
  0x29   :  { %434 = vmatpush1.msra.mxu0 %v4016_v55  ;;  %3118 = vmatpush3.msra.mxu1 %v43_v6  ;;  %v86_v6 = vld [vmem:[%s5748_s5] sm:$0x7] }
  0x2a   :  { %190 = vmatmul.mubr.f32.gmra.mxu0 %v4026_v57  ;;  %435 = vmatprep.subr.mxu0 %v4031_v58 }
  0x2b   :  { %436 = vmatpush1.msra.mxu0 %v4037_v59  ;;  %195 = vmatprep.mubr.f32.mxu0 %v5759_v3 }
  0x2c   :  { %437 = vmatprep.subr.mxu0 %v4043_v60  ;;  %3119 = vmatprep.subr.mxu1 %v40_v12 }
  0x2d   :  { %438 = vmatpush1.msra.mxu0 %v4050_v61  ;;  %3120 = vmatpush3.msra.mxu1 %v40_v12 }
  0x2e   :  { %196 = vmatmul.mubr.f32.gmra.mxu0 %v4060_v63  ;;  %439 = vmatprep.subr.mxu0 %v4065_v0 }
  0x2f   :  { %440 = vmatpush1.msra.mxu0 %v4071_v1  ;;  %201 = vmatprep.mubr.f32.mxu0 %v5759_v3 }
  0x30   :  { %441 = vmatprep.subr.mxu0 %v4077_v2  ;;  %3133 = vmatprep.subr.mxu1 %v5759_v3 }
  0x31   :  { %442 = vmatpush1.msra.mxu0 %v4084_v5  ;;  %3122 = vmatmul.mubr.f32.vlgmr.msra.gmra.mxu1 %v3992_v51  ;;  %v4345_v51 = vld [vmem:[%s5746_s4 + $0x28] sm:$0xff] }
  0x32   :  { %202 = vmatmul.mubr.f32.gmra.mxu0 %v4094_v7  ;;  %443 = vmatprep.subr.mxu0 %v4099_v8  ;;  %5826 = vst [vmem:[#allocation11_spill] sm:$0xff] %v4345_v51 }
  0x33   :  { %444 = vmatpush1.msra.mxu0 %v4105_v9  ;;  %207 = vmatprep.mubr.f32.mxu0 %v5759_v3 }
  0x34   :  { %445 = vmatprep.subr.mxu0 %v4111_v10  ;;  %3134 = vmatpush3.msra.mxu1 %v4186_v23 }
  0x35   :  { %446 = vmatpush1.msra.mxu0 %v4118_v11  ;;  %3135 = vmatprep.subr.mxu1 %v5759_v3 }
  0x36   :  { %208 = vmatmul.mubr.f32.gmra.mxu0 %v4128_v13  ;;  %447 = vmatprep.subr.mxu0 %v4133_v14 }
  0x37   :  { %448 = vmatpush1.msra.mxu0 %v4139_v15  ;;  %213 = vmatprep.mubr.f32.mxu0 %v5759_v3 }
  0x38   :  { %449 = vmatprep.subr.mxu0 %v4145_v16  ;;  %3136 = vmatpush3.msra.mxu1 %v4226_v30 }
  0x39   :  { %450 = vmatpush1.msra.mxu0 %v4152_v17  ;;  %3137 = vmatprep.subr.mxu1 %v5759_v3 }
  0x3a   :  { %214 = vmatmul.mubr.f32.gmra.mxu0 %v95_v18  ;;  %451 = vmatprep.subr.mxu0 %v4162_v19 }
  0x3b   :  { %452 = vmatpush1.msra.mxu0 %v4168_v20  ;;  %219 = vmatprep.mubr.f32.mxu0 %v5759_v3 }
  0x3c   :  { %453 = vmatprep.subr.mxu0 %v4174_v21  ;;  %3138 = vmatpush3.msra.mxu1 %v4235_v31 }
  0x3d   :  { %454 = vmatpush1.msra.mxu0 %v4181_v22  ;;  %3124 = vmatprep.mubr.f32.mxu1 %v4026_v57  ;;  %v5756_v57 = vlaneseq }
  0x3e   :  { %220 = vmatmul.mubr.f32.gmra.mxu0 %v96_v24  ;;  %455 = vmatprep.subr.mxu0 %v4196_v25 }
  0x3f   :  { %456 = vmatpush1.msra.mxu0 %v4202_v26  ;;  %491 = vmatprep.mubr.f32.mxu0 %v5759_v3  ;;  %v4418_v62 = vshrl.u32 %v5756_v57, 7 }
  0x40   :  { %457 = vmatprep.subr.mxu0 %v4209_v27  ;;  %3139 = vmatprep.subr.mxu1 %v5759_v3 }
  0x41   :  { %458 = vmatpush1.msra.mxu0 %v4221_v29  ;;  %3125 = vmatmul.mubr.f32.gmra.mxu1 %v4060_v63  ;;  %5828 = vst [vmem:[#allocation13_spill] sm:$0xff] %v4418_v62  ;;  %v4421_v63 = vsub.s32 0, %v4418_v62  ;;  %v4427_v12 = vsub.s32 1, %v4418_v62 }
  0x42   :  { %492 = vmatmul.mubr.f32.vlgmr.msra.gmra.mxu0 %v5759_v3  ;;  %3140 = vmatpush3.msra.mxu1 %v4245_v32 }
  0x43   :  { %3127 = vmatprep.mubr.f32.mxu1 %v4094_v7  ;;  %3141 = vmatprep.subr.mxu1 %v5759_v3  ;;  %5829 = vst [vmem:[#allocation14_spill] sm:$0xff] %v4421_v63  ;;  %5830 = vst [vmem:[#allocation15_spill] sm:$0xff] %v4427_v12 }
  0x44   :  { %591 = vperm.xlu0 %3566, %v589_v33   ;;  %3142 = vmatpush3.msra.mxu1 %v4254_v34  ;;  %v105_v33 = vrot.slane %v86_v6, %v4427_v12 }
  0x45   :  { %600 = vmatprep.subr.mxu0 %v3965_v46  ;;  %3143 = vmatprep.subr.mxu1 %v5759_v3 }
  0x46   :  { %3128 = vmatmul.mubr.f32.gmra.mxu1 %v4128_v13  ;;  %601 = vmatpush1.msra.mxu0 %v3970_v47 }
  0x47   :  { %3144 = vmatpush3.msra.mxu1 %v4264_v35  ;;  %3130 = vmatprep.mubr.f32.mxu1 %v95_v18  ;;  %v101_v18 = vrot.slane %v86_v6, %v4421_v63 }
  0x48   :  { %3145 = vmatprep.subr.mxu1 %v5759_v3  ;;  %764 = vperm.xlu0 %3566, %v762_v36  }
  0x49   :  { %3146 = vmatpush3.msra.mxu1 %v4273_v37  ;;  %602 = vmatprep.subr.mxu0 %v3975_v48 }
  0x4a   :  { %3147 = vmatprep.subr.mxu1 %v5759_v3  ;;  %3131 = vmatmul.mubr.f32.gmra.mxu1 %v96_v24 }
  0x4b   :  { %3148 = vmatpush3.msra.mxu1 %v4282_v38  ;;  %3165 = vmatprep.mubr.msk.f32.mxu1 %vm3762_vm4, %v5759_v3 }
  0x4c   :  { %3149 = vmatprep.subr.mxu1 %v5759_v3  ;;  %1289 = vperm.xlu0 %3566, %v1287_v39  }
  0x4d   :  { %3150 = vmatpush3.msra.mxu1 %v4291_v40  ;;  %603 = vmatpush1.msra.mxu0 %v3982_v49 }
  0x4e   :  { %3151 = vmatprep.subr.mxu1 %v5759_v3  ;;  %604 = vmatprep.subr.mxu0 %v3997_v52 }
  0x4f   :  { %3152 = vmatpush3.msra.mxu1 %v4301_v41  ;;  %605 = vmatpush1.msra.mxu0 %v4003_v53 }
  0x50   :  { %3153 = vmatprep.subr.mxu1 %v5759_v3  ;;  %1639 = vperm.xlu0 %3566, %v1637_v42  }
  0x51   :  { %3154 = vmatpush3.msra.mxu1 %v4310_v43  ;;  %606 = vmatprep.subr.mxu0 %v4009_v54 }
  0x52   :  { %3155 = vmatprep.subr.mxu1 %v5759_v3  ;;  %607 = vmatpush1.msra.mxu0 %v4016_v55 }
  0x53   :  { %3156 = vmatpush3.msra.mxu1 %v4319_v44  ;;  %608 = vmatprep.subr.mxu0 %v4031_v58 }
  0x54   :  { %3157 = vmatprep.subr.mxu1 %v5759_v3  ;;  %609 = vmatpush1.msra.mxu0 %v4037_v59 }
  0x55   :  { %3158 = vmatpush3.msra.mxu1 %v4327_v45  ;;  %610 = vmatprep.subr.mxu0 %v4043_v60 }
  0x56   :  { %3159 = vmatprep.subr.mxu1 %v5759_v3  ;;  %611 = vmatpush1.msra.mxu0 %v4050_v61 }
  0x57   :  { %3160 = vmatpush3.msra.mxu1 %v4336_v50  ;;  %612 = vmatprep.subr.mxu0 %v4065_v0 }
  0x58   :  { %3161 = vmatprep.subr.mxu1 %v5759_v3  ;;  %613 = vmatpush1.msra.mxu0 %v4071_v1 }
  0x59   :  { %3162 = vmatpush3.msra.mxu1 %v4345_v51  ;;  %614 = vmatprep.subr.mxu0 %v4077_v2 }
  0x5a   :  { %3163 = vmatprep.subr.mxu1 %v5759_v3  ;;  %615 = vmatpush1.msra.mxu0 %v4084_v5 }
  0x5b   :  { %3164 = vmatpush3.msra.mxu1 %v4354_v56  ;;  %616 = vmatprep.subr.mxu0 %v4099_v8 }
  0x5c   :  { %3166 = vmatmul.mubr.f32.vlgmr.msra.gmra.mxu1 %v5759_v3  ;;  %3168 = vmatprep.subr.mxu1 %v5759_v3 }
  0x5d   :  { %3169 = vmatpush3.msra.mxu1 %v4186_v23  ;;  %617 = vmatpush1.msra.mxu0 %v4105_v9 }
  0x5e   :  { %3170 = vmatprep.subr.mxu1 %v5759_v3  ;;  %618 = vmatprep.subr.mxu0 %v4111_v10 }
  0x5f   :  { %3171 = vmatpush3.msra.mxu1 %v4226_v30  ;;  %619 = vmatpush1.msra.mxu0 %v4118_v11 }
  0x60   :  { %3172 = vmatprep.subr.mxu1 %v5759_v3  ;;  %620 = vmatprep.subr.mxu0 %v4133_v14 }
  0x61   :  { %3173 = vmatpush3.msra.mxu1 %v4235_v31  ;;  %621 = vmatpush1.msra.mxu0 %v4139_v15 }
  0x62   :  { %3174 = vmatprep.subr.mxu1 %v5759_v3  ;;  %622 = vmatprep.subr.mxu0 %v4145_v16 }
  0x63   :  { %3175 = vmatpush3.msra.mxu1 %v4245_v32  ;;  %623 = vmatpush1.msra.mxu0 %v4152_v17 }
  0x64   :  { %3176 = vmatprep.subr.mxu1 %v5759_v3  ;;  %624 = vmatprep.subr.mxu0 %v4162_v19 }
  0x65   :  { %3177 = vmatpush3.msra.mxu1 %v4254_v34  ;;  %625 = vmatpush1.msra.mxu0 %v4168_v20 }
  0x66   :  { %3178 = vmatprep.subr.mxu1 %v5759_v3  ;;  %626 = vmatprep.subr.mxu0 %v4174_v21 }
  0x67   :  { %3179 = vmatpush3.msra.mxu1 %v4264_v35  ;;  %627 = vmatpush1.msra.mxu0 %v4181_v22 }
  0x68   :  { %3180 = vmatprep.subr.mxu1 %v5759_v3  ;;  %628 = vmatprep.subr.mxu0 %v4196_v25 }
  0x69   :  { %3181 = vmatpush3.msra.mxu1 %v4273_v37  ;;  %629 = vmatpush1.msra.mxu0 %v4202_v26 }
  0x6a   :  { %3182 = vmatprep.subr.mxu1 %v5759_v3  ;;  %630 = vmatprep.subr.mxu0 %v4209_v27 }
  0x6b   :  { %3183 = vmatpush3.msra.mxu1 %v4282_v38  ;;  %631 = vmatpush1.msra.mxu0 %v4221_v29 }
  0x6c   :  { %3184 = vmatprep.subr.mxu1 %v5759_v3  ;;  %664 = vmatprep.mubr.f32.mxu0 %v5759_v3 }
  0x6d   :  { %3185 = vmatpush3.msra.mxu1 %v4291_v40  ;;  %3200 = vmatprep.mubr.msk.f32.mxu1 %vm3762_vm4, %v5759_v3 }
  0x6e   :  { %3186 = vmatprep.subr.mxu1 %v5759_v3  ;;  %775 = vmatprep.subr.mxu0 %v3965_v46 }
  0x6f   :  { %3187 = vmatpush3.msra.mxu1 %v4301_v41 }
  0x70   :  { %3188 = vmatprep.subr.mxu1 %v5759_v3 }
  0x71   :  { %3189 = vmatpush3.msra.mxu1 %v4310_v43 }
  0x72   :  { %3190 = vmatprep.subr.mxu1 %v5759_v3 }
  0x73   :  { %3191 = vmatpush3.msra.mxu1 %v4319_v44 }
  0x74   :  { %3192 = vmatprep.subr.mxu1 %v5759_v3 }
  0x75   :  { %3193 = vmatpush3.msra.mxu1 %v4327_v45 }
  0x76   :  { %3194 = vmatprep.subr.mxu1 %v5759_v3 }
  0x77   :  { %3195 = vmatpush3.msra.mxu1 %v4336_v50 }
  0x78   :  { %3196 = vmatprep.subr.mxu1 %v5759_v3 }
  0x79   :  { %3197 = vmatpush3.msra.mxu1 %v4345_v51 }
  0x7a   :  { %3198 = vmatprep.subr.mxu1 %v5759_v3 }
  0x7b   :  { %3199 = vmatpush3.msra.mxu1 %v4354_v56 }
  0x7c   :  { %3203 = vmatprep.subr.mxu1 %v5759_v3 }
  0xe2   :  { %v179_v7 = vpop.f32.mrf.mxu0 }
  0xe4   :  { %v181_v13 = vpop.f32.mrf.mxu0 }
  0xe6   :  { %v185_v24 = vpop.f32.mrf.mxu0 }
  0xe7   :  { %v4431_v36 = vadd.f32 %v185_v24, %v101_v18 }
  0xe8   :  { %v187_v39 = vpop.f32.mrf.mxu0 }
  0xe9   :  { %5831 = vst [vmem:[#allocation16_spill] sm:$0xff] %v4431_v36  ;;  %v4433_v42 = vadd.f32 %v187_v39, %v105_v33  ;;  %v4448_v39 = vsub.s32 2, %v4418_v62 }
  0xea   :  { %v191_v57 = vpop.f32.mrf.mxu0 }
  0xeb   :  { %5832 = vst [vmem:[#allocation17_spill] sm:$0xff] %v4433_v42  ;;  %v4435_v4 = vadd.f32 %v191_v57, %v101_v18  ;;  %5839 = vst [vmem:[#allocation24_spill] sm:$0xff] %v4448_v39 }
  0xec   :  { %v193_v3 = vpop.f32.mrf.mxu0 }
  0xed   :  { %5833 = vst [vmem:[#allocation18_spill] sm:$0xff] %v4435_v4  ;;  %v4437_v28 = vadd.f32 %v193_v3, %v105_v33 }
  0xee   :  { %v197_v46 = vpop.f32.mrf.mxu0 }
  0xef   :  { %5834 = vst [vmem:[#allocation19_spill] sm:$0xff] %v4437_v28  ;;  %v4439_v56 = vadd.f32 %v197_v46, %v101_v18  ;;  %v109_v46 = vrot.slane %v86_v6, %v4448_v39 }
  0xf0   :  { %v199_v29 = vpop.f32.mrf.mxu0 }
  0xf1   :  { %5835 = vst [vmem:[#allocation20_spill] sm:$0xff] %v4439_v56  ;;  %v4441_v27 = vadd.f32 %v199_v29, %v105_v33 }
  0xf2   :  { %v203_v51 = vpop.f32.mrf.mxu0 }
  0xf3   :  { %5836 = vst [vmem:[#allocation21_spill] sm:$0xff] %v4441_v27  ;;  %v4443_v26 = vadd.f32 %v203_v51, %v101_v18  ;;  %v406_v51 = vld [vmem:[%s5749_s6] sm:$0x7] }
  0xf4   :  { %v205_v24 = vpop.f32.mrf.mxu0 }
  0xf5   :  { %5837 = vst [vmem:[#allocation22_spill] sm:$0xff] %v4443_v26  ;;  %v4445_v36 = vadd.f32 %v205_v24, %v105_v33  ;;  %v3123_v24 = vpop.f32.mrf.mxu1  ;;  %v180_v26 = vadd.f32 %v179_v7, %v101_v18 }
  0xf6   :  { %v209_v57 = vpop.f32.mrf.mxu0  ;;  %v4462_v62 = vadd.f32 %v3123_v24, %v109_v46 }
  0xf7   :  { %5838 = vst [vmem:[#allocation23_spill] sm:$0xff] %v4445_v36  ;;  %v4450_v4 = vadd.f32 %v209_v57, %v101_v18 }
  0xf8   :  { %v211_v3 = vpop.f32.mrf.mxu0  ;;  %5844 = vst [vmem:[#allocation29_spill] sm:$0xff] %v4462_v62 }
  0xf9   :  { %5840 = vst [vmem:[#allocation25_spill] sm:$0xff] %v4450_v4  ;;  %v4452_v28 = vadd.f32 %v211_v3, %v105_v33  ;;  %v4467_v3 = vrot.slane %v406_v51, %v4421_v63 }
  0xfa   :  { %v215_v56 = vpop.f32.mrf.mxu0 }
  0xfb   :  { %5841 = vst [vmem:[#allocation26_spill] sm:$0xff] %v4452_v28  ;;  %v4455_v29 = vadd.f32 %v215_v56, %v101_v18  ;;  %5846 = vst [vmem:[#allocation31_spill] sm:$0xff] %v4467_v3 }
  0xfc   :  { %v217_v27 = vpop.f32.mrf.mxu0 }
  0xfd   :  { %5842 = vst [vmem:[#allocation27_spill] sm:$0xff] %v4455_v29  ;;  %v4460_v36 = vadd.f32 %v217_v27, %v105_v33  ;;  %v292_v29 = vpop.f32.mrf.mxu1 }
  0xfe   :  { %v221_v57 = vpop.f32.mrf.mxu0 }
  0xff   :  { %5843 = vst [vmem:[#allocation28_spill] sm:$0xff] %v4460_v36  ;;  %v4464_v4 = vadd.f32 %v221_v57, %v101_v18  ;;  %v4477_v57 = vrot.slane %v406_v51, %v4427_v12 }
 0x100   :  { %v223_v6 = vpop.f32.mrf.mxu0 }
 0x101   :  { %5845 = vst [vmem:[#allocation30_spill] sm:$0xff] %v4464_v4  ;;  %v4469_v28 = vadd.f32 %v223_v6, %v105_v33  ;;  %v3126_v25 = vpop.f32.mrf.mxu1 }
 0x102   :  { %v493_v56 = vpop.f32.mrf.mxu0  ;;  %v4472_v27 = vadd.f32 %v3126_v25, %v109_v46 }
 0x103   :  { %5847 = vst [vmem:[#allocation32_spill] sm:$0xff] %v4469_v28  ;;  %v494_v42 = vadd.f32 %v493_v56, %v4467_v3  ;;  %v302_v24 = vpop.f32.mrf.mxu1 }
 0x104   :  { %5848 = vst [vmem:[#allocation33_spill] sm:$0xff] %v4472_v27  ;;  %v4474_v62 = vadd.f32 %v302_v24, %v109_v46  ;;  %v495_v6 = vpop.f32.mrf.mxu0 }
 0x105   :  { %v568_v50 = vadd.f32 %v494_v42, %v180_v26  ;;  %v496_v18 = vadd.f32 %v495_v6, %v4477_v57  ;;  %v182_v42 = vadd.f32 %v181_v13, %v105_v33 }
 0x106   :  { %5849 = vst [vmem:[#allocation34_spill] sm:$0xff] %v4474_v62  ;;  %v3129_v63 = vpop.f32.mrf.mxu1 }
 0x107   :  { %v2803_v36 = vmul.f32 -1.442695, %v568_v50  ;;  %v4479_v28 = vadd.f32 %v3129_v63, %v109_v46  ;;  %v575_v24 = vadd.f32 %v496_v18, %v182_v42 }
 0x108   :  { %v312_v4 = vpop.f32.mrf.mxu1 }
 0x109   :  { %3568 = vpow2.f32 %v2803_v36  ;;  %5850 = vst [vmem:[#allocation35_spill] sm:$0xff] %v4479_v28  ;;  %v4481_v7 = vadd.f32 %v312_v4, %v109_v46  ;;  %v2804_v12 = vmul.f32 -1.442695, %v575_v24  ;;  %v4489_v36 = vrot.slane %v406_v51, %v4448_v39  ;;  %v5860_v24 = vld [vmem:[#allocation11_spill] sm:$0xff] }
 0x10a   :  { %v3132_v26 = vpop.f32.mrf.mxu1 }
 0x10b   :  { %5851 = vst [vmem:[#allocation36_spill] sm:$0xff] %v4481_v7  ;;  %v4484_v25 = vadd.f32 %v3132_v26, %v109_v46  ;;  %3570 = vpow2.f32 %v2804_v12  ;;  %v4492_v12 = vpop.permute.xlu0 %591  ;;  %v5867_v7 = vld [vmem:[#allocation16_spill] sm:$0xff] }
 0x10c   :  { %v322_v50 = vpop.f32.mrf.mxu1  ;;  %5854 = vst [vmem:[#allocation39_spill] sm:$0xff] %v4492_v12  ;;  %vm593_vm5 = vcmp.eq.s32.totalorder %v4492_v12, 1  ;;  %v5897_v12 = vld [vmem:[#allocation23_spill] sm:$0xff] }
 0x10d   :  { %5852 = vst [vmem:[#allocation37_spill] sm:$0xff] %v4484_v25  ;;  %v4486_v56 = vadd.f32 %v322_v50, %v109_v46  ;;  %v293_v25 = vadd.f32 %v292_v29, %v109_v46  ;;  %v5857_v46 = vld [vmem:[#allocation10_spill] sm:$0xff]  ;;  %v5858_v29 = vld [vmem:[#allocation5_spill] sm:$0xff] }
 0x10f   :  { %5853 = vst [vmem:[#allocation38_spill] sm:$0xff] %v4486_v56 }
 0x116   :  { %v3569_v27 = vpop.eup %3568 }
 0x117   :  { %v572_v62 = vadd.f32 1.0, %v3569_v27 }
 0x118   :  { %v3571_v28 = vpop.eup %3570 }
 0x119   :  { %3572 = vrcp.f32 %v572_v62  ;;  %v579_v33 = vadd.f32 1.0, %v3571_v28  ;;  %v5856_v28 = vmov 0.0  }
 0x11c   :  { %v564_v63 = vpop.f32.mrf.mxu1 }
 0x11d   :  { %v565_v6 = vadd.f32 %v564_v63, %v4489_v36  ;;  %v5861_v63 = vld [vmem:[#allocation7_spill] sm:$0xff] }
 0x11e   :  { %v3167_v4 = vpop.f32.mrf.mxu1 }
 0x11f   :  { %v5862_v4 = vld [vmem:[#allocation9_spill] sm:$0xff] }
 0x126   :  { %v3573_v26 = vpop.eup %3572 }
 0x127   :  { %v582_v13 = vmul.f32 %v3573_v26, %v565_v6  ;;  %v5863_v6 = vld [vmem:[#allocation12_spill] sm:$0xff] }
 0x128   :  { %v5864_v26 = vld [vmem:[#allocation4_spill] sm:$0xff] }
 0x129   :  { %v583_v50 = vadd.f32 %v582_v13, %v293_v25  ;;  %v5859_v25 = vld [vmem:[#allocation6_spill] sm:$0xff]  ;;  %v5865_v13 = vld [vmem:[#allocation8_spill] sm:$0xff] }
 0x12a   :  { %vm936_vm6 = vcmp.gt.s32.totalorder %v5865_v13, 2  ;;  %vm1111_vm7 = vcmp.gt.s32.totalorder %v5865_v13, 3  ;;  %vm1461_vm8 = vcmp.gt.s32.totalorder %v5865_v13, 5  ;;  %vm1811_vm9 = vcmp.gt.s32.totalorder %v5865_v13, 7 }
 0x12b   :  { %3574 = vtanh.f32 %v583_v50 }
 0x12c   :  { %3576 = vrcp.f32 %v579_v33  ;;  %v5866_v33 = vmov 0  }
 0x12d   :  { %v937_v50 = vsel %vm936_vm6, 1, %v5866_v33 }
 0x12e   :  { %939 = vperm.xlu1 %3567, %v937_v50  }
 0x138   :  { %v3575_v18 = vpop.eup %3574 }
 0x139   :  { %v585_v42 = vsub.f32 0.0, %v3575_v18  ;;  %v3577_v27 = vpop.eup %3576 }
 0x13b   :  { %v586_v62 = vmul.f32 %v3577_v27, %v585_v42  ;;  %v1462_v42 = vsel %vm1461_vm8, 1, %v5866_v33  ;;  %v1812_v27 = vsel %vm1811_vm9, 1, %v5866_v33  ;;  %vm2443_vm9 = vcmask 1045504  }
 0x13d   :  { %v4495_v51 = vadd.f32 %v3575_v18, %v586_v62  ;;  %v1112_v18 = vsel %vm1111_vm7, 1, %v5866_v33 }
 0x13e   :  { %1114 = vperm.xlu1 %3567, %v1112_v18  }
 0x13f   :  { %5855 = vst [vmem:[#allocation40_spill] sm:$0xff] %v4495_v51  ;;  %2805 = vmatmul.mubr.msk.f32.vlgmr.msra.gmra.mxu0 %vm593_vm5, %v4495_v51  ;;  %3201 = vmatmul.mubr.msk.f32.vlgmr.msra.gmra.mxu1 %vm593_vm5, %v4495_v51 }
 0x140   :  { %776 = vmatpush1.msra.mxu0 %v3970_v47  ;;  %3204 = vmatpush3.msra.mxu1 %v4186_v23 }
 0x141   :  { %777 = vmatprep.subr.mxu0 %v3975_v48  ;;  %3205 = vmatprep.subr.mxu1 %v5856_v28 }
 0x142   :  { %778 = vmatpush1.msra.mxu0 %v3982_v49  ;;  %3206 = vmatpush3.msra.mxu1 %v4226_v30 }
 0x143   :  { %779 = vmatprep.subr.mxu0 %v3997_v52  ;;  %3207 = vmatprep.subr.mxu1 %v5856_v28 }
 0x144   :  { %780 = vmatpush1.msra.mxu0 %v4003_v53  ;;  %3208 = vmatpush3.msra.mxu1 %v4235_v31 }
 0x145   :  { %781 = vmatprep.subr.mxu0 %v4009_v54  ;;  %3209 = vmatprep.subr.mxu1 %v5856_v28 }
 0x146   :  { %782 = vmatpush1.msra.mxu0 %v4016_v55  ;;  %3210 = vmatpush3.msra.mxu1 %v4245_v32 }
 0x147   :  { %783 = vmatprep.subr.mxu0 %v4031_v58  ;;  %3211 = vmatprep.subr.mxu1 %v5856_v28 }
 0x148   :  { %784 = vmatpush1.msra.mxu0 %v4037_v59  ;;  %3212 = vmatpush3.msra.mxu1 %v4254_v34 }
 0x149   :  { %785 = vmatprep.subr.mxu0 %v4043_v60  ;;  %3213 = vmatprep.subr.mxu1 %v5856_v28 }
 0x14a   :  { %786 = vmatpush1.msra.mxu0 %v4050_v61  ;;  %3214 = vmatpush3.msra.mxu1 %v4264_v35 }
 0x14b   :  { %787 = vmatprep.subr.mxu0 %v4065_v0  ;;  %3215 = vmatprep.subr.mxu1 %v5856_v28 }
 0x14c   :  { %788 = vmatpush1.msra.mxu0 %v4071_v1  ;;  %3216 = vmatpush3.msra.mxu1 %v4273_v37 }
 0x14d   :  { %789 = vmatprep.subr.mxu0 %v4077_v2  ;;  %3217 = vmatprep.subr.mxu1 %v5856_v28 }
 0x14e   :  { %790 = vmatpush1.msra.mxu0 %v4084_v5  ;;  %3218 = vmatpush3.msra.mxu1 %v4282_v38 }
 0x14f   :  { %791 = vmatprep.subr.mxu0 %v4099_v8  ;;  %3219 = vmatprep.subr.mxu1 %v5856_v28 }
 0x150   :  { %792 = vmatpush1.msra.mxu0 %v4105_v9  ;;  %3220 = vmatpush3.msra.mxu1 %v4291_v40 }
 0x151   :  { %793 = vmatprep.subr.mxu0 %v4111_v10  ;;  %3221 = vmatprep.subr.mxu1 %v5856_v28 }
 0x152   :  { %794 = vmatpush1.msra.mxu0 %v4118_v11  ;;  %3222 = vmatpush3.msra.mxu1 %v4301_v41 }
 0x153   :  { %795 = vmatprep.subr.mxu0 %v4133_v14  ;;  %3223 = vmatprep.subr.mxu1 %v5856_v28 }
 0x154   :  { %796 = vmatpush1.msra.mxu0 %v4139_v15  ;;  %3224 = vmatpush3.msra.mxu1 %v4310_v43 }
 0x155   :  { %797 = vmatprep.subr.mxu0 %v4145_v16  ;;  %3225 = vmatprep.subr.mxu1 %v5856_v28 }
 0x156   :  { %798 = vmatpush1.msra.mxu0 %v4152_v17  ;;  %3226 = vmatpush3.msra.mxu1 %v4319_v44 }
 0x157   :  { %799 = vmatprep.subr.mxu0 %v4162_v19  ;;  %3227 = vmatprep.subr.mxu1 %v5856_v28 }
 0x158   :  { %800 = vmatpush1.msra.mxu0 %v4168_v20  ;;  %3228 = vmatpush3.msra.mxu1 %v4327_v45 }
 0x159   :  { %801 = vmatprep.subr.mxu0 %v4174_v21  ;;  %3229 = vmatprep.subr.mxu1 %v5856_v28 }
 0x15a   :  { %802 = vmatpush1.msra.mxu0 %v4181_v22  ;;  %3230 = vmatpush3.msra.mxu1 %v5857_v46 }
 0x15b   :  { %803 = vmatprep.subr.mxu0 %v5858_v29  ;;  %3231 = vmatprep.subr.mxu1 %v5856_v28 }
 0x15c   :  { %804 = vmatpush1.msra.mxu0 %v5859_v25  ;;  %3232 = vmatpush3.msra.mxu1 %v5860_v24 }
 0x15d   :  { %805 = vmatprep.subr.mxu0 %v5861_v63  ;;  %3233 = vmatprep.subr.mxu1 %v5856_v28  ;;  %v5868_v63 = vld [vmem:[#allocation17_spill] sm:$0xff] }
 0x15e   :  { %806 = vmatpush1.msra.mxu0 %v5862_v4  ;;  %839 = vmatprep.mubr.f32.mxu0 %v5856_v28 }
 0x15f   :  { %3234 = vmatpush3.msra.mxu1 %v5863_v6  ;;  %3235 = vmatprep.mubr.msk.f32.mxu1 %vm3762_vm4, %v5856_v28 }
 0x160   :  { %950 = vmatprep.subr.mxu0 %v5864_v26  ;;  %3238 = vmatprep.subr.mxu1 %v5856_v28 }
 0x161   :  { %1464 = vperm.xlu1 %3567, %v1462_v42  }
 0x165   :  { %1814 = vperm.xlu1 %3567, %v1812_v27  }
 0x1ff   :  { %v666_v62 = vpop.f32.mrf.mxu0  ;;  %v737_v26 = vpop.f32.mrf.mxu1 }
 0x200   :  { %v667_v39 = vadd.f32 %v666_v62, %v4467_v3  ;;  %v738_v27 = vadd.f32 %v737_v26, %v4489_v36 }
 0x201   :  { %v3202_v56 = vpop.f32.mrf.mxu1  ;;  %v668_v4 = vpop.f32.mrf.mxu0 }
 0x202   :  { %v741_v50 = vadd.f32 %v667_v39, %v5867_v7  ;;  %v669_v18 = vadd.f32 %v668_v4, %v4477_v57  ;;  %v5869_v56 = vld [vmem:[#allocation29_spill] sm:$0xff] }
 0x204   :  { %v2807_v6 = vmul.f32 -1.442695, %v741_v50  ;;  %v748_v24 = vadd.f32 %v669_v18, %v5868_v63  ;;  %v4587_v63 = vsel %vm593_vm5, %v4495_v51, 0.0 }
 0x205   :  { %5870 = vst [vmem:[#allocation10_spill] sm:$0xff] %v4587_v63 }
 0x206   :  { %3578 = vpow2.f32 %v2807_v6  ;;  %v2808_v25 = vmul.f32 -1.442695, %v748_v24  ;;  %v4590_v6 = vpop.permute.xlu0 %764 }
 0x207   :  { %5871 = vst [vmem:[#allocation4_spill] sm:$0xff] %v4590_v6  ;;  %vm766_vm10 = vcmp.eq.s32.totalorder %v4590_v6, 1 }
 0x208   :  { %3580 = vpow2.f32 %v2808_v25 }
 0x213   :  { %v3579_v13 = vpop.eup %3578 }
 0x214   :  { %v745_v42 = vadd.f32 1.0, %v3579_v13 }
 0x215   :  { %v3581_v33 = vpop.eup %3580 }
 0x216   :  { %3582 = vrcp.f32 %v745_v42  ;;  %v752_v39 = vadd.f32 1.0, %v3581_v33  ;;  %v4682_v33 = vpop.permute.xlu1 %939 }
 0x217   :  { %5884 = vst [vmem:[#allocation17_spill] sm:$0xff] %v4682_v33  ;;  %vm941_vm11 = vcmp.eq.s32.totalorder %v4682_v33, 1 }
 0x223   :  { %v3583_v29 = vpop.eup %3582 }
 0x224   :  { %v755_v62 = vmul.f32 %v3583_v29, %v738_v27 }
 0x226   :  { %v756_v3 = vadd.f32 %v755_v62, %v5869_v56 }
 0x228   :  { %3584 = vtanh.f32 %v756_v3 }
 0x229   :  { %3586 = vrcp.f32 %v752_v39  ;;  %v4698_v39 = vld [vmem:[%s5746_s4 + $0x168] sm:$0xff] }
 0x235   :  { %v3585_v7 = vpop.eup %3584 }
 0x236   :  { %v758_v24 = vsub.f32 %v4587_v63, %v3585_v7  ;;  %v3587_v25 = vpop.eup %3586 }
 0x238   :  { %v759_v4 = vmul.f32 %v3587_v25, %v758_v24  ;;  %v4712_v24 = vld [vmem:[%s5746_s4 + $0x150] sm:$0xff]  ;;  %v4726_v25 = vld [vmem:[%s5746_s4 + $0x138] sm:$0xff] }
 0x23a   :  { %v4592_v26 = vadd.f32 %v3585_v7, %v759_v4  ;;  %v4705_v7 = vld [vmem:[%s5746_s4 + $0x158] sm:$0xff]  ;;  %v4740_v4 = vld [vmem:[%s5746_s4 + $0x120] sm:$0xff] }
 0x23c   :  { %5872 = vst [vmem:[#allocation8_spill] sm:$0xff] %v4592_v26  ;;  %v4599_v3 = vsel %vm766_vm10, %v4592_v26, %v4587_v63 }
 0x23d   :  { %840 = vmatmul.mubr.f32.vlgmr.msra.gmra.mxu0 %v4599_v3  ;;  %3236 = vmatmul.mubr.f32.vlgmr.msra.gmra.mxu1 %v4599_v3 }
 0x23e   :  { %951 = vmatpush1.msra.mxu0 %v3970_v47  ;;  %3239 = vmatpush3.msra.mxu1 %v4186_v23  ;;  %v5873_v47 = vld [vmem:[#allocation5_spill] sm:$0xff] }
 0x23f   :  { %952 = vmatprep.subr.mxu0 %v3975_v48  ;;  %3240 = vmatprep.subr.mxu1 %v5856_v28  ;;  %v5874_v48 = vld [vmem:[#allocation6_spill] sm:$0xff] }
 0x240   :  { %953 = vmatpush1.msra.mxu0 %v3982_v49  ;;  %3241 = vmatpush3.msra.mxu1 %v4226_v30  ;;  %v5875_v49 = vld [vmem:[#allocation11_spill] sm:$0xff] }
 0x241   :  { %954 = vmatprep.subr.mxu0 %v3997_v52  ;;  %3242 = vmatprep.subr.mxu1 %v5856_v28  ;;  %v5876_v52 = vld [vmem:[#allocation7_spill] sm:$0xff] }
 0x242   :  { %955 = vmatpush1.msra.mxu0 %v4003_v53  ;;  %3243 = vmatpush3.msra.mxu1 %v4235_v31  ;;  %v5877_v53 = vld [vmem:[#allocation9_spill] sm:$0xff] }
 0x243   :  { %956 = vmatprep.subr.mxu0 %v4009_v54  ;;  %3244 = vmatprep.subr.mxu1 %v5856_v28  ;;  %v5878_v54 = vld [vmem:[#allocation12_spill] sm:$0xff] }
 0x244   :  { %957 = vmatpush1.msra.mxu0 %v4016_v55  ;;  %3245 = vmatpush3.msra.mxu1 %v4245_v32  ;;  %v4671_v55 = vld [vmem:[%s5746_s4 + $0x170] sm:$0xff] }
 0x245   :  { %958 = vmatprep.subr.mxu0 %v4031_v58  ;;  %3246 = vmatprep.subr.mxu1 %v5856_v28  ;;  %5879 = vst [vmem:[#allocation16_spill] sm:$0xff] %v4671_v55 }
 0x246   :  { %959 = vmatpush1.msra.mxu0 %v4037_v59  ;;  %3247 = vmatpush3.msra.mxu1 %v4254_v34 }
 0x247   :  { %960 = vmatprep.subr.mxu0 %v4043_v60  ;;  %3248 = vmatprep.subr.mxu1 %v5856_v28  ;;  %v5880_v60 = vld [vmem:[#allocation31_spill] sm:$0xff] }
 0x248   :  { %961 = vmatpush1.msra.mxu0 %v4050_v61  ;;  %3249 = vmatpush3.msra.mxu1 %v4264_v35 }
 0x249   :  { %962 = vmatprep.subr.mxu0 %v4065_v0  ;;  %3250 = vmatprep.subr.mxu1 %v5856_v28 }
 0x24a   :  { %963 = vmatpush1.msra.mxu0 %v4071_v1  ;;  %3251 = vmatpush3.msra.mxu1 %v4273_v37  ;;  %v5881_v1 = vld [vmem:[#allocation18_spill] sm:$0xff] }
 0x24b   :  { %964 = vmatprep.subr.mxu0 %v4077_v2  ;;  %3252 = vmatprep.subr.mxu1 %v5856_v28 }
 0x24c   :  { %965 = vmatpush1.msra.mxu0 %v4084_v5  ;;  %3253 = vmatpush3.msra.mxu1 %v4282_v38 }
 0x24d   :  { %966 = vmatprep.subr.mxu0 %v4099_v8  ;;  %3254 = vmatprep.subr.mxu1 %v5856_v28 }
 0x24e   :  { %967 = vmatpush1.msra.mxu0 %v4105_v9  ;;  %3255 = vmatpush3.msra.mxu1 %v4291_v40 }
 0x24f   :  { %968 = vmatprep.subr.mxu0 %v4111_v10  ;;  %3256 = vmatprep.subr.mxu1 %v5856_v28  ;;  %v5882_v10 = vld [vmem:[#allocation19_spill] sm:$0xff] }
 0x250   :  { %969 = vmatpush1.msra.mxu0 %v4118_v11  ;;  %3257 = vmatpush3.msra.mxu1 %v4301_v41 }
 0x251   :  { %970 = vmatprep.subr.mxu0 %v4133_v14  ;;  %3258 = vmatprep.subr.mxu1 %v5856_v28 }
 0x252   :  { %971 = vmatpush1.msra.mxu0 %v4139_v15  ;;  %3259 = vmatpush3.msra.mxu1 %v4310_v43 }
 0x253   :  { %972 = vmatprep.subr.mxu0 %v4145_v16  ;;  %3260 = vmatprep.subr.mxu1 %v5856_v28 }
 0x254   :  { %973 = vmatpush1.msra.mxu0 %v4152_v17  ;;  %3261 = vmatpush3.msra.mxu1 %v4319_v44 }
 0x255   :  { %974 = vmatprep.subr.mxu0 %v4162_v19  ;;  %3262 = vmatprep.subr.mxu1 %v5856_v28 }
 0x256   :  { %975 = vmatpush1.msra.mxu0 %v4168_v20  ;;  %3263 = vmatpush3.msra.mxu1 %v4327_v45 }
 0x257   :  { %976 = vmatprep.subr.mxu0 %v4174_v21  ;;  %3264 = vmatprep.subr.mxu1 %v5856_v28 }
 0x258   :  { %977 = vmatpush1.msra.mxu0 %v4181_v22  ;;  %3265 = vmatpush3.msra.mxu1 %v5857_v46  ;;  %v5883_v22 = vld [vmem:[#allocation34_spill] sm:$0xff] }
 0x259   :  { %978 = vmatprep.subr.mxu0 %v5873_v47  ;;  %3266 = vmatprep.subr.mxu1 %v5856_v28 }
 0x25a   :  { %979 = vmatpush1.msra.mxu0 %v5874_v48  ;;  %3267 = vmatpush3.msra.mxu1 %v5875_v49 }
 0x25b   :  { %980 = vmatprep.subr.mxu0 %v5876_v52  ;;  %3268 = vmatprep.subr.mxu1 %v5856_v28 }
 0x25c   :  { %981 = vmatpush1.msra.mxu0 %v5877_v53  ;;  %1014 = vmatprep.mubr.f32.mxu0 %v5856_v28 }
 0x25d   :  { %3269 = vmatpush3.msra.mxu1 %v5878_v54  ;;  %3270 = vmatprep.mubr.msk.f32.mxu1 %vm3762_vm4, %v5856_v28 }
 0x25e   :  { %1125 = vmatprep.subr.mxu0 %v4671_v55  ;;  %3273 = vmatprep.subr.mxu1 %v5856_v28 }
 0x2fd   :  { %v841_v58 = vpop.f32.mrf.mxu0  ;;  %v912_v59 = vpop.f32.mrf.mxu1 }
 0x2fe   :  { %v842_v61 = vadd.f32 %v841_v58, %v5880_v60  ;;  %v913_v19 = vadd.f32 %v912_v59, %v4489_v36  ;;  %v4768_v58 = vld [vmem:[%s5746_s4 + $0xf0] sm:$0xff]  ;;  %v4782_v59 = vld [vmem:[%s5746_s4 + $0xd8] sm:$0xff] }
 0x2ff   :  { %v3237_v0 = vpop.f32.mrf.mxu1  ;;  %v843_v8 = vpop.f32.mrf.mxu0 }
 0x300   :  { %v916_v2 = vadd.f32 %v842_v61, %v5881_v1  ;;  %v844_v9 = vadd.f32 %v843_v8, %v4477_v57  ;;  %v4796_v61 = vld [vmem:[%s5746_s4 + $0xc0] sm:$0xff]  ;;  %v4810_v0 = vld [vmem:[%s5746_s4 + $0xa8] sm:$0xff]  ;;  %v4824_v1 = vld [vmem:[%s5746_s4 + $0x90] sm:$0xff] }
 0x301   :  { %v4866_v8 = vld [vmem:[%s5746_s4 + $0x48] sm:$0xff] }
 0x302   :  { %v2809_v5 = vmul.f32 -1.442695, %v916_v2  ;;  %v923_v11 = vadd.f32 %v844_v9, %v5882_v10  ;;  %v4838_v2 = vld [vmem:[%s5746_s4 + $0x78] sm:$0xff]  ;;  %v4880_v9 = vld [vmem:[%s5746_s4 + $0x30] sm:$0xff] }
 0x304   :  { %3588 = vpow2.f32 %v2809_v5  ;;  %v2810_v14 = vmul.f32 -1.442695, %v923_v11  ;;  %v4852_v5 = vld [vmem:[%s5746_s4 + $0x60] sm:$0xff] }
 0x306   :  { %3590 = vpow2.f32 %v2810_v14 }
 0x311   :  { %v3589_v15 = vpop.eup %3588 }
 0x312   :  { %v920_v16 = vadd.f32 1.0, %v3589_v15 }
 0x313   :  { %v3591_v17 = vpop.eup %3590 }
 0x314   :  { %3592 = vrcp.f32 %v920_v16  ;;  %v927_v50 = vadd.f32 1.0, %v3591_v17 }
 0x321   :  { %v3593_v20 = vpop.eup %3592 }
 0x322   :  { %v930_v21 = vmul.f32 %v3593_v20, %v913_v19 }
 0x324   :  { %v931_v29 = vadd.f32 %v930_v21, %v5883_v22 }
 0x326   :  { %3594 = vtanh.f32 %v931_v29  ;;  %v5888_v29 = vld [vmem:[#allocation33_spill] sm:$0xff] }
 0x327   :  { %3596 = vrcp.f32 %v927_v50 }
 0x333   :  { %v3595_v18 = vpop.eup %3594 }
 0x334   :  { %v933_v13 = vsub.f32 %v4599_v3, %v3595_v18  ;;  %v3597_v42 = vpop.eup %3596 }
 0x336   :  { %v934_v27 = vmul.f32 %v3597_v42, %v933_v13 }
 0x338   :  { %v4685_v62 = vadd.f32 %v3595_v18, %v934_v27 }
 0x33a   :  { %5885 = vst [vmem:[#allocation29_spill] sm:$0xff] %v4685_v62  ;;  %v4691_v56 = vsel %vm941_vm11, %v4685_v62, %v4599_v3  ;;  %v4754_v3 = vld [vmem:[%s5746_s4 + $0x108] sm:$0xff] }
 0x33b   :  { %1015 = vmatmul.mubr.f32.vlgmr.msra.gmra.mxu0 %v4691_v56  ;;  %3271 = vmatmul.mubr.f32.vlgmr.msra.gmra.mxu1 %v4691_v56 }
 0x33c   :  { %1126 = vmatpush1.msra.mxu0 %v4698_v39  ;;  %3274 = vmatpush3.msra.mxu1 %v4186_v23  ;;  %v4719_v23 = vld [vmem:[%s5746_s4 + $0x140] sm:$0xff] }
 0x33d   :  { %1127 = vmatprep.subr.mxu0 %v4705_v7  ;;  %3275 = vmatprep.subr.mxu1 %v5856_v28 }
 0x33e   :  { %1128 = vmatpush1.msra.mxu0 %v4712_v24  ;;  %3276 = vmatpush3.msra.mxu1 %v4226_v30  ;;  %v4733_v30 = vld [vmem:[%s5746_s4 + $0x128] sm:$0xff] }
 0x33f   :  { %1129 = vmatprep.subr.mxu0 %v4719_v23  ;;  %3277 = vmatprep.subr.mxu1 %v5856_v28 }
 0x340   :  { %1130 = vmatpush1.msra.mxu0 %v4726_v25  ;;  %3278 = vmatpush3.msra.mxu1 %v4235_v31  ;;  %v4747_v31 = vld [vmem:[%s5746_s4 + $0x110] sm:$0xff] }
 0x341   :  { %1131 = vmatprep.subr.mxu0 %v4733_v30  ;;  %3279 = vmatprep.subr.mxu1 %v5856_v28 }
 0x342   :  { %1132 = vmatpush1.msra.mxu0 %v4740_v4  ;;  %3280 = vmatpush3.msra.mxu1 %v4245_v32  ;;  %v4761_v32 = vld [vmem:[%s5746_s4 + $0xf8] sm:$0xff] }
 0x343   :  { %1133 = vmatprep.subr.mxu0 %v4747_v31  ;;  %3281 = vmatprep.subr.mxu1 %v5856_v28 }
 0x344   :  { %1134 = vmatpush1.msra.mxu0 %v4754_v3  ;;  %3282 = vmatpush3.msra.mxu1 %v4254_v34  ;;  %v4775_v34 = vld [vmem:[%s5746_s4 + $0xe0] sm:$0xff] }
 0x345   :  { %1135 = vmatprep.subr.mxu0 %v4761_v32  ;;  %3283 = vmatprep.subr.mxu1 %v5856_v28 }
 0x346   :  { %1136 = vmatpush1.msra.mxu0 %v4768_v58  ;;  %3284 = vmatpush3.msra.mxu1 %v4264_v35  ;;  %v4789_v35 = vld [vmem:[%s5746_s4 + $0xc8] sm:$0xff] }
 0x347   :  { %1137 = vmatprep.subr.mxu0 %v4775_v34  ;;  %3285 = vmatprep.subr.mxu1 %v5856_v28 }
 0x348   :  { %1138 = vmatpush1.msra.mxu0 %v4782_v59  ;;  %3286 = vmatpush3.msra.mxu1 %v4273_v37  ;;  %v4803_v37 = vld [vmem:[%s5746_s4 + $0xb0] sm:$0xff] }
 0x349   :  { %1139 = vmatprep.subr.mxu0 %v4789_v35  ;;  %3287 = vmatprep.subr.mxu1 %v5856_v28 }
 0x34a   :  { %1140 = vmatpush1.msra.mxu0 %v4796_v61  ;;  %3288 = vmatpush3.msra.mxu1 %v4282_v38  ;;  %v4817_v38 = vld [vmem:[%s5746_s4 + $0x98] sm:$0xff] }
 0x34b   :  { %1141 = vmatprep.subr.mxu0 %v4803_v37  ;;  %3289 = vmatprep.subr.mxu1 %v5856_v28 }
 0x34c   :  { %1142 = vmatpush1.msra.mxu0 %v4810_v0  ;;  %3290 = vmatpush3.msra.mxu1 %v4291_v40  ;;  %v4831_v40 = vld [vmem:[%s5746_s4 + $0x80] sm:$0xff] }
 0x34d   :  { %1143 = vmatprep.subr.mxu0 %v4817_v38  ;;  %3291 = vmatprep.subr.mxu1 %v5856_v28 }
 0x34e   :  { %1144 = vmatpush1.msra.mxu0 %v4824_v1  ;;  %3292 = vmatpush3.msra.mxu1 %v4301_v41  ;;  %v4845_v41 = vld [vmem:[%s5746_s4 + $0x68] sm:$0xff] }
 0x34f   :  { %1145 = vmatprep.subr.mxu0 %v4831_v40  ;;  %3293 = vmatprep.subr.mxu1 %v5856_v28 }
 0x350   :  { %1146 = vmatpush1.msra.mxu0 %v4838_v2  ;;  %3294 = vmatpush3.msra.mxu1 %v4310_v43  ;;  %v4859_v43 = vld [vmem:[%s5746_s4 + $0x50] sm:$0xff] }
 0x351   :  { %1147 = vmatprep.subr.mxu0 %v4845_v41  ;;  %3295 = vmatprep.subr.mxu1 %v5856_v28 }
 0x352   :  { %1148 = vmatpush1.msra.mxu0 %v4852_v5  ;;  %3296 = vmatpush3.msra.mxu1 %v4319_v44  ;;  %v4873_v44 = vld [vmem:[%s5746_s4 + $0x38] sm:$0xff] }
 0x353   :  { %1149 = vmatprep.subr.mxu0 %v4859_v43  ;;  %3297 = vmatprep.subr.mxu1 %v5856_v28 }
 0x354   :  { %1150 = vmatpush1.msra.mxu0 %v4866_v8  ;;  %3298 = vmatpush3.msra.mxu1 %v4327_v45 }
 0x355   :  { %1151 = vmatprep.subr.mxu0 %v4873_v44  ;;  %3299 = vmatprep.subr.mxu1 %v5856_v28 }
 0x356   :  { %1152 = vmatpush1.msra.mxu0 %v4880_v9  ;;  %3300 = vmatpush3.msra.mxu1 %v5857_v46 }
 0x357   :  { %1153 = vmatprep.subr.mxu0 %v5873_v47  ;;  %3301 = vmatprep.subr.mxu1 %v5856_v28 }
 0x358   :  { %1154 = vmatpush1.msra.mxu0 %v5874_v48  ;;  %3302 = vmatpush3.msra.mxu1 %v5875_v49  ;;  %v5886_v49 = vld [vmem:[#allocation20_spill] sm:$0xff] }
 0x359   :  { %1155 = vmatprep.subr.mxu0 %v5876_v52  ;;  %3303 = vmatprep.subr.mxu1 %v5856_v28 }
 0x35a   :  { %1156 = vmatpush1.msra.mxu0 %v5877_v53  ;;  %1189 = vmatprep.mubr.f32.mxu0 %v5856_v28 }
 0x35b   :  { %3304 = vmatpush3.msra.mxu1 %v5878_v54  ;;  %3305 = vmatprep.mubr.msk.f32.mxu1 %vm3762_vm4, %v5856_v28  ;;  %v5887_v54 = vld [vmem:[#allocation21_spill] sm:$0xff] }
 0x35c   :  { %1300 = vmatprep.subr.mxu0 %v4671_v55  ;;  %3308 = vmatprep.subr.mxu1 %v5856_v28 }
 0x3fb   :  { %v1016_v45 = vpop.f32.mrf.mxu0  ;;  %v1087_v46 = vpop.f32.mrf.mxu1 }
 0x3fc   :  { %v1017_v47 = vadd.f32 %v1016_v45, %v5880_v60  ;;  %v1088_v20 = vadd.f32 %v1087_v46, %v4489_v36 }
 0x3fd   :  { %v3272_v48 = vpop.f32.mrf.mxu1  ;;  %v1018_v53 = vpop.f32.mrf.mxu0 }
 0x3fe   :  { %v1091_v52 = vadd.f32 %v1017_v47, %v5886_v49  ;;  %v1019_v11 = vadd.f32 %v1018_v53, %v4477_v57  ;;  %v4904_v47 = vpop.permute.xlu1 %1114  ;;  %v4921_v49 = vld [vmem:[%s5746_s4 + $0x178] sm:$0xff] }
 0x3ff   :  { %5889 = vst [vmem:[#allocation5_spill] sm:$0xff] %v4904_v47  ;;  %vm1116_vm12 = vcmp.eq.s32.totalorder %v4904_v47, 1  ;;  %v4957_v53 = vld [vmem:[%s5746_s4 + $0x118] sm:$0xff] }
 0x400   :  { %v2811_v10 = vmul.f32 -1.442695, %v1091_v52  ;;  %v1098_v14 = vadd.f32 %v1019_v11, %v5887_v54  ;;  %v4939_v52 = vld [vmem:[%s5746_s4 + $0x148] sm:$0xff]  ;;  %v4966_v11 = vld [vmem:[%s5746_s4 + $0x100] sm:$0xff] }
 0x401   :  { %v4975_v54 = vld [vmem:[%s5746_s4 + $0xe8] sm:$0xff] }
 0x402   :  { %3598 = vpow2.f32 %v2811_v10  ;;  %v2812_v15 = vmul.f32 -1.442695, %v1098_v14  ;;  %v4948_v10 = vld [vmem:[%s5746_s4 + $0x130] sm:$0xff] }
 0x403   :  { %v4984_v14 = vld [vmem:[%s5746_s4 + $0xd0] sm:$0xff] }
 0x404   :  { %3600 = vpow2.f32 %v2812_v15  ;;  %v4993_v15 = vld [vmem:[%s5746_s4 + $0xb8] sm:$0xff] }
 0x40f   :  { %v3599_v16 = vpop.eup %3598 }
 0x410   :  { %v1095_v17 = vadd.f32 1.0, %v3599_v16  ;;  %v5002_v16 = vld [vmem:[%s5746_s4 + $0xa0] sm:$0xff] }
 0x411   :  { %v3601_v19 = vpop.eup %3600 }
 0x412   :  { %3602 = vrcp.f32 %v1095_v17  ;;  %v1102_v18 = vadd.f32 1.0, %v3601_v19  ;;  %v5011_v17 = vld [vmem:[%s5746_s4 + $0x88] sm:$0xff]  ;;  %v5020_v19 = vld [vmem:[%s5746_s4 + $0x70] sm:$0xff] }
 0x41f   :  { %v3603_v21 = vpop.eup %3602 }
 0x420   :  { %v1105_v22 = vmul.f32 %v3603_v21, %v1088_v20  ;;  %v5029_v20 = vld [vmem:[%s5746_s4 + $0x58] sm:$0xff]  ;;  %v5038_v21 = vld [vmem:[%s5746_s4 + $0x40] sm:$0xff] }
 0x422   :  { %v1106_v50 = vadd.f32 %v1105_v22, %v5888_v29  ;;  %v5044_v22 = vld [vmem:[%s5746_s4 + $0x20] sm:$0xff]  ;;  %v5051_v29 = vld [vmem:[%s5746_s4 + $0x18] sm:$0xff] }
 0x423   :  { %5891 = vst [vmem:[#allocation11_spill] sm:$0xff] %v5051_v29 }
 0x424   :  { %3604 = vtanh.f32 %v1106_v50  ;;  %v5057_v50 = vld [vmem:[%s5746_s4 + $0x28] sm:$0xff] }
 0x425   :  { %3606 = vrcp.f32 %v1102_v18  ;;  %5892 = vst [vmem:[#allocation7_spill] sm:$0xff] %v5057_v50  ;;  %v5063_v18 = vld [vmem:[%s5746_s4 + $0x8] sm:$0xff] }
 0x426   :  { %5893 = vst [vmem:[#allocation9_spill] sm:$0xff] %v5063_v18 }
 0x431   :  { %v3605_v13 = vpop.eup %3604 }
 0x432   :  { %v1108_v42 = vsub.f32 %v4691_v56, %v3605_v13  ;;  %v3607_v27 = vpop.eup %3606 }
 0x434   :  { %v1109_v45 = vmul.f32 %v3607_v27, %v1108_v42  ;;  %v5077_v42 = vld [vmem:[%s5746_s4 + $0x10] sm:$0xff] }
 0x435   :  { %5895 = vst [vmem:[#allocation18_spill] sm:$0xff] %v5077_v42 }
 0x436   :  { %v4906_v48 = vadd.f32 %v3605_v13, %v1109_v45  ;;  %v5070_v13 = vld [vmem:[%s5746_s4] sm:$0xff] }
 0x437   :  { %5894 = vst [vmem:[#allocation12_spill] sm:$0xff] %v5070_v13 }
 0x438   :  { %5890 = vst [vmem:[#allocation6_spill] sm:$0xff] %v4906_v48  ;;  %v4913_v46 = vsel %vm1116_vm12, %v4906_v48, %v4691_v56  ;;  %v4930_v56 = vld [vmem:[%s5746_s4 + $0x160] sm:$0xff]  ;;  %v5896_v48 = vld [vmem:[#allocation22_spill] sm:$0xff] }
 0x439   :  { %1190 = vmatmul.mubr.f32.vlgmr.msra.gmra.mxu0 %v4913_v46  ;;  %3306 = vmatmul.mubr.f32.vlgmr.msra.gmra.mxu1 %v4913_v46 }
 0x43a   :  { %1301 = vmatpush1.msra.mxu0 %v4698_v39  ;;  %3309 = vmatpush3.msra.mxu1 %v4921_v49 }
 0x43b   :  { %1302 = vmatprep.subr.mxu0 %v4705_v7  ;;  %3310 = vmatprep.subr.mxu1 %v5856_v28 }
 0x43c   :  { %1303 = vmatpush1.msra.mxu0 %v4712_v24  ;;  %3311 = vmatpush3.msra.mxu1 %v4930_v56 }
 0x43d   :  { %1304 = vmatprep.subr.mxu0 %v4719_v23  ;;  %3312 = vmatprep.subr.mxu1 %v5856_v28 }
 0x43e   :  { %1305 = vmatpush1.msra.mxu0 %v4726_v25  ;;  %3313 = vmatpush3.msra.mxu1 %v4939_v52 }
 0x43f   :  { %1306 = vmatprep.subr.mxu0 %v4733_v30  ;;  %3314 = vmatprep.subr.mxu1 %v5856_v28 }
 0x440   :  { %1307 = vmatpush1.msra.mxu0 %v4740_v4  ;;  %3315 = vmatpush3.msra.mxu1 %v4948_v10 }
 0x441   :  { %1308 = vmatprep.subr.mxu0 %v4747_v31  ;;  %3316 = vmatprep.subr.mxu1 %v5856_v28 }
 0x442   :  { %1309 = vmatpush1.msra.mxu0 %v4754_v3  ;;  %3317 = vmatpush3.msra.mxu1 %v4957_v53 }
 0x443   :  { %1310 = vmatprep.subr.mxu0 %v4761_v32  ;;  %3318 = vmatprep.subr.mxu1 %v5856_v28 }
 0x444   :  { %1311 = vmatpush1.msra.mxu0 %v4768_v58  ;;  %3319 = vmatpush3.msra.mxu1 %v4966_v11 }
 0x445   :  { %1312 = vmatprep.subr.mxu0 %v4775_v34  ;;  %3320 = vmatprep.subr.mxu1 %v5856_v28 }
 0x446   :  { %1313 = vmatpush1.msra.mxu0 %v4782_v59  ;;  %3321 = vmatpush3.msra.mxu1 %v4975_v54 }
 0x447   :  { %1314 = vmatprep.subr.mxu0 %v4789_v35  ;;  %3322 = vmatprep.subr.mxu1 %v5856_v28 }
 0x448   :  { %1315 = vmatpush1.msra.mxu0 %v4796_v61  ;;  %3323 = vmatpush3.msra.mxu1 %v4984_v14 }
 0x449   :  { %1316 = vmatprep.subr.mxu0 %v4803_v37  ;;  %3324 = vmatprep.subr.mxu1 %v5856_v28 }
 0x44a   :  { %1317 = vmatpush1.msra.mxu0 %v4810_v0  ;;  %3325 = vmatpush3.msra.mxu1 %v4993_v15 }
 0x44b   :  { %1318 = vmatprep.subr.mxu0 %v4817_v38  ;;  %3326 = vmatprep.subr.mxu1 %v5856_v28 }
 0x44c   :  { %1319 = vmatpush1.msra.mxu0 %v4824_v1  ;;  %3327 = vmatpush3.msra.mxu1 %v5002_v16 }
 0x44d   :  { %1320 = vmatprep.subr.mxu0 %v4831_v40  ;;  %3328 = vmatprep.subr.mxu1 %v5856_v28 }
 0x44e   :  { %1321 = vmatpush1.msra.mxu0 %v4838_v2  ;;  %3329 = vmatpush3.msra.mxu1 %v5011_v17 }
 0x44f   :  { %1322 = vmatprep.subr.mxu0 %v4845_v41  ;;  %3330 = vmatprep.subr.mxu1 %v5856_v28 }
 0x450   :  { %1323 = vmatpush1.msra.mxu0 %v4852_v5  ;;  %3331 = vmatpush3.msra.mxu1 %v5020_v19 }
 0x451   :  { %1324 = vmatprep.subr.mxu0 %v4859_v43  ;;  %3332 = vmatprep.subr.mxu1 %v5856_v28 }
 0x452   :  { %1325 = vmatpush1.msra.mxu0 %v4866_v8  ;;  %3333 = vmatpush3.msra.mxu1 %v5029_v20 }
 0x453   :  { %1326 = vmatprep.subr.mxu0 %v4873_v44  ;;  %3334 = vmatprep.subr.mxu1 %v5856_v28 }
 0x454   :  { %1327 = vmatpush1.msra.mxu0 %v4880_v9  ;;  %3335 = vmatpush3.msra.mxu1 %v5038_v21 }
 0x455   :  { %1328 = vmatprep.subr.mxu0 %v5044_v22  ;;  %3336 = vmatprep.subr.mxu1 %v5856_v28 }
 0x456   :  { %1329 = vmatpush1.msra.mxu0 %v5051_v29  ;;  %3337 = vmatpush3.msra.mxu1 %v5057_v50 }
 0x457   :  { %1330 = vmatprep.subr.mxu0 %v5063_v18  ;;  %3338 = vmatprep.subr.mxu1 %v5856_v28 }
 0x458   :  { %1331 = vmatpush1.msra.mxu0 %v5070_v13  ;;  %1364 = vmatprep.mubr.f32.mxu0 %v5856_v28 }
 0x459   :  { %3339 = vmatpush3.msra.mxu1 %v5077_v42  ;;  %3340 = vmatprep.mubr.msk.f32.mxu1 %vm3762_vm4, %v5856_v28 }
 0x45a   :  { %1475 = vmatprep.subr.mxu0 %v4671_v55  ;;  %3343 = vmatprep.subr.mxu1 %v5856_v28 }
 0x4f9   :  { %v1191_v27 = vpop.f32.mrf.mxu0  ;;  %v1262_v45 = vpop.f32.mrf.mxu1 }
 0x4fa   :  { %v1192_v63 = vadd.f32 %v1191_v27, %v5880_v60  ;;  %v1263_v50 = vadd.f32 %v1262_v45, %v4489_v36  ;;  %v5907_v45 = vld [vmem:[#allocation31_spill] sm:$0xff] }
 0x4fb   :  { %v3307_v47 = vpop.f32.mrf.mxu1  ;;  %v1193_v6 = vpop.f32.mrf.mxu0 }
 0x4fc   :  { %v1266_v33 = vadd.f32 %v1192_v63, %v5896_v48  ;;  %v1194_v26 = vadd.f32 %v1193_v6, %v4477_v57  ;;  %v5898_v47 = vld [vmem:[#allocation36_spill] sm:$0xff] }
 0x4fe   :  { %v2813_v62 = vmul.f32 -1.442695, %v1266_v33  ;;  %v1273_v51 = vadd.f32 %v1194_v26, %v5897_v12 }
 0x500   :  { %3608 = vpow2.f32 %v2813_v62  ;;  %v2814_v42 = vmul.f32 -1.442695, %v1273_v51  ;;  %v5091_v51 = vpop.permute.xlu0 %1289 }
 0x501   :  { %5899 = vst [vmem:[#allocation19_spill] sm:$0xff] %v5091_v51  ;;  %vm1291_vm13 = vcmp.eq.s32.totalorder %v5091_v51, 1  ;;  %v5909_v51 = vld [vmem:[#allocation26_spill] sm:$0xff] }
 0x502   :  { %3610 = vpow2.f32 %v2814_v42 }
 0x50d   :  { %v3609_v13 = vpop.eup %3608 }
 0x50e   :  { %v1270_v18 = vadd.f32 1.0, %v3609_v13 }
 0x50f   :  { %v3611_v55 = vpop.eup %3610 }
 0x510   :  { %3612 = vrcp.f32 %v1270_v18  ;;  %v1277_v63 = vadd.f32 1.0, %v3611_v55  ;;  %v5901_v55 = vld [vmem:[#allocation11_spill] sm:$0xff]  ;;  %v5906_v18 = vld [vmem:[#allocation16_spill] sm:$0xff] }
 0x51d   :  { %v3613_v29 = vpop.eup %3612 }
 0x51e   :  { %v1280_v27 = vmul.f32 %v3613_v29, %v1263_v50  ;;  %v5904_v29 = vld [vmem:[#allocation12_spill] sm:$0xff]  ;;  %v5905_v50 = vld [vmem:[#allocation18_spill] sm:$0xff] }
 0x520   :  { %v1281_v60 = vadd.f32 %v1280_v27, %v5898_v47 }
 0x522   :  { %3614 = vtanh.f32 %v1281_v60  ;;  %v5902_v60 = vld [vmem:[#allocation7_spill] sm:$0xff] }
 0x523   :  { %3616 = vrcp.f32 %v1277_v63  ;;  %v5908_v63 = vld [vmem:[#allocation25_spill] sm:$0xff] }
 0x52f   :  { %v3615_v33 = vpop.eup %3614 }
 0x530   :  { %v1283_v6 = vsub.f32 %v4913_v46, %v3615_v33  ;;  %v3617_v62 = vpop.eup %3616 }
 0x532   :  { %v1284_v12 = vmul.f32 %v3617_v62, %v1283_v6 }
 0x534   :  { %v5093_v26 = vadd.f32 %v3615_v33, %v1284_v12 }
 0x536   :  { %5900 = vst [vmem:[#allocation34_spill] sm:$0xff] %v5093_v26  ;;  %v5100_v48 = vsel %vm1291_vm13, %v5093_v26, %v4913_v46  ;;  %v5903_v46 = vld [vmem:[#allocation9_spill] sm:$0xff] }
 0x537   :  { %1365 = vmatmul.mubr.f32.vlgmr.msra.gmra.mxu0 %v5100_v48  ;;  %3341 = vmatmul.mubr.f32.vlgmr.msra.gmra.mxu1 %v5100_v48 }
 0x538   :  { %1476 = vmatpush1.msra.mxu0 %v4698_v39  ;;  %3344 = vmatpush3.msra.mxu1 %v4921_v49 }
 0x539   :  { %1477 = vmatprep.subr.mxu0 %v4705_v7  ;;  %3345 = vmatprep.subr.mxu1 %v5856_v28 }
 0x53a   :  { %1478 = vmatpush1.msra.mxu0 %v4712_v24  ;;  %3346 = vmatpush3.msra.mxu1 %v4930_v56 }
 0x53b   :  { %1479 = vmatprep.subr.mxu0 %v4719_v23  ;;  %3347 = vmatprep.subr.mxu1 %v5856_v28 }
 0x53c   :  { %1480 = vmatpush1.msra.mxu0 %v4726_v25  ;;  %3348 = vmatpush3.msra.mxu1 %v4939_v52 }
 0x53d   :  { %1481 = vmatprep.subr.mxu0 %v4733_v30  ;;  %3349 = vmatprep.subr.mxu1 %v5856_v28 }
 0x53e   :  { %1482 = vmatpush1.msra.mxu0 %v4740_v4  ;;  %3350 = vmatpush3.msra.mxu1 %v4948_v10 }
 0x53f   :  { %1483 = vmatprep.subr.mxu0 %v4747_v31  ;;  %3351 = vmatprep.subr.mxu1 %v5856_v28 }
 0x540   :  { %1484 = vmatpush1.msra.mxu0 %v4754_v3  ;;  %3352 = vmatpush3.msra.mxu1 %v4957_v53 }
 0x541   :  { %1485 = vmatprep.subr.mxu0 %v4761_v32  ;;  %3353 = vmatprep.subr.mxu1 %v5856_v28 }
 0x542   :  { %1486 = vmatpush1.msra.mxu0 %v4768_v58  ;;  %3354 = vmatpush3.msra.mxu1 %v4966_v11 }
 0x543   :  { %1487 = vmatprep.subr.mxu0 %v4775_v34  ;;  %3355 = vmatprep.subr.mxu1 %v5856_v28 }
 0x544   :  { %1488 = vmatpush1.msra.mxu0 %v4782_v59  ;;  %3356 = vmatpush3.msra.mxu1 %v4975_v54 }
 0x545   :  { %1489 = vmatprep.subr.mxu0 %v4789_v35  ;;  %3357 = vmatprep.subr.mxu1 %v5856_v28 }
 0x546   :  { %1490 = vmatpush1.msra.mxu0 %v4796_v61  ;;  %3358 = vmatpush3.msra.mxu1 %v4984_v14 }
 0x547   :  { %1491 = vmatprep.subr.mxu0 %v4803_v37  ;;  %3359 = vmatprep.subr.mxu1 %v5856_v28 }
 0x548   :  { %1492 = vmatpush1.msra.mxu0 %v4810_v0  ;;  %3360 = vmatpush3.msra.mxu1 %v4993_v15 }
 0x549   :  { %1493 = vmatprep.subr.mxu0 %v4817_v38  ;;  %3361 = vmatprep.subr.mxu1 %v5856_v28 }
 0x54a   :  { %1494 = vmatpush1.msra.mxu0 %v4824_v1  ;;  %3362 = vmatpush3.msra.mxu1 %v5002_v16 }
 0x54b   :  { %1495 = vmatprep.subr.mxu0 %v4831_v40  ;;  %3363 = vmatprep.subr.mxu1 %v5856_v28 }
 0x54c   :  { %1496 = vmatpush1.msra.mxu0 %v4838_v2  ;;  %3364 = vmatpush3.msra.mxu1 %v5011_v17 }
 0x54d   :  { %1497 = vmatprep.subr.mxu0 %v4845_v41  ;;  %3365 = vmatprep.subr.mxu1 %v5856_v28 }
 0x54e   :  { %1498 = vmatpush1.msra.mxu0 %v4852_v5  ;;  %3366 = vmatpush3.msra.mxu1 %v5020_v19 }
 0x54f   :  { %1499 = vmatprep.subr.mxu0 %v4859_v43  ;;  %3367 = vmatprep.subr.mxu1 %v5856_v28 }
 0x550   :  { %1500 = vmatpush1.msra.mxu0 %v4866_v8  ;;  %3368 = vmatpush3.msra.mxu1 %v5029_v20 }
 0x551   :  { %1501 = vmatprep.subr.mxu0 %v4873_v44  ;;  %3369 = vmatprep.subr.mxu1 %v5856_v28 }
 0x552   :  { %1502 = vmatpush1.msra.mxu0 %v4880_v9  ;;  %3370 = vmatpush3.msra.mxu1 %v5038_v21 }
 0x553   :  { %1503 = vmatprep.subr.mxu0 %v5044_v22  ;;  %3371 = vmatprep.subr.mxu1 %v5856_v28 }
 0x554   :  { %1504 = vmatpush1.msra.mxu0 %v5901_v55  ;;  %3372 = vmatpush3.msra.mxu1 %v5902_v60 }
 0x555   :  { %1505 = vmatprep.subr.mxu0 %v5903_v46  ;;  %3373 = vmatprep.subr.mxu1 %v5856_v28 }
 0x556   :  { %1506 = vmatpush1.msra.mxu0 %v5904_v29  ;;  %1539 = vmatprep.mubr.f32.mxu0 %v5856_v28 }
 0x557   :  { %3374 = vmatpush3.msra.mxu1 %v5905_v50  ;;  %3375 = vmatprep.mubr.msk.f32.mxu1 %vm3762_vm4, %v5856_v28 }
 0x558   :  { %3378 = vmatprep.subr.mxu1 %v5856_v28  ;;  %1650 = vmatprep.subr.mxu0 %v5906_v18 }
 0x5f7   :  { %v1366_v13 = vpop.f32.mrf.mxu0  ;;  %v1437_v42 = vpop.f32.mrf.mxu1 }
 0x5f8   :  { %v1367_v27 = vadd.f32 %v1366_v13, %v5907_v45  ;;  %v1438_v55 = vadd.f32 %v1437_v42, %v4489_v36  ;;  %v1913_v42 = vld [vmem:[%s5750_s7 + $0x30] sm:$0xff] }
 0x5f9   :  { %v3342_v47 = vpop.f32.mrf.mxu1  ;;  %v1368_v62 = vpop.f32.mrf.mxu0 }
 0x5fa   :  { %v1441_v33 = vadd.f32 %v1367_v27, %v5908_v63  ;;  %v1369_v12 = vadd.f32 %v1368_v62, %v4477_v57  ;;  %v5910_v47 = vld [vmem:[#allocation35_spill] sm:$0xff]  ;;  %v1911_v62 = vld [vmem:[%s5750_s7 + $0x20] sm:$0xff] }
 0x5fc   :  { %v2815_v6 = vmul.f32 -1.442695, %v1441_v33  ;;  %v1448_v26 = vadd.f32 %v1369_v12, %v5909_v51  ;;  %v1910_v12 = vld [vmem:[%s5750_s7 + $0x18] sm:$0xff] }
 0x5fe   :  { %3618 = vpow2.f32 %v2815_v6  ;;  %v2816_v29 = vmul.f32 -1.442695, %v1448_v26  ;;  %v5178_v26 = vpop.permute.xlu1 %1464 }
 0x5ff   :  { %vm1466_vm14 = vcmp.eq.s32.totalorder %v5178_v26, 1 }
 0x600   :  { %3620 = vpow2.f32 %v2816_v29  ;;  %v1914_v29 = vld [vmem:[%s5750_s7 + $0x38] sm:$0xff] }
 0x60b   :  { %v3619_v50 = vpop.eup %3618 }
 0x60c   :  { %v1445_v46 = vadd.f32 1.0, %v3619_v50 }
 0x60d   :  { %v3621_v18 = vpop.eup %3620 }
 0x60e   :  { %3622 = vrcp.f32 %v1445_v46  ;;  %v1452_v27 = vadd.f32 1.0, %v3621_v18  ;;  %v1915_v46 = vld [vmem:[%s5750_s7 + $0x40] sm:$0xff]  ;;  %v1909_v18 = vld [vmem:[%s5750_s7 + $0x10] sm:$0xff] }
 0x61b   :  { %v3623_v60 = vpop.eup %3622 }
 0x61c   :  { %v1455_v13 = vmul.f32 %v3623_v60, %v1438_v55  ;;  %v1916_v60 = vld [vmem:[%s5750_s7 + $0x48] sm:$0xff] }
 0x61e   :  { %v1456_v45 = vadd.f32 %v1455_v13, %v5910_v47  ;;  %v1908_v13 = vld [vmem:[%s5750_s7 + $0x8] sm:$0xff]  ;;  %v1907_v47 = vld [vmem:[%s5750_s7] sm:$0xff] }
 0x620   :  { %3624 = vtanh.f32 %v1456_v45  ;;  %v1912_v45 = vld [vmem:[%s5750_s7 + $0x28] sm:$0xff] }
 0x621   :  { %3626 = vrcp.f32 %v1452_v27  ;;  %v5922_v27 = vld [vmem:[#allocation8_spill] sm:$0xff] }
 0x62d   :  { %v3625_v63 = vpop.eup %3624 }
 0x62e   :  { %v1458_v33 = vsub.f32 %v5100_v48, %v3625_v63  ;;  %v3627_v6 = vpop.eup %3626 }
 0x630   :  { %v1459_v51 = vmul.f32 %v3627_v6, %v1458_v33  ;;  %v5924_v33 = vld [vmem:[#allocation29_spill] sm:$0xff] }
 0x632   :  { %v5180_v50 = vadd.f32 %v3625_v63, %v1459_v51  ;;  %v5926_v51 = vld [vmem:[#allocation6_spill] sm:$0xff] }
 0x634   :  { %v5187_v55 = vsel %vm1466_vm14, %v5180_v50, %v5100_v48  ;;  %v1917_v48 = vld [vmem:[%s5750_s7 + $0x50] sm:$0xff] }
 0x635   :  { %1540 = vmatmul.mubr.f32.vlgmr.msra.gmra.mxu0 %v5187_v55  ;;  %3376 = vmatmul.mubr.f32.vlgmr.msra.gmra.mxu1 %v5187_v55 }
 0x636   :  { %3379 = vmatpush3.msra.mxu1 %v4921_v49  ;;  %1651 = vmatpush1.msra.mxu0 %v4698_v39  ;;  %v5911_v39 = vld [vmem:[#allocation7_spill] sm:$0xff] }
 0x637   :  { %3380 = vmatprep.subr.mxu1 %v5856_v28  ;;  %1652 = vmatprep.subr.mxu0 %v4705_v7  ;;  %v5912_v7 = vld [vmem:[#allocation11_spill] sm:$0xff] }
 0x638   :  { %3381 = vmatpush3.msra.mxu1 %v4930_v56  ;;  %1653 = vmatpush1.msra.mxu0 %v4712_v24  ;;  %v5913_v24 = vld [vmem:[#allocation9_spill] sm:$0xff] }
 0x639   :  { %3382 = vmatprep.subr.mxu1 %v5856_v28  ;;  %1654 = vmatprep.subr.mxu0 %v4719_v23  ;;  %v5914_v23 = vld [vmem:[#allocation18_spill] sm:$0xff] }
 0x63a   :  { %3383 = vmatpush3.msra.mxu1 %v4939_v52  ;;  %1655 = vmatpush1.msra.mxu0 %v4726_v25  ;;  %v5915_v25 = vld [vmem:[#allocation12_spill] sm:$0xff] }
 0x63b   :  { %3384 = vmatprep.subr.mxu1 %v5856_v28  ;;  %1656 = vmatprep.subr.mxu0 %v4733_v30  ;;  %v1922_v30 = vld [vmem:[%s5750_s7 + $0x78] sm:$0xff] }
 0x63c   :  { %3385 = vmatpush3.msra.mxu1 %v4948_v10  ;;  %1657 = vmatpush1.msra.mxu0 %v4740_v4 }
 0x63d   :  { %3386 = vmatprep.subr.mxu1 %v5856_v28  ;;  %1658 = vmatprep.subr.mxu0 %v4747_v31 }
 0x63e   :  { %3387 = vmatpush3.msra.mxu1 %v4957_v53  ;;  %1659 = vmatpush1.msra.mxu0 %v4754_v3  ;;  %v5916_v3 = vld [vmem:[#allocation31_spill] sm:$0xff]  ;;  %v5267_v53 = vpop.permute.xlu0 %1639 }
 0x63f   :  { %3388 = vmatprep.subr.mxu1 %v5856_v28  ;;  %1660 = vmatprep.subr.mxu0 %v4761_v32  ;;  %vm1641_vm15 = vcmp.eq.s32.totalorder %v5267_v53, 1 }
 0x640   :  { %3389 = vmatpush3.msra.mxu1 %v4966_v11  ;;  %1661 = vmatpush1.msra.mxu0 %v4768_v58 }
 0x641   :  { %3390 = vmatprep.subr.mxu1 %v5856_v28  ;;  %1662 = vmatprep.subr.mxu0 %v4775_v34  ;;  %v5917_v34 = vld [vmem:[#allocation27_spill] sm:$0xff] }
 0x642   :  { %3391 = vmatpush3.msra.mxu1 %v4975_v54  ;;  %1663 = vmatpush1.msra.mxu0 %v4782_v59 }
 0x643   :  { %3392 = vmatprep.subr.mxu1 %v5856_v28  ;;  %1664 = vmatprep.subr.mxu0 %v4789_v35 }
 0x644   :  { %3393 = vmatpush3.msra.mxu1 %v4984_v14  ;;  %1665 = vmatpush1.msra.mxu0 %v4796_v61 }
 0x645   :  { %3394 = vmatprep.subr.mxu1 %v5856_v28  ;;  %1666 = vmatprep.subr.mxu0 %v4803_v37 }
 0x646   :  { %3395 = vmatpush3.msra.mxu1 %v4993_v15  ;;  %1667 = vmatpush1.msra.mxu0 %v4810_v0  ;;  %v5918_v0 = vld [vmem:[#allocation28_spill] sm:$0xff]  ;;  %v1921_v15 = vld [vmem:[%s5750_s7 + $0x70] sm:$0xff] }
 0x647   :  { %3396 = vmatprep.subr.mxu1 %v5856_v28  ;;  %1668 = vmatprep.subr.mxu0 %v4817_v38 }
 0x648   :  { %3397 = vmatpush3.msra.mxu1 %v5002_v16  ;;  %1669 = vmatpush1.msra.mxu0 %v4824_v1 }
 0x649   :  { %3398 = vmatprep.subr.mxu1 %v5856_v28  ;;  %1670 = vmatprep.subr.mxu0 %v4831_v40 }
 0x64a   :  { %3399 = vmatpush3.msra.mxu1 %v5011_v17  ;;  %1671 = vmatpush1.msra.mxu0 %v4838_v2  ;;  %v5920_v17 = vld [vmem:[#allocation40_spill] sm:$0xff] }
 0x64b   :  { %3400 = vmatprep.subr.mxu1 %v5856_v28  ;;  %1672 = vmatprep.subr.mxu0 %v4845_v41 }
 0x64c   :  { %3401 = vmatpush3.msra.mxu1 %v5020_v19  ;;  %1673 = vmatpush1.msra.mxu0 %v4852_v5  ;;  %v5932_v19 = vld [vmem:[#allocation37_spill] sm:$0xff] }
 0x64d   :  { %3402 = vmatprep.subr.mxu1 %v5856_v28  ;;  %1674 = vmatprep.subr.mxu0 %v4859_v43 }
 0x64e   :  { %3403 = vmatpush3.msra.mxu1 %v5029_v20  ;;  %1675 = vmatpush1.msra.mxu0 %v4866_v8  ;;  %v1920_v20 = vld [vmem:[%s5750_s7 + $0x68] sm:$0xff] }
 0x64f   :  { %3404 = vmatprep.subr.mxu1 %v5856_v28  ;;  %1676 = vmatprep.subr.mxu0 %v4873_v44  ;;  %v5919_v44 = vld [vmem:[#allocation38_spill] sm:$0xff] }
 0x650   :  { %3405 = vmatpush3.msra.mxu1 %v5038_v21  ;;  %1677 = vmatpush1.msra.mxu0 %v4880_v9  ;;  %v1919_v21 = vld [vmem:[%s5750_s7 + $0x60] sm:$0xff] }
 0x651   :  { %3406 = vmatprep.subr.mxu1 %v5856_v28  ;;  %1678 = vmatprep.subr.mxu0 %v5044_v22  ;;  %v1918_v22 = vld [vmem:[%s5750_s7 + $0x58] sm:$0xff] }
 0x652   :  { %3407 = vmatpush3.msra.mxu1 %v5911_v39  ;;  %1679 = vmatpush1.msra.mxu0 %v5912_v7  ;;  %v5928_v39 = vld [vmem:[#allocation34_spill] sm:$0xff] }
 0x653   :  { %3408 = vmatprep.subr.mxu1 %v5856_v28  ;;  %1680 = vmatprep.subr.mxu0 %v5913_v24  ;;  %v1836_v24 = vld [vmem:[%s5751_s8 + $0x78] sm:$0xff] }
 0x654   :  { %3409 = vmatpush3.msra.mxu1 %v5914_v23  ;;  %1681 = vmatpush1.msra.mxu0 %v5915_v25  ;;  %v1835_v23 = vld [vmem:[%s5751_s8 + $0x70] sm:$0xff]  ;;  %v1834_v25 = vld [vmem:[%s5751_s8 + $0x68] sm:$0xff] }
 0x655   :  { %1714 = vmatprep.mubr.f32.mxu0 %v5856_v28  ;;  %3410 = vmatprep.mubr.msk.f32.mxu1 %vm3762_vm4, %v5856_v28 }
 0x656   :  { %3413 = vmatprep.subr.mxu0 %v5856_v28  ;;  %3448 = vmatprep.subr.mxu1 %v1922_v30 }
 0x6f5   :  { %v1541_v4 = vpop.f32.mrf.mxu0  ;;  %v1612_v31 = vpop.f32.mrf.mxu1 }
 0x6f6   :  { %v1542_v32 = vadd.f32 %v1541_v4, %v5916_v3  ;;  %v1613_v5 = vadd.f32 %v1612_v31, %v4489_v36  ;;  %v1832_v4 = vld [vmem:[%s5751_s8 + $0x58] sm:$0xff]  ;;  %v1831_v31 = vld [vmem:[%s5751_s8 + $0x50] sm:$0xff] }
 0x6f7   :  { %v3377_v58 = vpop.f32.mrf.mxu1  ;;  %v1543_v61 = vpop.f32.mrf.mxu0 }
 0x6f8   :  { %v1616_v59 = vadd.f32 %v1542_v32, %v5917_v34  ;;  %v1544_v37 = vadd.f32 %v1543_v61, %v4477_v57  ;;  %v1830_v32 = vld [vmem:[%s5751_s8 + $0x48] sm:$0xff]  ;;  %v1829_v58 = vld [vmem:[%s5751_s8 + $0x40] sm:$0xff]  ;;  %v1828_v34 = vld [vmem:[%s5751_s8 + $0x38] sm:$0xff] }
 0x6f9   :  { %v1825_v61 = vld [vmem:[%s5751_s8 + $0x20] sm:$0xff] }
 0x6fa   :  { %v2817_v35 = vmul.f32 -1.442695, %v1616_v59  ;;  %v1623_v38 = vadd.f32 %v1544_v37, %v5918_v0  ;;  %v1827_v59 = vld [vmem:[%s5751_s8 + $0x30] sm:$0xff]  ;;  %v1824_v37 = vld [vmem:[%s5751_s8 + $0x18] sm:$0xff] }
 0x6fb   :  { %v1823_v0 = vld [vmem:[%s5751_s8 + $0x10] sm:$0xff] }
 0x6fc   :  { %3628 = vpow2.f32 %v2817_v35  ;;  %v2818_v1 = vmul.f32 -1.442695, %v1623_v38  ;;  %v1826_v35 = vld [vmem:[%s5751_s8 + $0x28] sm:$0xff] }
 0x6fd   :  { %v1822_v38 = vld [vmem:[%s5751_s8 + $0x8] sm:$0xff] }
 0x6fe   :  { %3630 = vpow2.f32 %v2818_v1  ;;  %v1821_v1 = vld [vmem:[%s5751_s8] sm:$0xff] }
 0x709   :  { %v3629_v40 = vpop.eup %3628 }
 0x70a   :  { %v1620_v2 = vadd.f32 1.0, %v3629_v40 }
 0x70b   :  { %v3631_v41 = vpop.eup %3630 }
 0x70c   :  { %3632 = vrcp.f32 %v1620_v2  ;;  %v1627_v49 = vadd.f32 1.0, %v3631_v41 }
 0x719   :  { %v3633_v43 = vpop.eup %3632 }
 0x71a   :  { %v1630_v8 = vmul.f32 %v3633_v43, %v1613_v5  ;;  %v5930_v43 = vld [vmem:[#allocation30_spill] sm:$0xff] }
 0x71c   :  { %v1631_v9 = vadd.f32 %v1630_v8, %v5919_v44 }
 0x71e   :  { %3634 = vtanh.f32 %v1631_v9 }
 0x71f   :  { %3636 = vrcp.f32 %v1627_v49 }
 0x72b   :  { %v3635_v56 = vpop.eup %3634 }
 0x72c   :  { %v1633_v52 = vsub.f32 %v5187_v55, %v3635_v56  ;;  %v3637_v10 = vpop.eup %3636 }
 0x72e   :  { %v1634_v11 = vmul.f32 %v3637_v10, %v1633_v52 }
 0x730   :  { %v1635_v54 = vadd.f32 %v3635_v56, %v1634_v11  ;;  %v5931_v56 = vld [vmem:[#allocation32_spill] sm:$0xff] }
 0x732   :  { %v5273_v14 = vsel %vm1641_vm15, %v1635_v54, %v5187_v55  ;;  %v5280_v16 = vsel %vm1641_vm15, %v1635_v54, 0.0 }
 0x733   :  { %1715 = vmatmul.mubr.f32.vlgmr.msra.gmra.mxu0 %v5273_v14  ;;  %3411 = vmatmul.mubr.f32.vlgmr.msra.gmra.mxu1 %v5273_v14 }
 0x734   :  { %3449 = vmatpush3.msra.mxu1 %v1922_v30  ;;  %3480 = vmatprep.mubr.msk.f32.mxu1 %vm593_vm5, %v5920_v17  ;;  %v1833_v30 = vld [vmem:[%s5751_s8 + $0x60] sm:$0xff] }
 0x735   :  { %3450 = vmatprep.subr.mxu1 %v1921_v15  ;;  %3445 = vmatprep.mubr.msk.f32.mxu0 %vm3762_vm4, %v5856_v28 }
 0x736   :  { %3451 = vmatpush3.msra.mxu1 %v1921_v15  ;;  %3414 = vmatpush3.msra.mxu0 %v1836_v24  ;;  %v2838_v24 = vld [vmem:[%s5752_s10 + $0xc0] sm:$0xff] }
 0x737   :  { %3452 = vmatprep.subr.mxu1 %v1920_v20  ;;  %3415 = vmatprep.subr.mxu0 %v5856_v28 }
 0x738   :  { %3453 = vmatpush3.msra.mxu1 %v1920_v20  ;;  %3416 = vmatpush3.msra.mxu0 %v1835_v23  ;;  %v2837_v23 = vld [vmem:[%s5752_s10 + $0xb8] sm:$0xff] }
 0x739   :  { %3454 = vmatprep.subr.mxu1 %v1919_v21  ;;  %3417 = vmatprep.subr.mxu0 %v5856_v28 }
 0x73a   :  { %3455 = vmatpush3.msra.mxu1 %v1919_v21  ;;  %3418 = vmatpush3.msra.mxu0 %v1834_v25  ;;  %v2836_v25 = vld [vmem:[%s5752_s10 + $0xb0] sm:$0xff] }
 0x73b   :  { %3456 = vmatprep.subr.mxu1 %v1918_v22  ;;  %3419 = vmatprep.subr.mxu0 %v5856_v28 }
 0x73c   :  { %3457 = vmatpush3.msra.mxu1 %v1918_v22  ;;  %3420 = vmatpush3.msra.mxu0 %v1833_v30  ;;  %v2835_v30 = vld [vmem:[%s5752_s10 + $0xa8] sm:$0xff] }
 0x73d   :  { %3458 = vmatprep.subr.mxu1 %v1917_v48  ;;  %3421 = vmatprep.subr.mxu0 %v5856_v28 }
 0x73e   :  { %3459 = vmatpush3.msra.mxu1 %v1917_v48  ;;  %3422 = vmatpush3.msra.mxu0 %v1832_v4  ;;  %v2834_v4 = vld [vmem:[%s5752_s10 + $0xa0] sm:$0xff] }
 0x73f   :  { %3460 = vmatprep.subr.mxu1 %v1916_v60  ;;  %3423 = vmatprep.subr.mxu0 %v5856_v28 }
 0x740   :  { %3461 = vmatpush3.msra.mxu1 %v1916_v60  ;;  %3424 = vmatpush3.msra.mxu0 %v1831_v31  ;;  %v1815_v60 = vpop.permute.xlu1 %1814  ;;  %v2833_v31 = vld [vmem:[%s5752_s10 + $0x98] sm:$0xff] }
 0x741   :  { %3462 = vmatprep.subr.mxu1 %v1915_v46  ;;  %3425 = vmatprep.subr.mxu0 %v5856_v28  ;;  %vm1816_vm0 = vcmp.eq.s32.totalorder %v1815_v60, 1 }
 0x742   :  { %3463 = vmatpush3.msra.mxu1 %v1915_v46  ;;  %3426 = vmatpush3.msra.mxu0 %v1830_v32  ;;  %v2832_v32 = vld [vmem:[%s5752_s10 + $0x90] sm:$0xff] }
 0x743   :  { %3464 = vmatprep.subr.mxu1 %v1914_v29  ;;  %3427 = vmatprep.subr.mxu0 %v5856_v28 }
 0x744   :  { %3465 = vmatpush3.msra.mxu1 %v1914_v29  ;;  %3428 = vmatpush3.msra.mxu0 %v1829_v58  ;;  %v2831_v58 = vld [vmem:[%s5752_s10 + $0x88] sm:$0xff] }
 0x745   :  { %3466 = vmatprep.subr.mxu1 %v1913_v42  ;;  %3429 = vmatprep.subr.mxu0 %v5856_v28 }
 0x746   :  { %3467 = vmatpush3.msra.mxu1 %v1913_v42  ;;  %3430 = vmatpush3.msra.mxu0 %v1828_v34  ;;  %v2845_v42 = vld [vmem:[%s5752_s10 + $0xf8] sm:$0xff]  ;;  %v2830_v34 = vld [vmem:[%s5752_s10 + $0x80] sm:$0xff] }
 0x747   :  { %3468 = vmatprep.subr.mxu1 %v1912_v45  ;;  %3431 = vmatprep.subr.mxu0 %v5856_v28 }
 0x748   :  { %3469 = vmatpush3.msra.mxu1 %v1912_v45  ;;  %3432 = vmatpush3.msra.mxu0 %v1827_v59  ;;  %v2179_v59 = vld [vmem:[%s5752_s10 + $0x78] sm:$0xff] }
 0x749   :  { %3470 = vmatprep.subr.mxu1 %v1911_v62  ;;  %3433 = vmatprep.subr.mxu0 %v5856_v28 }
 0x74a   :  { %3471 = vmatpush3.msra.mxu1 %v1911_v62  ;;  %3434 = vmatpush3.msra.mxu0 %v1826_v35  ;;  %v2844_v62 = vld [vmem:[%s5752_s10 + $0xf0] sm:$0xff] }
 0x74b   :  { %3472 = vmatprep.subr.mxu1 %v1910_v12  ;;  %3435 = vmatprep.subr.mxu0 %v5856_v28  ;;  %v2178_v35 = vld [vmem:[%s5752_s10 + $0x70] sm:$0xff] }
 0x74c   :  { %3473 = vmatpush3.msra.mxu1 %v1910_v12  ;;  %3436 = vmatpush3.msra.mxu0 %v1825_v61  ;;  %v2842_v12 = vld [vmem:[%s5752_s10 + $0xe0] sm:$0xff]  ;;  %v2177_v61 = vld [vmem:[%s5752_s10 + $0x68] sm:$0xff] }
 0x74d   :  { %3474 = vmatprep.subr.mxu1 %v1909_v18  ;;  %3437 = vmatprep.subr.mxu0 %v5856_v28 }
 0x74e   :  { %3475 = vmatpush3.msra.mxu1 %v1909_v18  ;;  %3438 = vmatpush3.msra.mxu0 %v1824_v37  ;;  %v2841_v18 = vld [vmem:[%s5752_s10 + $0xd8] sm:$0xff]  ;;  %v2176_v37 = vld [vmem:[%s5752_s10 + $0x60] sm:$0xff] }
 0x74f   :  { %3476 = vmatprep.subr.mxu1 %v1908_v13  ;;  %3439 = vmatprep.subr.mxu0 %v5856_v28 }
 0x750   :  { %3477 = vmatpush3.msra.mxu1 %v1908_v13  ;;  %3440 = vmatpush3.msra.mxu0 %v1823_v0  ;;  %v2840_v13 = vld [vmem:[%s5752_s10 + $0xd0] sm:$0xff]  ;;  %v2175_v0 = vld [vmem:[%s5752_s10 + $0x58] sm:$0xff] }
 0x751   :  { %3478 = vmatprep.subr.mxu1 %v1907_v47  ;;  %3441 = vmatprep.subr.mxu0 %v5856_v28 }
 0x752   :  { %3479 = vmatpush3.msra.mxu1 %v1907_v47  ;;  %3442 = vmatpush3.msra.mxu0 %v1822_v38  ;;  %v2839_v47 = vld [vmem:[%s5752_s10 + $0xc8] sm:$0xff]  ;;  %v2174_v38 = vld [vmem:[%s5752_s10 + $0x50] sm:$0xff] }
 0x753   :  { %3481 = vmatmul.mubr.msk.f32.vlgmr.msra.gmra.mxu1 %vm766_vm10, %v5922_v27  ;;  %3527 = vmatprep.subr.mxu1 %v5856_v28 }
 0x754   :  { %3483 = vmatprep.mubr.msk.f32.mxu1 %vm941_vm11, %v5924_v33  ;;  %3443 = vmatprep.subr.mxu0 %v5856_v28 }
 0x755   :  { %3444 = vmatpush3.msra.mxu0 %v1821_v1  ;;  %3528 = vmatpush3.msra.mxu1 %v2179_v59 }
 0x756   :  { %3492 = vmatprep.subr.mxu0 %v5856_v28  ;;  %3529 = vmatprep.subr.mxu1 %v5856_v28 }
 0x757   :  { %3484 = vmatmul.mubr.msk.f32.gmra.mxu1 %vm1116_vm12, %v5926_v51 }
 0x758   :  { %3486 = vmatprep.mubr.msk.f32.mxu1 %vm1291_vm13, %v5928_v39  ;;  %3530 = vmatpush3.msra.mxu1 %v2178_v35 }
 0x759   :  { %3531 = vmatprep.subr.mxu1 %v5856_v28 }
 0x75a   :  { %3532 = vmatpush3.msra.mxu1 %v2177_v61 }
 0x75b   :  { %3487 = vmatmul.mubr.msk.f32.gmra.mxu1 %vm1466_vm14, %v5180_v50  ;;  %3533 = vmatprep.subr.mxu1 %v5856_v28 }
 0x75c   :  { %3489 = vmatprep.mubr.msk.f32.mxu1 %vm1641_vm15, %v1635_v54  ;;  %3534 = vmatpush3.msra.mxu1 %v2176_v37  ;;  %vm2520_vm15 = vcmask 1046534  }
 0x75d   :  { %3535 = vmatprep.subr.mxu1 %v5856_v28 }
 0x75e   :  { %3536 = vmatpush3.msra.mxu1 %v2175_v0 }
 0x75f   :  { %3537 = vmatprep.subr.mxu1 %v5856_v28 }
 0x760   :  { %3538 = vmatpush3.msra.mxu1 %v2174_v38 }
 0x761   :  { %3539 = vmatprep.subr.mxu1 %v5856_v28 }
 0x7f3   :  { %v1716_v40 = vpop.f32.mrf.mxu0  ;;  %v1787_v2 = vpop.f32.mrf.mxu1 }
 0x7f4   :  { %v1717_v41 = vadd.f32 %v1716_v40, %v5916_v3  ;;  %v1788_v15 = vadd.f32 %v1787_v2, %v4489_v36 }
 0x7f5   :  { %v3412_v5 = vpop.f32.mrf.mxu1  ;;  %v1718_v9 = vpop.f32.mrf.mxu0 }
 0x7f6   :  { %v1791_v8 = vadd.f32 %v1717_v41, %v5930_v43  ;;  %v1719_v49 = vadd.f32 %v1718_v9, %v4477_v57  ;;  %v1933_v43 = vld [vmem:[%s5745_s0] sm:$0xff]  ;;  %v1936_v9 = vld [vmem:[%s5745_s0 + $0x18] sm:$0xff] }
 0x7f7   :  { %vm2046_vm1 = vcmp.ne.f32.partialorder %v1933_v43, 0.0 }
 0x7f8   :  { %v2819_v44 = vmul.f32 -1.442695, %v1791_v8  ;;  %v1798_v52 = vadd.f32 %v1719_v49, %v5931_v56  ;;  %v1934_v8 = vld [vmem:[%s5745_s0 + $0x8] sm:$0xff]  ;;  %v1937_v49 = vld [vmem:[%s5745_s0 + $0x20] sm:$0xff]  ;;  %v1939_v56 = vld [vmem:[%s5745_s0 + $0x30] sm:$0xff] }
 0x7f9   :  { %vm2047_vm2 = vcmp.ne.f32.partialorder %v1934_v8, 0.0  ;;  %vm2050_vm5 = vcmp.ne.f32.partialorder %v1937_v49, 0.0  ;;  %vm2052_vm6 = vcmp.ne.f32.partialorder %v1939_v56, 0.0 }
 0x7fa   :  { %3638 = vpow2.f32 %v2819_v44  ;;  %v2820_v10 = vmul.f32 -1.442695, %v1798_v52  ;;  %v1935_v44 = vld [vmem:[%s5745_s0 + $0x10] sm:$0xff] }
 0x7fb   :  { %vm2048_vm3 = vcmp.ne.f32.partialorder %v1935_v44, 0.0 }
 0x7fc   :  { %3640 = vpow2.f32 %v2820_v10  ;;  %v1938_v10 = vld [vmem:[%s5745_s0 + $0x28] sm:$0xff] }
 0x7fd   :  { %vm2051_vm7 = vcmp.ne.f32.partialorder %v1938_v10, 0.0 }
 0x807   :  { %v3639_v53 = vpop.eup %3638 }
 0x808   :  { %v1795_v11 = vadd.f32 1.0, %v3639_v53 }
 0x809   :  { %v3641_v54 = vpop.eup %3640 }
 0x80a   :  { %3642 = vrcp.f32 %v1795_v11  ;;  %v1802_v21 = vadd.f32 1.0, %v3641_v54  ;;  %v1940_v54 = vld [vmem:[%s5745_s0 + $0x38] sm:$0xff] }
 0x80b   :  { %vm2053_vm8 = vcmp.ne.f32.partialorder %v1940_v54, 0.0 }
 0x813   :  { %v3482_v1 = vpop.f32.mrf.mxu1 }
 0x815   :  { %v2007_v40 = vpop.f32.mrf.mxu1 }
 0x817   :  { %v3643_v17 = vpop.eup %3642  ;;  %v3485_v2 = vpop.f32.mrf.mxu1 }
 0x818   :  { %v1805_v3 = vmul.f32 %v3643_v17, %v1788_v15 }
 0x819   :  { %v2017_v41 = vpop.f32.mrf.mxu1 }
 0x81a   :  { %v1806_v20 = vadd.f32 %v1805_v3, %v5932_v19 }
 0x81b   :  { %v3488_v5 = vpop.f32.mrf.mxu1 }
 0x81c   :  { %3644 = vtanh.f32 %v1806_v20 }
 0x81d   :  { %3646 = vrcp.f32 %v1802_v21  ;;  %v2027_v52 = vpop.f32.mrf.mxu1 }
 0x829   :  { %v3645_v22 = vpop.eup %3644 }
 0x82a   :  { %v1808_v57 = vsub.f32 %v5273_v14, %v3645_v22  ;;  %v3647_v48 = vpop.eup %3646 }
 0x82c   :  { %v1809_v46 = vmul.f32 %v3647_v48, %v1808_v57 }
 0x82e   :  { %v1810_v29 = vadd.f32 %v3645_v22, %v1809_v46 }
 0x830   :  { %3490 = vmatmul.mubr.msk.f32.gmra.mxu1 %vm1816_vm0, %v1810_v29  ;;  %v1820_v36 = vsel %vm1816_vm0, %v1810_v29, %v5273_v14  ;;  %v5424_v45 = vsel %vm1816_vm0, %v1810_v29, 0.0  ;;  %v2843_v14 = vld [vmem:[%s5752_s10 + $0xe8] sm:$0xff]  ;;  %vm2522_vm0 = vcmask 1047559  }
 0x831   :  { %3446 = vmatmul.mubr.f32.vlgmr.msra.gmra.mxu0 %v1820_v36  ;;  %3559 = vmatprep.mubr.msk.f32.mxu1 %vm3762_vm4, %v5856_v28 }
 0x832   :  { %3493 = vmatpush3.msra.mxu0 %v2845_v42  ;;  %3524 = vmatprep.mubr.msk.f32.mxu0 %vm3762_vm4, %v5856_v28  ;;  %vm2049_vm4 = vcmp.ne.f32.partialorder %v1936_v9, 0.0  ;;  %v2829_v9 = vld [vmem:[%s5753_s9] ss:$0 sm:$0xff] }
 0x833   :  { %3494 = vmatprep.subr.mxu0 %v5856_v28 }
 0x834   :  { %3495 = vmatpush3.msra.mxu0 %v2844_v62 }
 0x835   :  { %3496 = vmatprep.subr.mxu0 %v5856_v28 }
 0x836   :  { %3497 = vmatpush3.msra.mxu0 %v2843_v14 }
 0x837   :  { %3498 = vmatprep.subr.mxu0 %v5856_v28 }
 0x838   :  { %3499 = vmatpush3.msra.mxu0 %v2842_v12 }
 0x839   :  { %3500 = vmatprep.subr.mxu0 %v5856_v28 }
 0x83a   :  { %3501 = vmatpush3.msra.mxu0 %v2841_v18 }
 0x83b   :  { %3502 = vmatprep.subr.mxu0 %v5856_v28 }
 0x83c   :  { %3503 = vmatpush3.msra.mxu0 %v2840_v13 }
 0x83d   :  { %3504 = vmatprep.subr.mxu0 %v5856_v28 }
 0x83e   :  { %3505 = vmatpush3.msra.mxu0 %v2839_v47 }
 0x83f   :  { %3506 = vmatprep.subr.mxu0 %v5856_v28 }
 0x840   :  { %3507 = vmatpush3.msra.mxu0 %v2838_v24 }
 0x841   :  { %3508 = vmatprep.subr.mxu0 %v5856_v28 }
 0x842   :  { %3509 = vmatpush3.msra.mxu0 %v2837_v23 }
 0x843   :  { %3510 = vmatprep.subr.mxu0 %v5856_v28 }
 0x844   :  { %3511 = vmatpush3.msra.mxu0 %v2836_v25 }
 0x845   :  { %3512 = vmatprep.subr.mxu0 %v5856_v28 }
 0x846   :  { %3513 = vmatpush3.msra.mxu0 %v2835_v30 }
 0x847   :  { %3514 = vmatprep.subr.mxu0 %v5856_v28 }
 0x848   :  { %3515 = vmatpush3.msra.mxu0 %v2834_v4 }
 0x849   :  { %3516 = vmatprep.subr.mxu0 %v5856_v28 }
 0x84a   :  { %3517 = vmatpush3.msra.mxu0 %v2833_v31 }
 0x84b   :  { %3518 = vmatprep.subr.mxu0 %v5856_v28 }
 0x84c   :  { %3519 = vmatpush3.msra.mxu0 %v2832_v32 }
 0x84d   :  { %3520 = vmatprep.subr.mxu0 %v5856_v28 }
 0x84e   :  { %3521 = vmatpush3.msra.mxu0 %v2831_v58 }
 0x84f   :  { %3522 = vmatprep.subr.mxu0 %v5856_v28 }
 0x850   :  { %3523 = vmatpush3.msra.mxu0 %v2830_v34 }
 0x851   :  { %3525 = vmatmul.mubr.f32.vlgmr.msra.gmra.mxu0 %v1820_v36 }
 0x8f0   :  { %v3491_v53 = vpop.f32.mrf.mxu1 }
 0x8f1   :  { %v1903_v11 = vpop.f32.mrf.mxu0 }
 0x8f2   :  { %v2054_v15 = vsel %vm2046_vm1, %v1903_v11, 0.0  ;;  %v2055_v17 = vsel %vm2047_vm2, %v1903_v11, 0.0  ;;  %v2056_v3 = vsel %vm2048_vm3, %v1903_v11, 0.0  ;;  %v2057_v19 = vsel %vm2049_vm4, %v1903_v11, 0.0  ;;  %v2037_v20 = vpop.f32.mrf.mxu1 }
 0x8f3   :  { %v2058_v21 = vsel %vm2050_vm5, %v1903_v11, 0.0  ;;  %v2060_v22 = vsel %vm2052_vm6, %v1903_v11, 0.0  ;;  %v3447_v57 = vpop.f32.mrf.mxu0  ;;  %v2063_v60 = vadd.f32 %v3482_v1, %v2055_v17  ;;  %v2062_v46 = vadd.f32 %v2054_v15, %v2007_v40 }
 0x8f4   :  { %v2068_v48 = vadd.f32 %v2060_v22, %v2037_v20  ;;  %v2066_v29 = vadd.f32 %v2058_v21, %v2027_v52  ;;  %v2059_v42 = vsel %vm2051_vm7, %v1903_v11, 0.0  ;;  %v2064_v36 = vadd.f32 %v2056_v3, %v2017_v41 }
 0x8f5   :  { %v2065_v62 = vadd.f32 %v3485_v2, %v2057_v19  ;;  %v2822_v12 = vmul.f32 -1.442695, %v2063_v60  ;;  %v2821_v18 = vmul.f32 -1.442695, %v2062_v46  ;;  %v2067_v24 = vadd.f32 %v3488_v5, %v2059_v42  ;;  %v2173_v60 = vld [vmem:[%s5752_s10 + $0x48] sm:$0xff]  ;;  %v2172_v46 = vld [vmem:[%s5752_s10 + $0x40] sm:$0xff] }
 0x8f6   :  { %v2827_v14 = vmul.f32 -1.442695, %v2068_v48  ;;  %v2825_v13 = vmul.f32 -1.442695, %v2066_v29  ;;  %v2823_v47 = vmul.f32 -1.442695, %v2064_v36  ;;  %3540 = vmatpush3.msra.mxu1 %v2173_v60 }
 0x8f7   :  { %v2061_v23 = vsel %vm2053_vm8, %v1903_v11, 0.0  ;;  %v2824_v25 = vmul.f32 -1.442695, %v2065_v62  ;;  %v2826_v30 = vmul.f32 -1.442695, %v2067_v24  ;;  %3541 = vmatprep.subr.mxu1 %v5856_v28  ;;  %v2171_v42 = vld [vmem:[%s5752_s10 + $0x38] sm:$0xff] }
 0x8f8   :  { %3648 = vpow2.f32 %v2827_v14  ;;  %v2069_v4 = vadd.f32 %v3491_v53, %v2061_v23  ;;  %3542 = vmatpush3.msra.mxu1 %v2172_v46  ;;  %v2170_v36 = vld [vmem:[%s5752_s10 + $0x30] sm:$0xff]  ;;  %v2169_v62 = vld [vmem:[%s5752_s10 + $0x28] sm:$0xff]  ;;  %v2168_v14 = vld [vmem:[%s5752_s10 + $0x20] sm:$0xff]  ;;  %vm2525_vm1 = vcmask 48128  }
 0x8f9   :  { %3650 = vpow2.f32 %v2822_v12  ;;  %3543 = vmatprep.subr.mxu1 %v5856_v28  ;;  %v2167_v12 = vld [vmem:[%s5752_s10 + $0x18] sm:$0xff] }
 0x8fa   :  { %3652 = vpow2.f32 %v2821_v18  ;;  %v2828_v31 = vmul.f32 -1.442695, %v2069_v4  ;;  %3544 = vmatpush3.msra.mxu1 %v2171_v42  ;;  %v2166_v18 = vld [vmem:[%s5752_s10 + $0x10] sm:$0xff] }
 0x8fb   :  { %3654 = vpow2.f32 %v2825_v13  ;;  %3545 = vmatprep.subr.mxu1 %v5856_v28  ;;  %v2165_v13 = vld [vmem:[%s5752_s10 + $0x8] sm:$0xff]  ;;  %v5933_v4 = vld [vmem:[#allocation10_spill] sm:$0xff] }
 0x8fc   :  { %3656 = vpow2.f32 %v2823_v47  ;;  %3546 = vmatpush3.msra.mxu1 %v2170_v36  ;;  %v2164_v47 = vld [vmem:[%s5752_s10] sm:$0xff] }
 0x8fd   :  { %3658 = vpow2.f32 %v2824_v25  ;;  %3547 = vmatprep.subr.mxu1 %v5856_v28  ;;  %v767_v25 = vsel %vm766_vm10, %v5922_v27, 0.0  ;;  %v1292_v27 = vsel %vm1291_vm13, %v5928_v39, 0.0  ;;  %v3763_v39 = vmov 1966171168  }
 0x8fe   :  { %3660 = vpow2.f32 %v2826_v30  ;;  %3548 = vmatpush3.msra.mxu1 %v2169_v62  ;;  %v2348_v7 = vunpack.c.l.s4 %v3763_v39  ;;  %vm2510_vm10 = vcmask 1041409   ;;  %vm2516_vm13 = vcmask 1044484  }
 0x8ff   :  { %3662 = vpow2.f32 %v2828_v31  ;;  %3549 = vmatprep.subr.mxu1 %v5856_v28 }
 0x900   :  { %3550 = vmatpush3.msra.mxu1 %v2168_v14 }
 0x901   :  { %3551 = vmatprep.subr.mxu1 %v5856_v28 }
 0x902   :  { %3552 = vmatpush3.msra.mxu1 %v2167_v12 }
 0x903   :  { %3553 = vmatprep.subr.mxu1 %v5856_v28 }
 0x904   :  { %3554 = vmatpush3.msra.mxu1 %v2166_v18 }
 0x905   :  { %v3649_v32 = vpop.eup %3648  ;;  %3555 = vmatprep.subr.mxu1 %v5856_v28 }
 0x906   :  { %v3651_v58 = vpop.eup %3650  ;;  %v2100_v40 = vadd.f32 1.0, %v3649_v32  ;;  %3556 = vmatpush3.msra.mxu1 %v2165_v13 }
 0x907   :  { %v3653_v34 = vpop.eup %3652  ;;  %v2095_v59 = vadd.f32 1.0, %v3651_v58  ;;  %3557 = vmatprep.subr.mxu1 %v5856_v28  ;;  %v942_v58 = vsel %vm941_vm11, %v5924_v33, 0.0  ;;  %v1117_v28 = vsel %vm1116_vm12, %v5926_v51, 0.0  ;;  %v1467_v33 = vsel %vm1466_vm14, %v5180_v50, 0.0 }
 0x908   :  { %v3655_v35 = vpop.eup %3654  ;;  %v2094_v61 = vadd.f32 1.0, %v3653_v34  ;;  %3558 = vmatpush3.msra.mxu1 %v2164_v47  ;;  %v2341_v47 = vld [vmem:[%s5754_s2 + $0x20] sm:$0x3f]  ;;  %vm2512_vm11 = vcmask 1042434   ;;  %vm2514_vm12 = vcmask 1043459   ;;  %vm2518_vm14 = vcmask 1045509  }
 0x909   :  { %v3657_v37 = vpop.eup %3656  ;;  %3664 = vrcp.f32 %v2095_v59  ;;  %v2098_v0 = vadd.f32 1.0, %v3655_v35 }
 0x90a   :  { %v3659_v38 = vpop.eup %3658  ;;  %3666 = vrcp.f32 %v2094_v61  ;;  %v2096_v1 = vadd.f32 1.0, %v3657_v37 }
 0x90b   :  { %3668 = vrcp.f32 %v2098_v0  ;;  %v2097_v2 = vadd.f32 1.0, %v3659_v38  ;;  %v3661_v41 = vpop.eup %3660 }
 0x90c   :  { %3670 = vrcp.f32 %v2096_v1  ;;  %v2099_v5 = vadd.f32 1.0, %v3661_v41  ;;  %v3663_v43 = vpop.eup %3662 }
 0x90d   :  { %3672 = vrcp.f32 %v2100_v40  ;;  %v2101_v49 = vadd.f32 1.0, %v3663_v43 }
 0x90e   :  { %3674 = vrcp.f32 %v2097_v2 }
 0x90f   :  { %3676 = vrcp.f32 %v2099_v5 }
 0x910   :  { %3678 = vrcp.f32 %v2101_v49  ;;  %v5934_v49 = vld [vmem:[#allocation13_spill] sm:$0xff] }
 0x911   :  { %v5538_v8 = vpop.f32.mrf.mxu0 }
 0x913   :  { %v3526_v44 = vpop.f32.mrf.mxu0 }
 0x916   :  { %v3665_v56 = vpop.eup %3664 }
 0x917   :  { %v3667_v52 = vpop.eup %3666  ;;  %v2125_v10 = vmul.f32 %v3665_v56, %v2829_v9 }
 0x918   :  { %v3669_v53 = vpop.eup %3668  ;;  %v2124_v11 = vmul.f32 %v3667_v52, %v2829_v9 }
 0x919   :  { %v3671_v54 = vpop.eup %3670  ;;  %2134 = vadd.xlane.f32.xlu1 %v2125_v10  ;;  %v2128_v15 = vmul.f32 %v3669_v53, %v2829_v9 }
 0x91a   :  { %2132 = vadd.xlane.f32.xlu0 %v2124_v11  ;;  %v3673_v17 = vpop.eup %3672  ;;  %v2126_v3 = vmul.f32 %v3671_v54, %v2829_v9 }
 0x91b   :  { %v3675_v19 = vpop.eup %3674  ;;  %v2130_v20 = vmul.f32 %v3673_v17, %v2829_v9  ;;  %v5935_v17 = vld [vmem:[#allocation14_spill] sm:$0xff] }
 0x91c   :  { %v2127_v21 = vmul.f32 %v3675_v19, %v2829_v9  ;;  %v3677_v22 = vpop.eup %3676 }
 0x91d   :  { %2140 = vadd.xlane.f32.xlu1 %v2128_v15  ;;  %v2129_v57 = vmul.f32 %v3677_v22, %v2829_v9  ;;  %v3679_v48 = vpop.eup %3678 }
 0x91e   :  { %2136 = vadd.xlane.f32.xlu0 %v2126_v3  ;;  %v2131_v29 = vmul.f32 %v3679_v48, %v2829_v9  ;;  %v2349_v9 = vunpack.c.0.s8 %v2348_v7 }
 0x920   :  { %v2352_v56 = vsub.s32 %v2349_v9, %v5934_v49 }
 0x921   :  { %2144 = vadd.xlane.f32.xlu1 %v2130_v20 }
 0x922   :  { %2138 = vadd.xlane.f32.xlu0 %v2127_v21  ;;  %v2339_v21 = vld [vmem:[%s5754_s2 + $0x10] sm:$0x3f] }
 0x926   :  { %2142 = vadd.xlane.f32.xlu0 %v2129_v57 }
 0x92a   :  { %2146 = vadd.xlane.f32.xlu0 %v2131_v29  ;;  %v2340_v29 = vld [vmem:[%s5754_s2 + $0x18] sm:$0x3f] }
 0x9a2   :  { %v2135_v24 = vpop.xlane.xlu1 %2134 }
 0x9a3   :  { %v2133_v23 = vpop.xlane.xlu0 %2132  ;;  %v2149_v30 = vmul.f32 %v2135_v24, %v767_v25 }
 0x9a4   :  { %v2148_v31 = vmul.f32 %v2133_v23, %v5933_v4  ;;  %v2342_v4 = vld [vmem:[%s5754_s2 + $0x28] sm:$0x3f] }
 0x9a6   :  { %v2141_v59 = vpop.xlane.xlu1 %2140  ;;  %v2156_v35 = vadd.f32 %v2149_v30, %v2148_v31 }
 0x9a7   :  { %v2137_v32 = vpop.xlane.xlu0 %2136  ;;  %v2152_v63 = vmul.f32 %v2141_v59, %v1292_v27 }
 0x9a8   :  { %v2150_v34 = vmul.f32 %v2137_v32, %v942_v58 }
 0x9aa   :  { %v2157_v37 = vadd.f32 %v2156_v35, %v2150_v34  ;;  %v2145_v1 = vpop.xlane.xlu1 %2144  ;;  %v2343_v34 = vld [vmem:[%s5754_s2 + $0x30] sm:$0x3f] }
 0x9ab   :  { %v2139_v61 = vpop.xlane.xlu0 %2138  ;;  %v2154_v41 = vmul.f32 %v2145_v1, %v5280_v16 }
 0x9ac   :  { %v2151_v0 = vmul.f32 %v2139_v61, %v1117_v28  ;;  %v2344_v28 = vld [vmem:[%s5754_s2 + $0x38] sm:$0x3f] }
 0x9ae   :  { %v2158_v38 = vadd.f32 %v2157_v37, %v2151_v0 }
 0x9af   :  { %v2143_v40 = vpop.xlane.xlu0 %2142 }
 0x9b0   :  { %v2153_v6 = vmul.f32 %v2143_v40, %v1467_v33  ;;  %v2159_v2 = vadd.f32 %v2158_v38, %v2152_v63  ;;  %v5936_v40 = vlaneseq }
 0x9b2   :  { %v2160_v55 = vadd.f32 %v2159_v2, %v2153_v6  ;;  %v2477_v33 = vand.u32 127, %v5936_v40 }
 0x9b3   :  { %v2147_v51 = vpop.xlane.xlu0 %2146 }
 0x9b4   :  { %v2155_v5 = vmul.f32 %v2147_v51, %v5424_v45  ;;  %v2161_v43 = vadd.f32 %v2160_v55, %v2154_v41  ;;  %v2337_v45 = vld [vmem:[%s5754_s2] sm:$0x3f]  ;;  %v5644_v6 = vsub.s32 %v2477_v33, %v5934_v49 }
 0x9b6   :  { %v2162_v44 = vadd.f32 %v2161_v43, %v2155_v5 }
 0x9b8   :  { %3560 = vmatmul.mubr.f32.vlgmr.msra.gmra.mxu1 %v2162_v44 }
 0xa78   :  { %v2333_v52 = vpop.f32.mrf.mxu1 }
 0xa79   :  { %v2334_v26 = vadd.f32 %v2333_v52, %v5538_v8  ;;  %v2338_v8 = vld [vmem:[%s5754_s2 + $0x8] sm:$0x3f] }
 0xa7a   :  { %v3561_v50 = vpop.f32.mrf.mxu1 }
 0xa7b   :  { %v2346_v10 = vcombine.high %v2334_v26, %v2334_v26  ;;  %v2353_v53 = vrot.slane %v2334_v26, %v2352_v56 }
 0xa7d   :  { %v2360_v11 = vrot.slane %v2346_v10, %v2352_v56  ;;  %v2361_v16 = vcombine.high %v2353_v53, %v2353_v53  ;;  %v2369_v54 = vrot.slane %v2353_v53, %v2352_v56 }
 0xa7f   :  { %v2362_v15 = vcombine.high %v2360_v11, %v2360_v11  ;;  %v2398_v3 = vrot.slane %v2369_v54, %v5935_v17  ;;  %v2383_v19 = vrot.slane %v2361_v16, %v2352_v56  ;;  %v2391_v20 = vcombine.high %v2369_v54, %v2369_v54 }
 0xa80   :  { %v2376_v22 = vrot.slane %v2360_v11, %v2352_v56 }
 0xa81   :  { %v2435_v57 = vmul.f32 %v2398_v3, %v2337_v45  ;;  %v2402_v48 = vrot.slane %v2383_v19, %v5935_v17  ;;  %v2406_v60 = vrot.slane %v2391_v20, %v5935_v17  ;;  %v2393_v46 = vcombine.high %v2383_v19, %v2383_v19 }
 0xa82   :  { %v2414_v42 = vrot.slane %v2376_v22, %v5935_v17  ;;  %v2390_v36 = vrot.slane %v2362_v15, %v2352_v56  ;;  %v2392_v62 = vcombine.high %v2376_v22, %v2376_v22  ;;  %v2548_v22 = vsub.s32 4, %v5934_v49 }
 0xa83   :  { %v2444_v14 = vsel %vm2443_vm9, %v2435_v57, 0.0  ;;  %v2436_v12 = vmul.f32 %v2402_v48, %v2338_v8  ;;  %v2437_v18 = vmul.f32 %v2406_v60, %v2339_v21  ;;  %v2410_v13 = vrot.slane %v2393_v46, %v5935_v17  ;;  %v5937_v60 = vld [vmem:[#allocation15_spill] sm:$0xff] }
 0xa84   :  { %2445 = vadd.xlane.f32.xlu1 %v2444_v14  ;;  %v2418_v25 = vrot.slane %v2390_v36, %v5935_v17  ;;  %v2394_v30 = vcombine.high %v2390_v36, %v2390_v36  ;;  %v2439_v32 = vmul.f32 %v2414_v42, %v2341_v47  ;;  %v2422_v58 = vrot.slane %v2392_v62, %v5935_v17 }
 0xa85   :  { %v2447_v24 = vsel %vm2443_vm9, %v2436_v12, 0.0  ;;  %v2438_v23 = vmul.f32 %v2410_v13, %v2340_v29  ;;  %v2450_v31 = vsel %vm2443_vm9, %v2437_v18, 0.0  ;;  %v2544_v8 = vsub.s32 3, %v5934_v49  ;;  %v5938_v29 = vld [vmem:[#allocation24_spill] sm:$0xff] }
 0xa86   :  { %2448 = vadd.xlane.f32.xlu0 %v2447_v24  ;;  %v2440_v35 = vmul.f32 %v2418_v25, %v2342_v4  ;;  %v2426_v61 = vrot.slane %v2394_v30, %v5935_v17  ;;  %v2456_v37 = vsel %vm2443_vm9, %v2439_v32, 0.0  ;;  %v2441_v0 = vmul.f32 %v2422_v58, %v2343_v34 }
 0xa87   :  { %v2453_v59 = vsel %vm2443_vm9, %v2438_v23, 0.0  ;;  %v2552_v21 = vsub.s32 5, %v5934_v49  ;;  %v2560_v62 = vsub.s32 7, %v5934_v49  ;;  %v2556_v47 = vsub.s32 6, %v5934_v49 }
 0xa88   :  { %2451 = vadd.xlane.f32.xlu1 %v2450_v31  ;;  %v2459_v27 = vsel %vm2443_vm9, %v2440_v35, 0.0  ;;  %v2442_v63 = vmul.f32 %v2426_v61, %v2344_v28  ;;  %v2462_v38 = vsel %vm2443_vm9, %v2441_v0, 0.0 }
 0xa8a   :  { %2454 = vadd.xlane.f32.xlu0 %v2453_v59  ;;  %v2465_v1 = vsel %vm2443_vm9, %v2442_v63, 0.0 }
 0xa8c   :  { %2457 = vadd.xlane.f32.xlu1 %v2456_v37 }
 0xa8e   :  { %2460 = vadd.xlane.f32.xlu0 %v2459_v27 }
 0xa90   :  { %2463 = vadd.xlane.f32.xlu1 %v2462_v38 }
 0xa92   :  { %2466 = vadd.xlane.f32.xlu0 %v2465_v1 }
 0xb0d   :  { %v2446_v2 = vpop.xlane.xlu1 %2445 }
 0xb0e   :  { %v2481_v55 = vrot.slane %v2446_v2, %v5644_v6 }
 0xb0f   :  { %v2449_v41 = vpop.xlane.xlu0 %2448 }
 0xb10   :  { %v2485_v51 = vrot.slane %v2449_v41, %v5644_v6 }
 0xb11   :  { %v2452_v5 = vpop.xlane.xlu1 %2451 }
 0xb12   :  { %v2511_v43 = vsel %vm2510_vm10, %v2485_v51, %v2481_v55  ;;  %v2489_v44 = vrot.slane %v2452_v5, %v5644_v6 }
 0xb13   :  { %v2455_v39 = vpop.xlane.xlu0 %2454 }
 0xb14   :  { %v2513_v7 = vsel %vm2512_vm11, %v2489_v44, %v2511_v43  ;;  %v2493_v9 = vrot.slane %v2455_v39, %v5644_v6 }
 0xb15   :  { %v2458_v56 = vpop.xlane.xlu1 %2457 }
 0xb16   :  { %v2515_v52 = vsel %vm2514_vm12, %v2493_v9, %v2513_v7  ;;  %v2497_v26 = vrot.slane %v2458_v56, %v5644_v6 }
 0xb17   :  { %v2461_v50 = vpop.xlane.xlu0 %2460 }
 0xb18   :  { %v2517_v10 = vsel %vm2516_vm13, %v2497_v26, %v2515_v52  ;;  %v2501_v53 = vrot.slane %v2461_v50, %v5644_v6 }
 0xb19   :  { %v2464_v11 = vpop.xlane.xlu1 %2463 }
 0xb1a   :  { %v2505_v16 = vrot.slane %v2464_v11, %v5644_v6  ;;  %v2519_v54 = vsel %vm2518_vm14, %v2501_v53, %v2517_v10 }
 0xb1b   :  { %v2467_v45 = vpop.xlane.xlu0 %2466 }
 0xb1c   :  { %v2509_v15 = vrot.slane %v2467_v45, %v5644_v6  ;;  %v2521_v3 = vsel %vm2520_vm15, %v2505_v16, %v2519_v54 }
 0xb1e   :  { %v2523_v19 = vsel %vm2522_vm0, %v2509_v15, %v2521_v3 }
 0xb1f   :  { %v2526_v20 = vsel %vm2525_vm1, %v2523_v19, -inf }
 0xb20   :  { %2527 = vmax.xlane.f32.xlu1 %v2526_v20 }
 0xba9   :  { %v2528_v57 = vpop.xlane.xlu1 %2527 }
 0xbaa   :  { %v2533_v48 = vrot.slane %v2528_v57, %v5935_v17  ;;  %v2537_v46 = vrot.slane %v2528_v57, %v5937_v60  ;;  %v2541_v42 = vrot.slane %v2528_v57, %v5938_v29  ;;  %v2545_v36 = vrot.slane %v2528_v57, %v2544_v8 }
 0xbab   :  { %v2553_v14 = vrot.slane %v2528_v57, %v2552_v21  ;;  %v2549_v24 = vrot.slane %v2528_v57, %v2548_v22  ;;  %v2561_v4 = vrot.slane %v2528_v57, %v2560_v62  ;;  %v2557_v58 = vrot.slane %v2528_v57, %v2556_v47 }
 0xbac   :  { %v2570_v12 = vsub.f32 %v2446_v2, %v2533_v48  ;;  %v2571_v18 = vsub.f32 %v2449_v41, %v2537_v46  ;;  %v2573_v13 = vsub.f32 %v2455_v39, %v2545_v36  ;;  %v2572_v23 = vsub.f32 %v2452_v5, %v2541_v42 }
 0xbad   :  { %v2575_v31 = vsub.f32 %v2461_v50, %v2553_v14  ;;  %v2574_v34 = vsub.f32 %v2458_v56, %v2549_v24  ;;  %v2577_v35 = vsub.f32 %v2467_v45, %v2561_v4  ;;  %v2576_v28 = vsub.f32 %v2464_v11, %v2557_v58 }
 0xbae   :  { %v2578_v25 = vmul.f32 1.442695, %v2570_v12  ;;  %v2580_v30 = vmul.f32 1.442695, %v2571_v18  ;;  %v2584_v32 = vmul.f32 1.442695, %v2573_v13 }
 0xbaf   :  { %v2582_v59 = vmul.f32 1.442695, %v2572_v23  ;;  %v2588_v61 = vmul.f32 1.442695, %v2575_v31  ;;  %v2586_v37 = vmul.f32 1.442695, %v2574_v34 }
 0xbb0   :  { %3680 = vpow2.f32 %v2578_v25  ;;  %v2592_v0 = vmul.f32 1.442695, %v2577_v35  ;;  %v2590_v27 = vmul.f32 1.442695, %v2576_v28 }
 0xbb1   :  { %3682 = vpow2.f32 %v2580_v30 }
 0xbb2   :  { %3684 = vpow2.f32 %v2584_v32 }
 0xbb3   :  { %3686 = vpow2.f32 %v2582_v59 }
 0xbb4   :  { %3688 = vpow2.f32 %v2588_v61 }
 0xbb5   :  { %3690 = vpow2.f32 %v2586_v37 }
 0xbb6   :  { %3692 = vpow2.f32 %v2592_v0 }
 0xbb7   :  { %3694 = vpow2.f32 %v2590_v27 }
 0xbbd   :  { %v3681_v63 = vpop.eup %3680 }
 0xbbe   :  { %v3683_v38 = vpop.eup %3682  ;;  %2603 = vperm.xlu0 %3566, %v3681_v63  }
 0xbbf   :  { %2606 = vperm.xlu1 %3567, %v3683_v38   ;;  %v5680_v1 = vpop.eup %3684 }
 0xbc0   :  { %v3687_v40 = vpop.eup %3686 }
 0xbc1   :  { %v5683_v33 = vpop.eup %3688 }
 0xbc2   :  { %2612 = vperm.xlu0 %3566, %v5680_v1   ;;  %v3691_v2 = vpop.eup %3690 }
 0xbc3   :  { %2609 = vperm.xlu1 %3567, %v3687_v40   ;;  %v5686_v41 = vpop.eup %3692 }
 0xbc4   :  { %v5688_v55 = vpop.eup %3694 }
 0xbc6   :  { %2618 = vperm.xlu0 %3566, %v5683_v33  }
 0xbc7   :  { %2615 = vperm.xlu1 %3567, %v3691_v2  }
 0xbca   :  { %2624 = vperm.xlu0 %3566, %v5686_v41  }
 0xbcb   :  { %2621 = vperm.xlu1 %3567, %v5688_v55  }
 0xc39   :  { %v2604_v51 = vpop.permute.xlu0 %2603 }
 0xc3a   :  { %v2607_v5 = vpop.permute.xlu1 %2606  ;;  %v2629_v44 = vrot.slane %v2604_v51, %v5644_v6 }
 0xc3b   :  { %v2633_v43 = vrot.slane %v2607_v5, %v5644_v6 }
 0xc3d   :  { %v2613_v39 = vpop.permute.xlu0 %2612  ;;  %v2658_v56 = vsel %vm2510_vm10, %v2633_v43, %v2629_v44 }
 0xc3e   :  { %v2610_v7 = vpop.permute.xlu1 %2609  ;;  %v2641_v52 = vrot.slane %v2613_v39, %v5644_v6 }
 0xc3f   :  { %v2637_v9 = vrot.slane %v2610_v7, %v5644_v6 }
 0xc41   :  { %v2659_v26 = vsel %vm2512_vm11, %v2637_v9, %v2658_v56  ;;  %v2619_v50 = vpop.permute.xlu0 %2618 }
 0xc42   :  { %v2616_v10 = vpop.permute.xlu1 %2615  ;;  %v2660_v11 = vsel %vm2514_vm12, %v2641_v52, %v2659_v26  ;;  %v2649_v16 = vrot.slane %v2619_v50, %v5644_v6 }
 0xc43   :  { %v2645_v53 = vrot.slane %v2616_v10, %v5644_v6 }
 0xc45   :  { %v2661_v54 = vsel %vm2516_vm13, %v2645_v53, %v2660_v11  ;;  %v2625_v45 = vpop.permute.xlu0 %2624 }
 0xc46   :  { %v2622_v15 = vpop.permute.xlu1 %2621  ;;  %v2657_v3 = vrot.slane %v2625_v45, %v5644_v6  ;;  %v2662_v20 = vsel %vm2518_vm14, %v2649_v16, %v2661_v54 }
 0xc47   :  { %v2653_v19 = vrot.slane %v2622_v15, %v5644_v6 }
 0xc49   :  { %v2663_v57 = vsel %vm2520_vm15, %v2653_v19, %v2662_v20 }
 0xc4a   :  { %v2664_v48 = vsel %vm2522_vm0, %v2657_v3, %v2663_v57 }
 0xc4b   :  { %v2666_v46 = vsel %vm2525_vm1, %v2664_v48, 0.0 }
 0xc4c   :  { %2667 = vadd.xlane.f32.xlu1 %v2666_v46 }
 0xcd5   :  { %v2668_v42 = vpop.xlane.xlu1 %2667 }
 0xcd6   :  { %v2673_v36 = vrot.slane %v2668_v42, %v5935_v17  ;;  %v2677_v14 = vrot.slane %v2668_v42, %v5937_v60  ;;  %v2681_v12 = vrot.slane %v2668_v42, %v5938_v29  ;;  %v2685_v18 = vrot.slane %v2668_v42, %v2544_v8 }
 0xcd7   :  { %v2689_v13 = vrot.slane %v2668_v42, %v2548_v22  ;;  %v2693_v23 = vrot.slane %v2668_v42, %v2552_v21  ;;  %v2697_v60 = vrot.slane %v2668_v42, %v2556_v47  ;;  %v2701_v8 = vrot.slane %v2668_v42, %v2560_v62 }
 0xcd8   :  { %3696 = vrcp.f32 %v2673_v36 }
 0xcd9   :  { %3698 = vrcp.f32 %v2677_v14 }
 0xcda   :  { %3700 = vrcp.f32 %v2681_v12 }
 0xcdb   :  { %3702 = vrcp.f32 %v2685_v18 }
 0xcdc   :  { %3704 = vrcp.f32 %v2689_v13 }
 0xcdd   :  { %3706 = vrcp.f32 %v2693_v23 }
 0xcde   :  { %3708 = vrcp.f32 %v2697_v60 }
 0xcdf   :  { %3710 = vrcp.f32 %v2701_v8 }
 0xce5   :  { %v3697_v24 = vpop.eup %3696 }
 0xce6   :  { %v2711_v17 = vmul.f32 %v3697_v24, %v3681_v63  ;;  %v3699_v25 = vpop.eup %3698 }
 0xce7   :  { %v2713_v29 = vmul.f32 %v3699_v25, %v3683_v38  ;;  %v3701_v30 = vpop.eup %3700 }
 0xce8   :  { %2735 = vperm.xlu0 %3566, %v2711_v17   ;;  %v2715_v22 = vmul.f32 %v3701_v30, %v3687_v40  ;;  %v3703_v4 = vpop.eup %3702 }
 0xce9   :  { %v2717_v21 = vmul.f32 %v3703_v4, %v5680_v1  ;;  %v3705_v31 = vpop.eup %3704 }
 0xcea   :  { %v2719_v32 = vmul.f32 %v3705_v31, %v3691_v2  ;;  %v3707_v58 = vpop.eup %3706 }
 0xceb   :  { %v2721_v47 = vmul.f32 %v3707_v58, %v5683_v33  ;;  %v3709_v34 = vpop.eup %3708 }
 0xcec   :  { %2738 = vperm.xlu0 %3566, %v2713_v29   ;;  %v2723_v59 = vmul.f32 %v3709_v34, %v5688_v55  ;;  %v3711_v49 = vpop.eup %3710 }
 0xced   :  { %v2725_v62 = vmul.f32 %v3711_v49, %v5686_v41 }
 0xcf0   :  { %2741 = vperm.xlu0 %3566, %v2715_v22  }
 0xcf4   :  { %2744 = vperm.xlu0 %3566, %v2717_v21  }
 0xcf8   :  { %2747 = vperm.xlu0 %3566, %v2719_v32  }
 0xcfc   :  { %2750 = vperm.xlu0 %3566, %v2721_v47  }
 0xd00   :  { %2753 = vperm.xlu0 %3566, %v2723_v59  }
 0xd04   :  { %2756 = vperm.xlu0 %3566, %v2725_v62  }
 0xd63   :  { %v2736_v35 = vpop.permute.xlu0 %2735 }
 0xd64   :  { %v2761_v1 = vrot.slane %v2736_v35, %v5644_v6 }
 0xd67   :  { %v2739_v61 = vpop.permute.xlu0 %2738 }
 0xd68   :  { %v2765_v63 = vrot.slane %v2739_v61, %v5644_v6 }
 0xd6a   :  { %v2790_v41 = vsel %vm2510_vm10, %v2765_v63, %v2761_v1 }
 0xd6b   :  { %v2742_v28 = vpop.permute.xlu0 %2741 }
 0xd6c   :  { %v2769_v38 = vrot.slane %v2742_v28, %v5644_v6 }
 0xd6e   :  { %v2791_v51 = vsel %vm2512_vm11, %v2769_v38, %v2790_v41 }
 0xd6f   :  { %v2745_v37 = vpop.permute.xlu0 %2744 }
 0xd70   :  { %v2773_v40 = vrot.slane %v2745_v37, %v5644_v6 }
 0xd72   :  { %v2792_v43 = vsel %vm2514_vm12, %v2773_v40, %v2791_v51 }
 0xd73   :  { %v2748_v0 = vpop.permute.xlu0 %2747 }
 0xd74   :  { %v2777_v33 = vrot.slane %v2748_v0, %v5644_v6 }
 0xd76   :  { %v2793_v44 = vsel %vm2516_vm13, %v2777_v33, %v2792_v43 }
 0xd77   :  { %v2751_v27 = vpop.permute.xlu0 %2750 }
 0xd78   :  { %v2781_v55 = vrot.slane %v2751_v27, %v5644_v6 }
 0xd7a   :  { %v2794_v7 = vsel %vm2518_vm14, %v2781_v55, %v2793_v44 }
 0xd7b   :  { %v2754_v2 = vpop.permute.xlu0 %2753 }
 0xd7c   :  { %v2785_v5 = vrot.slane %v2754_v2, %v5644_v6 }
 0xd7e   :  { %v2795_v56 = vsel %vm2520_vm15, %v2785_v5, %v2794_v7 }
 0xd7f   :  { %v2757_v39 = vpop.permute.xlu0 %2756 }
 0xd80   :  { %v2789_v9 = vrot.slane %v2757_v39, %v5644_v6 }
 0xd82   :  { %v2796_v52 = vsel %vm2522_vm0, %v2789_v9, %v2795_v56 }
 0xd83   :  { %2798 = vst.msk [vmem:[%s5755_s11] sm:$0xff] %vm2525_vm1, %v2796_v52 }

</bundles_post_ra>
